<compile_context>
chip_gen: v5e
topology: v5e:2x2
jax: 0.10.0
libtpu: 0.0.40
codegen_flags: <defaults>
</compile_context>

<pallas_src>
import functools

import jax
import jax.numpy as jnp
from jax.experimental import pallas as pl
from jax.experimental.pallas import tpu as pltpu


# For the sub-pixel upsample-conv: _ROW_SEL[phase][tap] = contributing 3x3 rows/cols.
_ROW_SEL = (((0,), (1, 2)), ((0, 1), (2,)))


# ----------------------------- host-side small helpers -----------------------------

def _group_indicator(C, G, dtype=jnp.float32):
    """(C, G) one-hot map channel -> GroupNorm group (PyTorch contiguous groups)."""
    cpg = C // G
    return (jnp.arange(C)[:, None] // cpg == jnp.arange(G)[None, :]).astype(dtype)


def _col_masks(H, W, dtype=jnp.float32):
    """(H*W, 2) validity masks for the dx=-1 / dx=+1 column taps in flat (H*W, C) layout."""
    w_idx = jnp.arange(H * W) % W
    left = (w_idx > 0)
    right = (w_idx < W - 1)
    return jnp.stack([left, right], axis=1).astype(dtype)


def _halo_pad(W):
    # front/back halo rows for the flattened layout (must cover a +-1 row shift),
    # rounded to an f32 sublane multiple.
    return ((W + 1 + 7) // 8) * 8


def _subpixel_weights(w):
    """3x3 HWIO conv weight -> (2,2,2,2,Cin,Cout) per-phase 2x2 weights equivalent to
    'nearest 2x upsample then 3x3 conv (pad=1)'."""
    phases_a = []
    for a in range(2):
        phases_b = []
        for b in range(2):
            taps_u = []
            for u in range(2):
                taps_v = []
                for v in range(2):
                    acc = jnp.zeros(w.shape[2:], w.dtype)
                    for ky in _ROW_SEL[a][u]:
                        for kx in _ROW_SEL[b][v]:
                            acc = acc + w[ky, kx]
                    taps_v.append(acc)
                taps_u.append(jnp.stack(taps_v))
            phases_b.append(jnp.stack(taps_u))
        phases_a.append(jnp.stack(phases_b))
    return jnp.stack(phases_a)


def _pack_subpixel_weights(w):
    """-> (2,2,2, 3*Cin, Cout): per (row-phase, col-phase, row-tap) weight; the two
    column taps are placed at K-block (dc+1) in {0,1,2} so they line up with the
    [dx=-1 | dx=0 | dx=+1] lane-concatenated activation scratch."""
    wp = _subpixel_weights(w)                      # (2,2,2,2,Cin,Cout)
    Cin, Cout = w.shape[2], w.shape[3]
    zero = jnp.zeros((Cin, Cout), w.dtype)
    rows = []
    for pa in range(2):
        cols = []
        for pb in range(2):
            us = []
            for u in range(2):
                blocks = [zero, zero, zero]
                for v in range(2):
                    blocks[pb + v] = wp[pa, pb, u, v]      # dc = pb-1+v -> block dc+1
                us.append(jnp.concatenate(blocks, axis=0))  # (3*Cin, Cout)
            cols.append(jnp.stack(us))
        rows.append(jnp.stack(cols))
    return jnp.stack(rows)                          # (2,2,2,3*Cin,Cout)


# ----------------------------- in-kernel helpers (traced) -----------------------------

def _zero_halo(pad_ref, M, P):
    """Zero only the halo rows; interior rows [P:P+M) are fully rewritten each step."""
    rows, lanes = pad_ref.shape
    pad_ref[0:P, :] = jnp.zeros((P, lanes), pad_ref.dtype)
    pad_ref[P + M:rows, :] = jnp.zeros((rows - P - M, lanes), pad_ref.dtype)


def _store_tap_blocks(pad_ref, act, ml, mr, P):
    """Write [shift(act,+1)*ml | act | shift(act,-1)*mr] as three lane-concatenated
    blocks into rows [P:P+M) of the padded scratch (casting to the scratch dtype).
    The column shift + edge masking is done ONCE here instead of per conv tap."""
    M, C = act.shape
    zr = jnp.zeros((1, C), act.dtype)
    left = jnp.concatenate([zr, act[:-1, :]], axis=0) * ml    # value at m from m-1
    right = jnp.concatenate([act[1:, :], zr], axis=0) * mr    # value at m from m+1
    pad_ref[P:P + M, 0:C] = left.astype(pad_ref.dtype)
    pad_ref[P:P + M, C:2 * C] = act.astype(pad_ref.dtype)
    pad_ref[P:P + M, 2 * C:3 * C] = right.astype(pad_ref.dtype)


def _conv3x3_rows(pad_ref, w_ref, M, W, P):
    """3x3 conv as 3 MXU dots: one (M, 3*C) x (3*C, Cout) dot per kernel row ky."""
    acc = jnp.zeros((M, w_ref.shape[-1]), jnp.float32)
    for ky in range(3):
        off = P + (ky - 1) * W
        acc = acc + jnp.dot(pad_ref[off:off + M, :], w_ref[ky],
                            preferred_element_type=jnp.float32)
    return acc


def _group_norm_silu(x, gb_ref, ind_ref, indt_ref, eps):
    """GroupNorm (f32 stats via two tiny MXU dots) followed by SiLU."""
    f32 = jnp.float32
    M, C = x.shape
    G = ind_ref.shape[1]
    inv_n = 1.0 / float(M * (C // G))
    s = jnp.sum(x, axis=0, keepdims=True)                       # (1, C)
    q = jnp.sum(x * x, axis=0, keepdims=True)
    # TODO(synk): E[x^2]-E[x]^2 in f32; switch to a shifted/two-pass form if inputs
    #             ever carry large per-channel means.
    st = jnp.dot(jnp.concatenate([s, q], axis=0), ind_ref[...],
                 preferred_element_type=f32) * inv_n             # (2, G)
    st = jnp.dot(st, indt_ref[...], preferred_element_type=f32)  # (2, C)
    mean = st[0:1]
    var = st[1:2] - mean * mean
    y = (x - mean) * jax.lax.rsqrt(var + eps) * gb_ref[0:1] + gb_ref[1:2]
    return y * jax.nn.sigmoid(y)


# ----------------------------- Pallas kernels -----------------------------

def _resnet_block_kernel(*refs, eps, W, P, inv_scale, has_shortcut):
    """One fully fused EfficientResNetBlock, one batch element per grid step.

    Layout: activations are flat (M=H*W, C), channels on lanes.  The 3x3 convs use
    a row-halo-padded bf16 scratch holding [dx=-1 | dx=0 | dx=+1] lane blocks so each
    conv is 3 aligned (M,3C)x(3C,Cout) bf16 MXU dots with f32 accumulation."""
    if has_shortcut:
        (h_ref, r_ref, gb1_ref, ind1_ref, ind1t_ref, w1_ref, b1_ref,
         gb2_ref, ind2_ref, ind2t_ref, w2_ref, b2_ref, ws_ref, bs_ref,
         cm_ref, o_ref, pad1_ref, pad2_ref) = refs
    else:
        (h_ref, r_ref, gb1_ref, ind1_ref, ind1t_ref, w1_ref, b1_ref,
         gb2_ref, ind2_ref, ind2t_ref, w2_ref, b2_ref,
         cm_ref, o_ref, pad1_ref, pad2_ref) = refs
        ws_ref = bs_ref = None

    f32 = jnp.float32
    bf16 = jnp.bfloat16
    M = h_ref.shape[1]

    _zero_halo(pad1_ref, M, P)
    _zero_halo(pad2_ref, M, P)

    ml = cm_ref[:, 0:1]
    mr = cm_ref[:, 1:2]

    # ---- skip-connection concat in registers (never round-trips HBM/VMEM raw) ----
    x = jnp.concatenate([h_ref[0].astype(f32), r_ref[0].astype(f32)], axis=1)  # (M, Cin)

    # ---- 1x1 shortcut (bf16 dot) or identity, computed while x is live ----
    if has_shortcut:
        short = (jnp.dot(x.astype(bf16), ws_ref[...], preferred_element_type=f32)
                 + bs_ref[...])
    else:
        short = x                                   # requires Cin == Cout

    # ---- GroupNorm1 + SiLU -> conv1 (+ temb folded into per-batch bias) ----
    act1 = _group_norm_silu(x, gb1_ref, ind1_ref, ind1t_ref, eps)
    _store_tap_blocks(pad1_ref, act1, ml, mr, P)
    h1 = _conv3x3_rows(pad1_ref, w1_ref, M, W, P) + b1_ref[0]

    # ---- GroupNorm2 + SiLU -> conv2 ----
    act2 = _group_norm_silu(h1, gb2_ref, ind2_ref, ind2t_ref, eps)
    _store_tap_blocks(pad2_ref, act2, ml, mr, P)
    h2 = _conv3x3_rows(pad2_ref, w2_ref, M, W, P) + b2_ref[...]

    # ---- residual epilogue (no HBM round trip) ----
    o_ref[0] = ((h2 + short) * inv_scale).astype(o_ref.dtype)


def _upconv_kernel(h_ref, wq_ref, b_ref, cm_ref, o_ref, pad_ref, *, W, P):
    """2x nearest upsample + 3x3 conv (pad 1) in sub-pixel form: per output phase
    (pa, pb) two K=3C dots on the LOW-res input; the 4x upsampled tensor never
    exists.  The four phase results are lane-concatenated so the store is one
    lane-dense (M, 4*Cout) slab."""
    f32 = jnp.float32
    M = h_ref.shape[1]
    Cout = b_ref.shape[1]

    _zero_halo(pad_ref, M, P)
    ml = cm_ref[:, 0:1]
    mr = cm_ref[:, 1:2]

    x = h_ref[0].astype(f32)
    _store_tap_blocks(pad_ref, x, ml, mr, P)

    outs = []
    for pa in range(2):
        for pb in range(2):
            acc = jnp.zeros((M, Cout), f32)
            for u in range(2):
                off = P + (pa - 1 + u) * W
                acc = acc + jnp.dot(pad_ref[off:off + M, :], wq_ref[pa, pb, u],
                                    preferred_element_type=f32)
            outs.append((acc + b_ref[...]).astype(o_ref.dtype))
    o_ref[0] = jnp.concatenate(outs, axis=1)        # (M, 4*Cout), phase-major lanes


# ----------------------------- pallas_call wrappers -----------------------------

_VMEM_LIMIT = 64 * 1024 * 1024   # raise the default 16/32 MiB scoped limit


def _run_resnet_block(h_flat, r_flat, p, bias1, ind1, ind2, cmask, *,
                      W, groups, eps, output_scale_factor):
    N, M, Ch = h_flat.shape
    Cr = r_flat.shape[2]
    Cin = Ch + Cr
    Cout = p["conv1_w"].shape[-1]
    P = _halo_pad(W)
    rows = M + 2 * P
    dt = h_flat.dtype
    f32 = jnp.float32
    bf16 = jnp.bfloat16

    # per-kernel-row weights, K laid out as [kx=0 | kx=1 | kx=2] (matches the scratch)
    w1 = p["conv1_w"].reshape(3, 3 * Cin, Cout).astype(bf16)
    w2 = p["conv2_w"].reshape(3, 3 * Cout, Cout).astype(bf16)
    gb1 = jnp.stack([p["norm1_g"], p["norm1_b"]]).astype(f32)      # (2, Cin)
    gb2 = jnp.stack([p["norm2_g"], p["norm2_b"]]).astype(f32)      # (2, Cout)
    has_shortcut = "short_w" in p
    if not has_shortcut:
        assert Cin == Cout, "identity shortcut requires Cin == Cout"

    kern = functools.partial(_resnet_block_kernel, eps=float(eps), W=W, P=P,
                             inv_scale=float(1.0 / output_scale_factor),
                             has_shortcut=has_shortcut)

    operands = [h_flat, r_flat, gb1, ind1, ind1.T, w1,
                bias1.reshape(N, 1, Cout).astype(f32),
                gb2, ind2, ind2.T, w2,
                p["conv2_b"].reshape(1, Cout).astype(f32)]
    in_specs = [
        pl.BlockSpec((1, M, Ch), lambda n: (n, 0, 0)),
        pl.BlockSpec((1, M, Cr), lambda n: (n, 0, 0)),
        pl.BlockSpec((2, Cin), lambda n: (0, 0)),
        pl.BlockSpec((Cin, groups), lambda n: (0, 0)),
        pl.BlockSpec((groups, Cin), lambda n: (0, 0)),
        pl.BlockSpec((3, 3 * Cin, Cout), lambda n: (0, 0, 0)),
        pl.BlockSpec((1, 1, Cout), lambda n: (n, 0, 0)),
        pl.BlockSpec((2, Cout), lambda n: (0, 0)),
        pl.BlockSpec((Cout, groups), lambda n: (0, 0)),
        pl.BlockSpec((groups, Cout), lambda n: (0, 0)),
        pl.BlockSpec((3, 3 * Cout, Cout), lambda n: (0, 0, 0)),
        pl.BlockSpec((1, Cout), lambda n: (0, 0)),
    ]
    if has_shortcut:
        operands += [p["short_w"].astype(bf16),
                     p["short_b"].reshape(1, Cout).astype(f32)]
        in_specs += [pl.BlockSpec((Cin, Cout), lambda n: (0, 0)),
                     pl.BlockSpec((1, Cout), lambda n: (0, 0))]
    operands += [cmask]
    in_specs += [pl.BlockSpec((M, 2), lambda n: (0, 0))]

    return pl.pallas_call(
        kern,
        out_shape=jax.ShapeDtypeStruct((N, M, Cout), dt),
        grid=(N,),
        in_specs=in_specs,
        out_specs=pl.BlockSpec((1, M, Cout), lambda n: (n, 0, 0)),
        scratch_shapes=[pltpu.VMEM((rows, 3 * Cin), bf16),
                        pltpu.VMEM((rows, 3 * Cout), bf16)],
        compiler_params=pltpu.CompilerParams(
            dimension_semantics=("parallel",),
            vmem_limit_bytes=_VMEM_LIMIT),
    )(*operands)


def _run_upsample_conv(h_flat, w, b, cmask, *, W):
    N, M, C = h_flat.shape
    Cout = w.shape[-1]
    P = _halo_pad(W)
    rows = M + 2 * P
    wq = _pack_subpixel_weights(w).astype(jnp.bfloat16)      # (2,2,2,3C,Cout)

    kern = functools.partial(_upconv_kernel, W=W, P=P)
    return pl.pallas_call(
        kern,
        out_shape=jax.ShapeDtypeStruct((N, M, 4 * Cout), h_flat.dtype),
        grid=(N,),
        in_specs=[
            pl.BlockSpec((1, M, C), lambda n: (n, 0, 0)),
            pl.BlockSpec((2, 2, 2, 3 * C, Cout), lambda n: (0, 0, 0, 0, 0)),
            pl.BlockSpec((1, Cout), lambda n: (0, 0)),
            pl.BlockSpec((M, 2), lambda n: (0, 0)),
        ],
        out_specs=pl.BlockSpec((1, M, 4 * Cout), lambda n: (n, 0, 0)),
        scratch_shapes=[pltpu.VMEM((rows, 3 * C), jnp.bfloat16)],
        compiler_params=pltpu.CompilerParams(
            dimension_semantics=("parallel",),
            vmem_limit_bytes=_VMEM_LIMIT),
    )(h_flat, wq, b.reshape(1, Cout).astype(jnp.float32), cmask)


# ----------------------------- public forward -----------------------------

def efficient_up_block(hidden_states, res_hidden_states, temb, params, *,
                       groups=8, eps=1e-6, output_scale_factor=1.0):
    """Forward of EfficientUpBlock.  hidden_states / res_hidden_states are NCHW; output NCHW."""
    N, _, H, W = hidden_states.shape

    def to_flat(x):
        n, c, hh, ww = x.shape
        return jnp.transpose(x, (0, 2, 3, 1)).reshape(n, hh * ww, c)

    h = to_flat(hidden_states)
    res_list = [to_flat(r) for r in res_hidden_states]
    cmask = _col_masks(H, W, jnp.float32)

    for p in params["resnets"]:
        r = res_list[-1]
        res_list = res_list[:-1]
        Cin = h.shape[2] + r.shape[2]
        Cout = p["conv1_w"].shape[-1]
        ind1 = _group_indicator(Cin, groups)
        ind2 = _group_indicator(Cout, groups)
        if temb is not None:
            # tiny projection: plain XLA, folded into conv1's per-batch bias
            tproj = jnp.dot(jax.nn.silu(temb.astype(jnp.float32)),
                            p["temb_w"]) + p["temb_b"]
            bias1 = p["conv1_b"][None, :] + tproj                   # (N, Cout)
        else:
            bias1 = jnp.broadcast_to(p["conv1_b"][None, :], (N, Cout))
        h = _run_resnet_block(h, r, p, bias1, ind1, ind2, cmask,
                              W=W, groups=groups, eps=eps,
                              output_scale_factor=output_scale_factor)

    # TODO(synk): attention branch not implemented (module default add_attention=False).

    if params.get("upsampler") is not None:
        up = params["upsampler"]
        y = _run_upsample_conv(h, up["w"], up["b"], cmask, W=W)     # (N, H*W, 4*Cout)
        Cout = up["w"].shape[-1]
        y = y.reshape(N, H, W, 2, 2, Cout)
        # single channels-last -> NCHW boundary transpose (the phase interleave is
        # already in the lane layout, so this is the transpose we'd need anyway)
        return jnp.transpose(y, (0, 5, 1, 3, 2, 4)).reshape(N, Cout, 2 * H, 2 * W)

    C = h.shape[2]
    return jnp.transpose(h.reshape(N, H, W, C), (0, 3, 1, 2))


# ----------------------------- pure-JAX reference (for self-check) -----------------------------

def _silu(x):
    return x * jax.nn.sigmoid(x)


def _ref_conv3x3(x, w, b):
    y = jax.lax.conv_general_dilated(
        x, w, window_strides=(1, 1), padding="SAME",
        dimension_numbers=("NHWC", "HWIO", "NHWC"),
        precision=jax.lax.Precision.HIGHEST)
    return y + b[None, None, None, :]


def _ref_group_norm(x, gamma, beta, G, eps):
    N, H, W, C = x.shape
    xg = x.reshape(N, H, W, G, C // G)
    mean = jnp.mean(xg, axis=(1, 2, 4), keepdims=True)
    var = jnp.mean((xg - mean) ** 2, axis=(1, 2, 4), keepdims=True)
    xn = ((xg - mean) / jnp.sqrt(var + eps)).reshape(N, H, W, C)
    return xn * gamma[None, None, None, :] + beta[None, None, None, :]


def _ref_up_block(hidden, res_states, temb, params, *, groups, eps, output_scale_factor):
    x = jnp.transpose(hidden, (0, 2, 3, 1))
    res_list = [jnp.transpose(r, (0, 2, 3, 1)) for r in res_states]
    for p in params["resnets"]:
        r = res_list[-1]
        res_list = res_list[:-1]
        x = jnp.concatenate([x, r], axis=-1)
        h = _silu(_ref_group_norm(x, p["norm1_g"], p["norm1_b"], groups, eps))
        h = _ref_conv3x3(h, p["conv1_w"], p["conv1_b"])
        if temb is not None:
            tproj = jnp.dot(_silu(temb), p["temb_w"],
                            precision=jax.lax.Precision.HIGHEST) + p["temb_b"]
            h = h + tproj[:, None, None, :]
        h = _silu(_ref_group_norm(h, p["norm2_g"], p["norm2_b"], groups, eps))
        h = _ref_conv3x3(h, p["conv2_w"], p["conv2_b"])
        if "short_w" in p:
            short = jnp.einsum("nhwc,cd->nhwd", x, p["short_w"],
                               precision=jax.lax.Precision.HIGHEST) + p["short_b"]
        else:
            short = x
        x = (short + h) / output_scale_factor
    if params.get("upsampler") is not None:
        up = params["upsampler"]
        x = jnp.repeat(jnp.repeat(x, 2, axis=1), 2, axis=2)
        x = _ref_conv3x3(x, up["w"], up["b"])
    return jnp.transpose(x, (0, 3, 1, 2))


# ----------------------------- deterministic parameter init -----------------------------

def init_params(key, in_channels, prev_channels, out_channels, temb_channels,
                num_layers=1, add_upsampling=True):
    params = {"resnets": []}
    for i in range(num_layers):
        cin = in_channels + (prev_channels if i == 0 else out_channels)
        ks = jax.random.split(jax.random.fold_in(key, i), 10)
        p = {
            "norm1_g": 1.0 + 0.1 * jax.random.normal(ks[0], (cin,), jnp.float32),
            "norm1_b": 0.1 * jax.random.normal(ks[1], (cin,), jnp.float32),
            "conv1_w": 0.05 * jax.random.normal(ks[2], (3, 3, cin, out_channels), jnp.float32),
            "conv1_b": 0.02 * jax.random.normal(ks[3], (out_channels,), jnp.float32),
            "temb_w": 0.05 * jax.random.normal(ks[4], (temb_channels, out_channels), jnp.float32),
            "temb_b": 0.02 * jax.random.normal(ks[5], (out_channels,), jnp.float32),
            "norm2_g": 1.0 + 0.1 * jax.random.normal(ks[6], (out_channels,), jnp.float32),
            "norm2_b": 0.1 * jax.random.normal(ks[7], (out_channels,), jnp.float32),
            "conv2_w": 0.05 * jax.random.normal(ks[8], (3, 3, out_channels, out_channels), jnp.float32),
            "conv2_b": 0.02 * jax.random.normal(ks[9], (out_channels,), jnp.float32),
        }
        if cin != out_channels:
            ks2 = jax.random.split(jax.random.fold_in(key, 100 + i), 2)
            p["short_w"] = 0.05 * jax.random.normal(ks2[0], (cin, out_channels), jnp.float32)
            p["short_b"] = 0.02 * jax.random.normal(ks2[1], (out_channels,), jnp.float32)
        params["resnets"].append(p)

    if add_upsampling:
        ks3 = jax.random.split(jax.random.fold_in(key, 999), 2)
        params["upsampler"] = {
            "w": 0.05 * jax.random.normal(ks3[0], (3, 3, out_channels, out_channels), jnp.float32),
            "b": 0.02 * jax.random.normal(ks3[1], (out_channels,), jnp.float32),
        }
    else:
        params["upsampler"] = None
    return params


# ----------------------------- demo -----------------------------

if __name__ == "__main__":
    key = jax.random.PRNGKey(0)
    B, in_ch, prev_ch, out_ch, temb_ch = 2, 8, 8, 24, 32
    H = W = 8

    k1, k2, k3, kp = jax.random.split(key, 4)
    hidden = jax.random.normal(k1, (B, in_ch, H, W), jnp.float32)        # NCHW, like PyTorch
    res_skip = jax.random.normal(k2, (B, prev_ch, H, W), jnp.float32)    # NCHW skip connection
    temb = jax.random.normal(k3, (B, temb_ch), jnp.float32)

    params = init_params(kp, in_ch, prev_ch, out_ch, temb_ch,
                         num_layers=1, add_upsampling=True)

    fwd = jax.jit(functools.partial(efficient_up_block, groups=8, eps=1e-6,
                                    output_scale_factor=1.0))
    out = jax.block_until_ready(fwd(hidden, (res_skip,), temb, params))

    assert out.shape == (B, out_ch, 2 * H, 2 * W), out.shape
    assert bool(jnp.all(jnp.isfinite(out)))

    # correctness self-check vs. a plain-JAX f32 reference of the same module semantics.
    # tolerance accounts for bf16 MXU operands (accumulation / GroupNorm stay f32).
    ref = _ref_up_block(hidden, (res_skip,), temb, params,
                        groups=8, eps=1e-6, output_scale_factor=1.0)
    err = float(jnp.max(jnp.abs(out - ref)))
    scale = float(jnp.max(jnp.abs(ref))) + 1e-6
    assert err <= 3e-2 * scale + 1e-3, ("mismatch vs reference", err, scale)

    print("KERNEL_OK")
</pallas_src>

<mosaic_0001>
module attributes {stable_mosaic.version = 11 : i64} {
  func.func @_resnet_block_kernel(%arg0: i32, %arg1: memref<1x64x8xf32, #tpu.memory_space<vmem>>, %arg2: memref<1x64x8xf32, #tpu.memory_space<vmem>>, %arg3: memref<2x16xf32, #tpu.memory_space<vmem>>, %arg4: memref<16x8xf32, #tpu.memory_space<vmem>>, %arg5: memref<8x16xf32, #tpu.memory_space<vmem>>, %arg6: memref<3x48x24xbf16, #tpu.memory_space<vmem>>, %arg7: memref<1x1x24xf32, #tpu.memory_space<vmem>>, %arg8: memref<2x24xf32, #tpu.memory_space<vmem>>, %arg9: memref<24x8xf32, #tpu.memory_space<vmem>>, %arg10: memref<8x24xf32, #tpu.memory_space<vmem>>, %arg11: memref<3x72x24xbf16, #tpu.memory_space<vmem>>, %arg12: memref<1x24xf32, #tpu.memory_space<vmem>>, %arg13: memref<16x24xbf16, #tpu.memory_space<vmem>>, %arg14: memref<1x24xf32, #tpu.memory_space<vmem>>, %arg15: memref<64x2xf32, #tpu.memory_space<vmem>>, %arg16: memref<1x64x24xf32, #tpu.memory_space<vmem>>, %arg17: memref<96x48xbf16, #tpu.memory_space<vmem>>, %arg18: memref<96x72xbf16, #tpu.memory_space<vmem>>) attributes {dimension_semantics = [#tpu.dimension_semantics<parallel>], iteration_bounds = array<i64: 2>, scalar_prefetch = 0 : i64, scratch_operands = 2 : i64, tpu.core_type = #tpu.core_type<tc>, window_params = [{transform_indices = @transform_0, window_bounds = array<i64: 1, 64, 8>}, {transform_indices = @transform_1, window_bounds = array<i64: 1, 64, 8>}, {pipeline_mode = #tpu.pipeline_mode<synchronous>, transform_indices = @transform_2, window_bounds = array<i64: 2, 16>}, {pipeline_mode = #tpu.pipeline_mode<synchronous>, transform_indices = @transform_3, window_bounds = array<i64: 16, 8>}, {pipeline_mode = #tpu.pipeline_mode<synchronous>, transform_indices = @transform_4, window_bounds = array<i64: 8, 16>}, {pipeline_mode = #tpu.pipeline_mode<synchronous>, transform_indices = @transform_5, window_bounds = array<i64: 3, 48, 24>}, {transform_indices = @transform_6, window_bounds = array<i64: 1, 1, 24>}, {pipeline_mode = #tpu.pipeline_mode<synchronous>, transform_indices = @transform_7, window_bounds = array<i64: 2, 24>}, {pipeline_mode = #tpu.pipeline_mode<synchronous>, transform_indices = @transform_8, window_bounds = array<i64: 24, 8>}, {pipeline_mode = #tpu.pipeline_mode<synchronous>, transform_indices = @transform_9, window_bounds = array<i64: 8, 24>}, {pipeline_mode = #tpu.pipeline_mode<synchronous>, transform_indices = @transform_10, window_bounds = array<i64: 3, 72, 24>}, {pipeline_mode = #tpu.pipeline_mode<synchronous>, transform_indices = @transform_11, window_bounds = array<i64: 1, 24>}, {pipeline_mode = #tpu.pipeline_mode<synchronous>, transform_indices = @transform_12, window_bounds = array<i64: 16, 24>}, {pipeline_mode = #tpu.pipeline_mode<synchronous>, transform_indices = @transform_13, window_bounds = array<i64: 1, 24>}, {pipeline_mode = #tpu.pipeline_mode<synchronous>, transform_indices = @transform_14, window_bounds = array<i64: 64, 2>}, {transform_indices = @transform_15, window_bounds = array<i64: 1, 64, 24>}]} {
    %cst = arith.constant 0.000000e+00 : bf16
    %0 = vector.broadcast %cst : bf16 to vector<16x48xbf16>
    %c0 = arith.constant 0 : index
    %c0_0 = arith.constant 0 : index
    %1 = vector.load %arg17[%c0, %c0_0] : memref<96x48xbf16, #tpu.memory_space<vmem>>, vector<16x48xbf16>
    tpu.vector_store %arg17[%c0, %c0_0], %0 {strides = array<i32>} : memref<96x48xbf16, #tpu.memory_space<vmem>>, vector<16x48xbf16>,
    %cst_1 = arith.constant 0.000000e+00 : bf16
    %2 = vector.broadcast %cst_1 : bf16 to vector<16x48xbf16>
    %c80 = arith.constant 80 : index
    %c0_2 = arith.constant 0 : index
    %3 = vector.load %arg17[%c80, %c0_2] : memref<96x48xbf16, #tpu.memory_space<vmem>>, vector<16x48xbf16>
    tpu.vector_store %arg17[%c80, %c0_2], %2 {strides = array<i32>} : memref<96x48xbf16, #tpu.memory_space<vmem>>, vector<16x48xbf16>,
    %cst_3 = arith.constant 0.000000e+00 : bf16
    %4 = vector.broadcast %cst_3 : bf16 to vector<16x72xbf16>
    %c0_4 = arith.constant 0 : index
    %c0_5 = arith.constant 0 : index
    %5 = vector.load %arg18[%c0_4, %c0_5] : memref<96x72xbf16, #tpu.memory_space<vmem>>, vector<16x72xbf16>
    tpu.vector_store %arg18[%c0_4, %c0_5], %4 {strides = array<i32>} : memref<96x72xbf16, #tpu.memory_space<vmem>>, vector<16x72xbf16>,
    %cst_6 = arith.constant 0.000000e+00 : bf16
    %6 = vector.broadcast %cst_6 : bf16 to vector<16x72xbf16>
    %c80_7 = arith.constant 80 : index
    %c0_8 = arith.constant 0 : index
    %7 = vector.load %arg18[%c80_7, %c0_8] : memref<96x72xbf16, #tpu.memory_space<vmem>>, vector<16x72xbf16>
    tpu.vector_store %arg18[%c80_7, %c0_8], %6 {strides = array<i32>} : memref<96x72xbf16, #tpu.memory_space<vmem>>, vector<16x72xbf16>,
    %c0_9 = arith.constant 0 : index
    %c0_10 = arith.constant 0 : index
    %8 = vector.load %arg15[%c0_9, %c0_10] : memref<64x2xf32, #tpu.memory_space<vmem>>, vector<64x1xf32>
    %c0_11 = arith.constant 0 : index
    %c1 = arith.constant 1 : index
    %9 = vector.load %arg15[%c0_11, %c1] : memref<64x2xf32, #tpu.memory_space<vmem>>, vector<64x1xf32>
    %c0_12 = arith.constant 0 : index
    %c0_13 = arith.constant 0 : index
    %c0_14 = arith.constant 0 : index
    %10 = vector.load %arg1[%c0_12, %c0_13, %c0_14] : memref<1x64x8xf32, #tpu.memory_space<vmem>>, vector<1x64x8xf32>
    %11 = vector.shape_cast %10 : vector<1x64x8xf32> to vector<64x8xf32>
    %c0_15 = arith.constant 0 : index
    %c0_16 = arith.constant 0 : index
    %c0_17 = arith.constant 0 : index
    %12 = vector.load %arg2[%c0_15, %c0_16, %c0_17] : memref<1x64x8xf32, #tpu.memory_space<vmem>>, vector<1x64x8xf32>
    %13 = vector.shape_cast %12 : vector<1x64x8xf32> to vector<64x8xf32>
    %14 = tpu.concatenate %11, %13 in 1 : vector<64x8xf32>, vector<64x8xf32> -> vector<64x16xf32>
    %15 = arith.truncf %14 : vector<64x16xf32> to vector<64x16xbf16>
    %c0_18 = arith.constant 0 : index
    %c0_19 = arith.constant 0 : index
    %16 = vector.load %arg13[%c0_18, %c0_19] : memref<16x24xbf16, #tpu.memory_space<vmem>>, vector<16x24xbf16>
    %cst_20 = arith.constant dense<0.000000e+00> : vector<64x24xf32>
    %17 = tpu.matmul %15, %16, %cst_20 {dimension_numbers = #tpu.dot_dimension_numbers<[1], [0], [0], [1], [0, 0, 1, 1], [], []>} : vector<64x16xbf16>, vector<16x24xbf16>, vector<64x24xf32> -> vector<64x24xf32>
    %c0_21 = arith.constant 0 : index
    %c0_22 = arith.constant 0 : index
    %18 = vector.load %arg14[%c0_21, %c0_22] : memref<1x24xf32, #tpu.memory_space<vmem>>, vector<1x24xf32>
    %19 = vector.broadcast %18 : vector<1x24xf32> to vector<64x24xf32>
    %20 = arith.addf %17, %19 : vector<64x24xf32>
    %cst_23 = arith.constant dense<0.000000e+00> : vector<16xf32>
    %21 = vector.multi_reduction <add>, %14, %cst_23 [0] : vector<64x16xf32> to vector<16xf32>
    %22 = vector.shape_cast %21 : vector<16xf32> to vector<1x16xf32>
    %23 = arith.mulf %14, %14 : vector<64x16xf32>
    %cst_24 = arith.constant dense<0.000000e+00> : vector<16xf32>
    %24 = vector.multi_reduction <add>, %23, %cst_24 [0] : vector<64x16xf32> to vector<16xf32>
    %25 = vector.shape_cast %24 : vector<16xf32> to vector<1x16xf32>
    %26 = tpu.concatenate %22, %25 in 0 : vector<1x16xf32>, vector<1x16xf32> -> vector<2x16xf32>
    %c0_25 = arith.constant 0 : index
    %c0_26 = arith.constant 0 : index
    %27 = vector.load %arg4[%c0_25, %c0_26] : memref<16x8xf32, #tpu.memory_space<vmem>>, vector<16x8xf32>
    %cst_27 = arith.constant dense<0.000000e+00> : vector<2x8xf32>
    %28 = tpu.matmul %26, %27, %cst_27 {dimension_numbers = #tpu.dot_dimension_numbers<[1], [0], [0], [1], [0, 0, 1, 1], [], []>} : vector<2x16xf32>, vector<16x8xf32>, vector<2x8xf32> -> vector<2x8xf32>
    %cst_28 = arith.constant 7.812500e-03 : f32
    %29 = vector.broadcast %cst_28 : f32 to vector<2x8xf32>
    %30 = arith.mulf %28, %29 : vector<2x8xf32>
    %c0_29 = arith.constant 0 : index
    %c0_30 = arith.constant 0 : index
    %31 = vector.load %arg5[%c0_29, %c0_30] : memref<8x16xf32, #tpu.memory_space<vmem>>, vector<8x16xf32>
    %cst_31 = arith.constant dense<0.000000e+00> : vector<2x16xf32>
    %32 = tpu.matmul %30, %31, %cst_31 {dimension_numbers = #tpu.dot_dimension_numbers<[1], [0], [0], [1], [0, 0, 1, 1], [], []>} : vector<2x8xf32>, vector<8x16xf32>, vector<2x16xf32> -> vector<2x16xf32>
    %33 = vector.extract_strided_slice %32 {offsets = [0, 0], sizes = [1, 16], strides = [1, 1]} : vector<2x16xf32> to vector<1x16xf32>
    %34 = vector.extract_strided_slice %32 {offsets = [1, 0], sizes = [1, 16], strides = [1, 1]} : vector<2x16xf32> to vector<1x16xf32>
    %35 = arith.mulf %33, %33 : vector<1x16xf32>
    %36 = arith.subf %34, %35 : vector<1x16xf32>
    %37 = vector.broadcast %33 : vector<1x16xf32> to vector<64x16xf32>
    %38 = arith.subf %14, %37 : vector<64x16xf32>
    %cst_32 = arith.constant 9.99999997E-7 : f32
    %39 = vector.broadcast %cst_32 : f32 to vector<1x16xf32>
    %40 = arith.addf %36, %39 : vector<1x16xf32>
    %41 = math.rsqrt %40 : vector<1x16xf32>
    %42 = vector.broadcast %41 : vector<1x16xf32> to vector<64x16xf32>
    %43 = arith.mulf %38, %42 : vector<64x16xf32>
    %c0_33 = arith.constant 0 : index
    %c0_34 = arith.constant 0 : index
    %44 = vector.load %arg3[%c0_33, %c0_34] : memref<2x16xf32, #tpu.memory_space<vmem>>, vector<1x16xf32>
    %45 = vector.broadcast %44 : vector<1x16xf32> to vector<64x16xf32>
    %46 = arith.mulf %43, %45 : vector<64x16xf32>
    %c1_35 = arith.constant 1 : index
    %c0_36 = arith.constant 0 : index
    %47 = vector.load %arg3[%c1_35, %c0_36] : memref<2x16xf32, #tpu.memory_space<vmem>>, vector<1x16xf32>
    %48 = vector.broadcast %47 : vector<1x16xf32> to vector<64x16xf32>
    %49 = arith.addf %46, %48 : vector<64x16xf32>
    %50 = arith.negf %49 : vector<64x16xf32>
    %51 = math.exp %50 : vector<64x16xf32>
    %cst_37 = arith.constant 1.000000e+00 : f32
    %52 = vector.broadcast %cst_37 : f32 to vector<64x16xf32>
    %53 = arith.addf %52, %51 : vector<64x16xf32>
    %54 = arith.divf %52, %53 : vector<64x16xf32>
    %55 = arith.mulf %49, %54 : vector<64x16xf32>
    %cst_38 = arith.constant 0.000000e+00 : f32
    %56 = vector.broadcast %cst_38 : f32 to vector<1x16xf32>
    %57 = vector.extract_strided_slice %55 {offsets = [0, 0], sizes = [63, 16], strides = [1, 1]} : vector<64x16xf32> to vector<63x16xf32>
    %58 = tpu.concatenate %56, %57 in 0 : vector<1x16xf32>, vector<63x16xf32> -> vector<64x16xf32>
    %59 = vector.broadcast %8 : vector<64x1xf32> to vector<64x16xf32>
    %60 = arith.mulf %58, %59 : vector<64x16xf32>
    %61 = vector.extract_strided_slice %55 {offsets = [1, 0], sizes = [63, 16], strides = [1, 1]} : vector<64x16xf32> to vector<63x16xf32>
    %62 = tpu.concatenate %61, %56 in 0 : vector<63x16xf32>, vector<1x16xf32> -> vector<64x16xf32>
    %63 = vector.broadcast %9 : vector<64x1xf32> to vector<64x16xf32>
    %64 = arith.mulf %62, %63 : vector<64x16xf32>
    %65 = arith.truncf %60 : vector<64x16xf32> to vector<64x16xbf16>
    %c16 = arith.constant 16 : index
    %c0_39 = arith.constant 0 : index
    %66 = vector.load %arg17[%c16, %c0_39] : memref<96x48xbf16, #tpu.memory_space<vmem>>, vector<64x16xbf16>
    tpu.vector_store %arg17[%c16, %c0_39], %65 {strides = array<i32>} : memref<96x48xbf16, #tpu.memory_space<vmem>>, vector<64x16xbf16>,
    %67 = arith.truncf %55 : vector<64x16xf32> to vector<64x16xbf16>
    %c16_40 = arith.constant 16 : index
    %c16_41 = arith.constant 16 : index
    %68 = vector.load %arg17[%c16_40, %c16_41] : memref<96x48xbf16, #tpu.memory_space<vmem>>, vector<64x16xbf16>
    tpu.vector_store %arg17[%c16_40, %c16_41], %67 {strides = array<i32>} : memref<96x48xbf16, #tpu.memory_space<vmem>>, vector<64x16xbf16>,
    %69 = arith.truncf %64 : vector<64x16xf32> to vector<64x16xbf16>
    %c16_42 = arith.constant 16 : index
    %c32 = arith.constant 32 : index
    %70 = vector.load %arg17[%c16_42, %c32] : memref<96x48xbf16, #tpu.memory_space<vmem>>, vector<64x16xbf16>
    tpu.vector_store %arg17[%c16_42, %c32], %69 {strides = array<i32>} : memref<96x48xbf16, #tpu.memory_space<vmem>>, vector<64x16xbf16>,
    %cst_43 = arith.constant 0.000000e+00 : f32
    %71 = vector.broadcast %cst_43 : f32 to vector<64x24xf32>
    %c8 = arith.constant 8 : index
    %c0_44 = arith.constant 0 : index
    %72 = vector.load %arg17[%c8, %c0_44] : memref<96x48xbf16, #tpu.memory_space<vmem>>, vector<64x48xbf16>
    %c0_45 = arith.constant 0 : index
    %c0_46 = arith.constant 0 : index
    %c0_47 = arith.constant 0 : index
    %73 = vector.load %arg6[%c0_45, %c0_46, %c0_47] : memref<3x48x24xbf16, #tpu.memory_space<vmem>>, vector<1x48x24xbf16>
    %74 = vector.shape_cast %73 : vector<1x48x24xbf16> to vector<48x24xbf16>
    %cst_48 = arith.constant dense<0.000000e+00> : vector<64x24xf32>
    %75 = tpu.matmul %72, %74, %cst_48 {dimension_numbers = #tpu.dot_dimension_numbers<[1], [0], [0], [1], [0, 0, 1, 1], [], []>} : vector<64x48xbf16>, vector<48x24xbf16>, vector<64x24xf32> -> vector<64x24xf32>
    %76 = arith.addf %71, %75 : vector<64x24xf32>
    %c16_49 = arith.constant 16 : index
    %c0_50 = arith.constant 0 : index
    %77 = vector.load %arg17[%c16_49, %c0_50] : memref<96x48xbf16, #tpu.memory_space<vmem>>, vector<64x48xbf16>
    %c1_51 = arith.constant 1 : index
    %c0_52 = arith.constant 0 : index
    %c0_53 = arith.constant 0 : index
    %78 = vector.load %arg6[%c1_51, %c0_52, %c0_53] : memref<3x48x24xbf16, #tpu.memory_space<vmem>>, vector<1x48x24xbf16>
    %79 = vector.shape_cast %78 : vector<1x48x24xbf16> to vector<48x24xbf16>
    %cst_54 = arith.constant dense<0.000000e+00> : vector<64x24xf32>
    %80 = tpu.matmul %77, %79, %cst_54 {dimension_numbers = #tpu.dot_dimension_numbers<[1], [0], [0], [1], [0, 0, 1, 1], [], []>} : vector<64x48xbf16>, vector<48x24xbf16>, vector<64x24xf32> -> vector<64x24xf32>
    %81 = arith.addf %76, %80 : vector<64x24xf32>
    %c24 = arith.constant 24 : index
    %c0_55 = arith.constant 0 : index
    %82 = vector.load %arg17[%c24, %c0_55] : memref<96x48xbf16, #tpu.memory_space<vmem>>, vector<64x48xbf16>
    %c2 = arith.constant 2 : index
    %c0_56 = arith.constant 0 : index
    %c0_57 = arith.constant 0 : index
    %83 = vector.load %arg6[%c2, %c0_56, %c0_57] : memref<3x48x24xbf16, #tpu.memory_space<vmem>>, vector<1x48x24xbf16>
    %84 = vector.shape_cast %83 : vector<1x48x24xbf16> to vector<48x24xbf16>
    %cst_58 = arith.constant dense<0.000000e+00> : vector<64x24xf32>
    %85 = tpu.matmul %82, %84, %cst_58 {dimension_numbers = #tpu.dot_dimension_numbers<[1], [0], [0], [1], [0, 0, 1, 1], [], []>} : vector<64x48xbf16>, vector<48x24xbf16>, vector<64x24xf32> -> vector<64x24xf32>
    %86 = arith.addf %81, %85 : vector<64x24xf32>
    %c0_59 = arith.constant 0 : index
    %c0_60 = arith.constant 0 : index
    %c0_61 = arith.constant 0 : index
    %87 = vector.load %arg7[%c0_59, %c0_60, %c0_61] : memref<1x1x24xf32, #tpu.memory_space<vmem>>, vector<1x1x24xf32>
    %88 = vector.shape_cast %87 : vector<1x1x24xf32> to vector<1x24xf32>
    %89 = vector.broadcast %88 : vector<1x24xf32> to vector<64x24xf32>
    %90 = arith.addf %86, %89 : vector<64x24xf32>
    %cst_62 = arith.constant dense<0.000000e+00> : vector<24xf32>
    %91 = vector.multi_reduction <add>, %90, %cst_62 [0] : vector<64x24xf32> to vector<24xf32>
    %92 = vector.shape_cast %91 : vector<24xf32> to vector<1x24xf32>
    %93 = arith.mulf %90, %90 : vector<64x24xf32>
    %cst_63 = arith.constant dense<0.000000e+00> : vector<24xf32>
    %94 = vector.multi_reduction <add>, %93, %cst_63 [0] : vector<64x24xf32> to vector<24xf32>
    %95 = vector.shape_cast %94 : vector<24xf32> to vector<1x24xf32>
    %96 = tpu.concatenate %92, %95 in 0 : vector<1x24xf32>, vector<1x24xf32> -> vector<2x24xf32>
    %c0_64 = arith.constant 0 : index
    %c0_65 = arith.constant 0 : index
    %97 = vector.load %arg9[%c0_64, %c0_65] : memref<24x8xf32, #tpu.memory_space<vmem>>, vector<24x8xf32>
    %cst_66 = arith.constant dense<0.000000e+00> : vector<2x8xf32>
    %98 = tpu.matmul %96, %97, %cst_66 {dimension_numbers = #tpu.dot_dimension_numbers<[1], [0], [0], [1], [0, 0, 1, 1], [], []>} : vector<2x24xf32>, vector<24x8xf32>, vector<2x8xf32> -> vector<2x8xf32>
    %cst_67 = arith.constant 0.00520833349 : f32
    %99 = vector.broadcast %cst_67 : f32 to vector<2x8xf32>
    %100 = arith.mulf %98, %99 : vector<2x8xf32>
    %c0_68 = arith.constant 0 : index
    %c0_69 = arith.constant 0 : index
    %101 = vector.load %arg10[%c0_68, %c0_69] : memref<8x24xf32, #tpu.memory_space<vmem>>, vector<8x24xf32>
    %cst_70 = arith.constant dense<0.000000e+00> : vector<2x24xf32>
    %102 = tpu.matmul %100, %101, %cst_70 {dimension_numbers = #tpu.dot_dimension_numbers<[1], [0], [0], [1], [0, 0, 1, 1], [], []>} : vector<2x8xf32>, vector<8x24xf32>, vector<2x24xf32> -> vector<2x24xf32>
    %103 = vector.extract_strided_slice %102 {offsets = [0, 0], sizes = [1, 24], strides = [1, 1]} : vector<2x24xf32> to vector<1x24xf32>
    %104 = vector.extract_strided_slice %102 {offsets = [1, 0], sizes = [1, 24], strides = [1, 1]} : vector<2x24xf32> to vector<1x24xf32>
    %105 = arith.mulf %103, %103 : vector<1x24xf32>
    %106 = arith.subf %104, %105 : vector<1x24xf32>
    %107 = vector.broadcast %103 : vector<1x24xf32> to vector<64x24xf32>
    %108 = arith.subf %90, %107 : vector<64x24xf32>
    %cst_71 = arith.constant 9.99999997E-7 : f32
    %109 = vector.broadcast %cst_71 : f32 to vector<1x24xf32>
    %110 = arith.addf %106, %109 : vector<1x24xf32>
    %111 = math.rsqrt %110 : vector<1x24xf32>
    %112 = vector.broadcast %111 : vector<1x24xf32> to vector<64x24xf32>
    %113 = arith.mulf %108, %112 : vector<64x24xf32>
    %c0_72 = arith.constant 0 : index
    %c0_73 = arith.constant 0 : index
    %114 = vector.load %arg8[%c0_72, %c0_73] : memref<2x24xf32, #tpu.memory_space<vmem>>, vector<1x24xf32>
    %115 = vector.broadcast %114 : vector<1x24xf32> to vector<64x24xf32>
    %116 = arith.mulf %113, %115 : vector<64x24xf32>
    %c1_74 = arith.constant 1 : index
    %c0_75 = arith.constant 0 : index
    %117 = vector.load %arg8[%c1_74, %c0_75] : memref<2x24xf32, #tpu.memory_space<vmem>>, vector<1x24xf32>
    %118 = vector.broadcast %117 : vector<1x24xf32> to vector<64x24xf32>
    %119 = arith.addf %116, %118 : vector<64x24xf32>
    %120 = arith.negf %119 : vector<64x24xf32>
    %121 = math.exp %120 : vector<64x24xf32>
    %cst_76 = arith.constant 1.000000e+00 : f32
    %122 = vector.broadcast %cst_76 : f32 to vector<64x24xf32>
    %123 = arith.addf %122, %121 : vector<64x24xf32>
    %124 = arith.divf %122, %123 : vector<64x24xf32>
    %125 = arith.mulf %119, %124 : vector<64x24xf32>
    %cst_77 = arith.constant 0.000000e+00 : f32
    %126 = vector.broadcast %cst_77 : f32 to vector<1x24xf32>
    %127 = vector.extract_strided_slice %125 {offsets = [0, 0], sizes = [63, 24], strides = [1, 1]} : vector<64x24xf32> to vector<63x24xf32>
    %128 = tpu.concatenate %126, %127 in 0 : vector<1x24xf32>, vector<63x24xf32> -> vector<64x24xf32>
    %129 = vector.broadcast %8 : vector<64x1xf32> to vector<64x24xf32>
    %130 = arith.mulf %128, %129 : vector<64x24xf32>
    %131 = vector.extract_strided_slice %125 {offsets = [1, 0], sizes = [63, 24], strides = [1, 1]} : vector<64x24xf32> to vector<63x24xf32>
    %132 = tpu.concatenate %131, %126 in 0 : vector<63x24xf32>, vector<1x24xf32> -> vector<64x24xf32>
    %133 = vector.broadcast %9 : vector<64x1xf32> to vector<64x24xf32>
    %134 = arith.mulf %132, %133 : vector<64x24xf32>
    %135 = arith.truncf %130 : vector<64x24xf32> to vector<64x24xbf16>
    %c16_78 = arith.constant 16 : index
    %c0_79 = arith.constant 0 : index
    %136 = vector.load %arg18[%c16_78, %c0_79] : memref<96x72xbf16, #tpu.memory_space<vmem>>, vector<64x24xbf16>
    tpu.vector_store %arg18[%c16_78, %c0_79], %135 {strides = array<i32>} : memref<96x72xbf16, #tpu.memory_space<vmem>>, vector<64x24xbf16>,
    %137 = arith.truncf %125 : vector<64x24xf32> to vector<64x24xbf16>
    %c16_80 = arith.constant 16 : index
    %c24_81 = arith.constant 24 : index
    %138 = vector.load %arg18[%c16_80, %c24_81] : memref<96x72xbf16, #tpu.memory_space<vmem>>, vector<64x24xbf16>
    tpu.vector_store %arg18[%c16_80, %c24_81], %137 {strides = array<i32>} : memref<96x72xbf16, #tpu.memory_space<vmem>>, vector<64x24xbf16>,
    %139 = arith.truncf %134 : vector<64x24xf32> to vector<64x24xbf16>
    %c16_82 = arith.constant 16 : index
    %c48 = arith.constant 48 : index
    %140 = vector.load %arg18[%c16_82, %c48] : memref<96x72xbf16, #tpu.memory_space<vmem>>, vector<64x24xbf16>
    tpu.vector_store %arg18[%c16_82, %c48], %139 {strides = array<i32>} : memref<96x72xbf16, #tpu.memory_space<vmem>>, vector<64x24xbf16>,
    %cst_83 = arith.constant 0.000000e+00 : f32
    %141 = vector.broadcast %cst_83 : f32 to vector<64x24xf32>
    %c8_84 = arith.constant 8 : index
    %c0_85 = arith.constant 0 : index
    %142 = vector.load %arg18[%c8_84, %c0_85] : memref<96x72xbf16, #tpu.memory_space<vmem>>, vector<64x72xbf16>
    %c0_86 = arith.constant 0 : index
    %c0_87 = arith.constant 0 : index
    %c0_88 = arith.constant 0 : index
    %143 = vector.load %arg11[%c0_86, %c0_87, %c0_88] : memref<3x72x24xbf16, #tpu.memory_space<vmem>>, vector<1x72x24xbf16>
    %144 = vector.shape_cast %143 : vector<1x72x24xbf16> to vector<72x24xbf16>
    %cst_89 = arith.constant dense<0.000000e+00> : vector<64x24xf32>
    %145 = tpu.matmul %142, %144, %cst_89 {dimension_numbers = #tpu.dot_dimension_numbers<[1], [0], [0], [1], [0, 0, 1, 1], [], []>} : vector<64x72xbf16>, vector<72x24xbf16>, vector<64x24xf32> -> vector<64x24xf32>
    %146 = arith.addf %141, %145 : vector<64x24xf32>
    %c16_90 = arith.constant 16 : index
    %c0_91 = arith.constant 0 : index
    %147 = vector.load %arg18[%c16_90, %c0_91] : memref<96x72xbf16, #tpu.memory_space<vmem>>, vector<64x72xbf16>
    %c1_92 = arith.constant 1 : index
    %c0_93 = arith.constant 0 : index
    %c0_94 = arith.constant 0 : index
    %148 = vector.load %arg11[%c1_92, %c0_93, %c0_94] : memref<3x72x24xbf16, #tpu.memory_space<vmem>>, vector<1x72x24xbf16>
    %149 = vector.shape_cast %148 : vector<1x72x24xbf16> to vector<72x24xbf16>
    %cst_95 = arith.constant dense<0.000000e+00> : vector<64x24xf32>
    %150 = tpu.matmul %147, %149, %cst_95 {dimension_numbers = #tpu.dot_dimension_numbers<[1], [0], [0], [1], [0, 0, 1, 1], [], []>} : vector<64x72xbf16>, vector<72x24xbf16>, vector<64x24xf32> -> vector<64x24xf32>
    %151 = arith.addf %146, %150 : vector<64x24xf32>
    %c24_96 = arith.constant 24 : index
    %c0_97 = arith.constant 0 : index
    %152 = vector.load %arg18[%c24_96, %c0_97] : memref<96x72xbf16, #tpu.memory_space<vmem>>, vector<64x72xbf16>
    %c2_98 = arith.constant 2 : index
    %c0_99 = arith.constant 0 : index
    %c0_100 = arith.constant 0 : index
    %153 = vector.load %arg11[%c2_98, %c0_99, %c0_100] : memref<3x72x24xbf16, #tpu.memory_space<vmem>>, vector<1x72x24xbf16>
    %154 = vector.shape_cast %153 : vector<1x72x24xbf16> to vector<72x24xbf16>
    %cst_101 = arith.constant dense<0.000000e+00> : vector<64x24xf32>
    %155 = tpu.matmul %152, %154, %cst_101 {dimension_numbers = #tpu.dot_dimension_numbers<[1], [0], [0], [1], [0, 0, 1, 1], [], []>} : vector<64x72xbf16>, vector<72x24xbf16>, vector<64x24xf32> -> vector<64x24xf32>
    %156 = arith.addf %151, %155 : vector<64x24xf32>
    %c0_102 = arith.constant 0 : index
    %c0_103 = arith.constant 0 : index
    %157 = vector.load %arg12[%c0_102, %c0_103] : memref<1x24xf32, #tpu.memory_space<vmem>>, vector<1x24xf32>
    %158 = vector.broadcast %157 : vector<1x24xf32> to vector<64x24xf32>
    %159 = arith.addf %156, %158 : vector<64x24xf32>
    %160 = arith.addf %159, %20 : vector<64x24xf32>
    %cst_104 = arith.constant 1.000000e+00 : f32
    %161 = vector.broadcast %cst_104 : f32 to vector<64x24xf32>
    %162 = arith.mulf %160, %161 : vector<64x24xf32>
    %c0_105 = arith.constant 0 : index
    %c0_106 = arith.constant 0 : index
    %c0_107 = arith.constant 0 : index
    %163 = vector.load %arg16[%c0_105, %c0_106, %c0_107] : memref<1x64x24xf32, #tpu.memory_space<vmem>>, vector<1x64x24xf32>
    %164 = vector.shape_cast %163 : vector<1x64x24xf32> to vector<64x24xf32>
    %165 = vector.shape_cast %162 : vector<64x24xf32> to vector<1x64x24xf32>
    tpu.vector_store %arg16[%c0_105, %c0_106, %c0_107], %165 {strides = array<i32>} : memref<1x64x24xf32, #tpu.memory_space<vmem>>, vector<1x64x24xf32>,
    return
  }
  func.func @transform_0(%arg0: i32) -> (i32, i32, i32) {
    %c0_i32 = arith.constant 0 : i32
    %c0_i32_0 = arith.constant 0 : i32
    %c0_i32_1 = arith.constant 0 : i32
    return %arg0, %c0_i32, %c0_i32_0 : i32, i32, i32
  }
  func.func @transform_1(%arg0: i32) -> (i32, i32, i32) {
    %c0_i32 = arith.constant 0 : i32
    %c0_i32_0 = arith.constant 0 : i32
    %c0_i32_1 = arith.constant 0 : i32
    return %arg0, %c0_i32, %c0_i32_0 : i32, i32, i32
  }
  func.func @transform_2(%arg0: i32) -> (i32, i32) {
    %c0_i32 = arith.constant 0 : i32
    %c0_i32_0 = arith.constant 0 : i32
    %c0_i32_1 = arith.constant 0 : i32
    return %c0_i32, %c0_i32_0 : i32, i32
  }
  func.func @transform_3(%arg0: i32) -> (i32, i32) {
    %c0_i32 = arith.constant 0 : i32
    %c0_i32_0 = arith.constant 0 : i32
    %c0_i32_1 = arith.constant 0 : i32
    return %c0_i32, %c0_i32_0 : i32, i32
  }
  func.func @transform_4(%arg0: i32) -> (i32, i32) {
    %c0_i32 = arith.constant 0 : i32
    %c0_i32_0 = arith.constant 0 : i32
    %c0_i32_1 = arith.constant 0 : i32
    return %c0_i32, %c0_i32_0 : i32, i32
  }
  func.func @transform_5(%arg0: i32) -> (i32, i32, i32) {
    %c0_i32 = arith.constant 0 : i32
    %c0_i32_0 = arith.constant 0 : i32
    %c0_i32_1 = arith.constant 0 : i32
    %c0_i32_2 = arith.constant 0 : i32
    return %c0_i32, %c0_i32_0, %c0_i32_1 : i32, i32, i32
  }
  func.func @transform_6(%arg0: i32) -> (i32, i32, i32) {
    %c0_i32 = arith.constant 0 : i32
    %c0_i32_0 = arith.constant 0 : i32
    %c0_i32_1 = arith.constant 0 : i32
    return %arg0, %c0_i32, %c0_i32_0 : i32, i32, i32
  }
  func.func @transform_7(%arg0: i32) -> (i32, i32) {
    %c0_i32 = arith.constant 0 : i32
    %c0_i32_0 = arith.constant 0 : i32
    %c0_i32_1 = arith.constant 0 : i32
    return %c0_i32, %c0_i32_0 : i32, i32
  }
  func.func @transform_8(%arg0: i32) -> (i32, i32) {
    %c0_i32 = arith.constant 0 : i32
    %c0_i32_0 = arith.constant 0 : i32
    %c0_i32_1 = arith.constant 0 : i32
    return %c0_i32, %c0_i32_0 : i32, i32
  }
  func.func @transform_9(%arg0: i32) -> (i32, i32) {
    %c0_i32 = arith.constant 0 : i32
    %c0_i32_0 = arith.constant 0 : i32
    %c0_i32_1 = arith.constant 0 : i32
    return %c0_i32, %c0_i32_0 : i32, i32
  }
  func.func @transform_10(%arg0: i32) -> (i32, i32, i32) {
    %c0_i32 = arith.constant 0 : i32
    %c0_i32_0 = arith.constant 0 : i32
    %c0_i32_1 = arith.constant 0 : i32
    %c0_i32_2 = arith.constant 0 : i32
    return %c0_i32, %c0_i32_0, %c0_i32_1 : i32, i32, i32
  }
  func.func @transform_11(%arg0: i32) -> (i32, i32) {
    %c0_i32 = arith.constant 0 : i32
    %c0_i32_0 = arith.constant 0 : i32
    %c0_i32_1 = arith.constant 0 : i32
    return %c0_i32, %c0_i32_0 : i32, i32
  }
  func.func @transform_12(%arg0: i32) -> (i32, i32) {
    %c0_i32 = arith.constant 0 : i32
    %c0_i32_0 = arith.constant 0 : i32
    %c0_i32_1 = arith.constant 0 : i32
    return %c0_i32, %c0_i32_0 : i32, i32
  }
  func.func @transform_13(%arg0: i32) -> (i32, i32) {
    %c0_i32 = arith.constant 0 : i32
    %c0_i32_0 = arith.constant 0 : i32
    %c0_i32_1 = arith.constant 0 : i32
    return %c0_i32, %c0_i32_0 : i32, i32
  }
  func.func @transform_14(%arg0: i32) -> (i32, i32) {
    %c0_i32 = arith.constant 0 : i32
    %c0_i32_0 = arith.constant 0 : i32
    %c0_i32_1 = arith.constant 0 : i32
    return %c0_i32, %c0_i32_0 : i32, i32
  }
  func.func @transform_15(%arg0: i32) -> (i32, i32, i32) {
    %c0_i32 = arith.constant 0 : i32
    %c0_i32_0 = arith.constant 0 : i32
    %c0_i32_1 = arith.constant 0 : i32
    return %arg0, %c0_i32, %c0_i32_0 : i32, i32, i32
  }
}

module attributes {stable_mosaic.version = 11 : i64} {
  func.func @_upconv_kernel(%arg0: i32, %arg1: memref<1x64x24xf32, #tpu.memory_space<vmem>>, %arg2: memref<2x2x2x72x24xbf16, #tpu.memory_space<vmem>>, %arg3: memref<1x24xf32, #tpu.memory_space<vmem>>, %arg4: memref<64x2xf32, #tpu.memory_space<vmem>>, %arg5: memref<1x64x96xf32, #tpu.memory_space<vmem>>, %arg6: memref<96x72xbf16, #tpu.memory_space<vmem>>) attributes {dimension_semantics = [#tpu.dimension_semantics<parallel>], iteration_bounds = array<i64: 2>, scalar_prefetch = 0 : i64, scratch_operands = 1 : i64, tpu.core_type = #tpu.core_type<tc>, window_params = [{transform_indices = @transform_0, window_bounds = array<i64: 1, 64, 24>}, {pipeline_mode = #tpu.pipeline_mode<synchronous>, transform_indices = @transform_1, window_bounds = array<i64: 2, 2, 2, 72, 24>}, {pipeline_mode = #tpu.pipeline_mode<synchronous>, transform_indices = @transform_2, window_bounds = array<i64: 1, 24>}, {pipeline_mode = #tpu.pipeline_mode<synchronous>, transform_indices = @transform_3, window_bounds = array<i64: 64, 2>}, {transform_indices = @transform_4, window_bounds = array<i64: 1, 64, 96>}]} {
    %cst = arith.constant 0.000000e+00 : bf16
    %0 = vector.broadcast %cst : bf16 to vector<16x72xbf16>
    %c0 = arith.constant 0 : index
    %c0_0 = arith.constant 0 : index
    %1 = vector.load %arg6[%c0, %c0_0] : memref<96x72xbf16, #tpu.memory_space<vmem>>, vector<16x72xbf16>
    tpu.vector_store %arg6[%c0, %c0_0], %0 {strides = array<i32>} : memref<96x72xbf16, #tpu.memory_space<vmem>>, vector<16x72xbf16>,
    %cst_1 = arith.constant 0.000000e+00 : bf16
    %2 = vector.broadcast %cst_1 : bf16 to vector<16x72xbf16>
    %c80 = arith.constant 80 : index
    %c0_2 = arith.constant 0 : index
    %3 = vector.load %arg6[%c80, %c0_2] : memref<96x72xbf16, #tpu.memory_space<vmem>>, vector<16x72xbf16>
    tpu.vector_store %arg6[%c80, %c0_2], %2 {strides = array<i32>} : memref<96x72xbf16, #tpu.memory_space<vmem>>, vector<16x72xbf16>,
    %c0_3 = arith.constant 0 : index
    %c0_4 = arith.constant 0 : index
    %4 = vector.load %arg4[%c0_3, %c0_4] : memref<64x2xf32, #tpu.memory_space<vmem>>, vector<64x1xf32>
    %c0_5 = arith.constant 0 : index
    %c1 = arith.constant 1 : index
    %5 = vector.load %arg4[%c0_5, %c1] : memref<64x2xf32, #tpu.memory_space<vmem>>, vector<64x1xf32>
    %c0_6 = arith.constant 0 : index
    %c0_7 = arith.constant 0 : index
    %c0_8 = arith.constant 0 : index
    %6 = vector.load %arg1[%c0_6, %c0_7, %c0_8] : memref<1x64x24xf32, #tpu.memory_space<vmem>>, vector<1x64x24xf32>
    %7 = vector.shape_cast %6 : vector<1x64x24xf32> to vector<64x24xf32>
    %cst_9 = arith.constant 0.000000e+00 : f32
    %8 = vector.broadcast %cst_9 : f32 to vector<1x24xf32>
    %9 = vector.extract_strided_slice %7 {offsets = [0, 0], sizes = [63, 24], strides = [1, 1]} : vector<64x24xf32> to vector<63x24xf32>
    %10 = tpu.concatenate %8, %9 in 0 : vector<1x24xf32>, vector<63x24xf32> -> vector<64x24xf32>
    %11 = vector.broadcast %4 : vector<64x1xf32> to vector<64x24xf32>
    %12 = arith.mulf %10, %11 : vector<64x24xf32>
    %13 = vector.extract_strided_slice %7 {offsets = [1, 0], sizes = [63, 24], strides = [1, 1]} : vector<64x24xf32> to vector<63x24xf32>
    %14 = tpu.concatenate %13, %8 in 0 : vector<63x24xf32>, vector<1x24xf32> -> vector<64x24xf32>
    %15 = vector.broadcast %5 : vector<64x1xf32> to vector<64x24xf32>
    %16 = arith.mulf %14, %15 : vector<64x24xf32>
    %17 = arith.truncf %12 : vector<64x24xf32> to vector<64x24xbf16>
    %c16 = arith.constant 16 : index
    %c0_10 = arith.constant 0 : index
    %18 = vector.load %arg6[%c16, %c0_10] : memref<96x72xbf16, #tpu.memory_space<vmem>>, vector<64x24xbf16>
    tpu.vector_store %arg6[%c16, %c0_10], %17 {strides = array<i32>} : memref<96x72xbf16, #tpu.memory_space<vmem>>, vector<64x24xbf16>,
    %19 = arith.truncf %7 : vector<64x24xf32> to vector<64x24xbf16>
    %c16_11 = arith.constant 16 : index
    %c24 = arith.constant 24 : index
    %20 = vector.load %arg6[%c16_11, %c24] : memref<96x72xbf16, #tpu.memory_space<vmem>>, vector<64x24xbf16>
    tpu.vector_store %arg6[%c16_11, %c24], %19 {strides = array<i32>} : memref<96x72xbf16, #tpu.memory_space<vmem>>, vector<64x24xbf16>,
    %21 = arith.truncf %16 : vector<64x24xf32> to vector<64x24xbf16>
    %c16_12 = arith.constant 16 : index
    %c48 = arith.constant 48 : index
    %22 = vector.load %arg6[%c16_12, %c48] : memref<96x72xbf16, #tpu.memory_space<vmem>>, vector<64x24xbf16>
    tpu.vector_store %arg6[%c16_12, %c48], %21 {strides = array<i32>} : memref<96x72xbf16, #tpu.memory_space<vmem>>, vector<64x24xbf16>,
    %cst_13 = arith.constant 0.000000e+00 : f32
    %23 = vector.broadcast %cst_13 : f32 to vector<64x24xf32>
    %c8 = arith.constant 8 : index
    %c0_14 = arith.constant 0 : index
    %24 = vector.load %arg6[%c8, %c0_14] : memref<96x72xbf16, #tpu.memory_space<vmem>>, vector<64x72xbf16>
    %c0_15 = arith.constant 0 : index
    %c0_16 = arith.constant 0 : index
    %c0_17 = arith.constant 0 : index
    %c0_18 = arith.constant 0 : index
    %c0_19 = arith.constant 0 : index
    %25 = vector.load %arg2[%c0_15, %c0_16, %c0_17, %c0_18, %c0_19] : memref<2x2x2x72x24xbf16, #tpu.memory_space<vmem>>, vector<1x1x1x72x24xbf16>
    %26 = vector.shape_cast %25 : vector<1x1x1x72x24xbf16> to vector<72x24xbf16>
    %cst_20 = arith.constant dense<0.000000e+00> : vector<64x24xf32>
    %27 = tpu.matmul %24, %26, %cst_20 {dimension_numbers = #tpu.dot_dimension_numbers<[1], [0], [0], [1], [0, 0, 1, 1], [], []>} : vector<64x72xbf16>, vector<72x24xbf16>, vector<64x24xf32> -> vector<64x24xf32>
    %28 = arith.addf %23, %27 : vector<64x24xf32>
    %c16_21 = arith.constant 16 : index
    %c0_22 = arith.constant 0 : index
    %29 = vector.load %arg6[%c16_21, %c0_22] : memref<96x72xbf16, #tpu.memory_space<vmem>>, vector<64x72xbf16>
    %c0_23 = arith.constant 0 : index
    %c0_24 = arith.constant 0 : index
    %c1_25 = arith.constant 1 : index
    %c0_26 = arith.constant 0 : index
    %c0_27 = arith.constant 0 : index
    %30 = vector.load %arg2[%c0_23, %c0_24, %c1_25, %c0_26, %c0_27] : memref<2x2x2x72x24xbf16, #tpu.memory_space<vmem>>, vector<1x1x1x72x24xbf16>
    %31 = vector.shape_cast %30 : vector<1x1x1x72x24xbf16> to vector<72x24xbf16>
    %cst_28 = arith.constant dense<0.000000e+00> : vector<64x24xf32>
    %32 = tpu.matmul %29, %31, %cst_28 {dimension_numbers = #tpu.dot_dimension_numbers<[1], [0], [0], [1], [0, 0, 1, 1], [], []>} : vector<64x72xbf16>, vector<72x24xbf16>, vector<64x24xf32> -> vector<64x24xf32>
    %33 = arith.addf %28, %32 : vector<64x24xf32>
    %c0_29 = arith.constant 0 : index
    %c0_30 = arith.constant 0 : index
    %34 = vector.load %arg3[%c0_29, %c0_30] : memref<1x24xf32, #tpu.memory_space<vmem>>, vector<1x24xf32>
    %35 = vector.broadcast %34 : vector<1x24xf32> to vector<64x24xf32>
    %36 = arith.addf %33, %35 : vector<64x24xf32>
    %cst_31 = arith.constant 0.000000e+00 : f32
    %37 = vector.broadcast %cst_31 : f32 to vector<64x24xf32>
    %c8_32 = arith.constant 8 : index
    %c0_33 = arith.constant 0 : index
    %38 = vector.load %arg6[%c8_32, %c0_33] : memref<96x72xbf16, #tpu.memory_space<vmem>>, vector<64x72xbf16>
    %c0_34 = arith.constant 0 : index
    %c1_35 = arith.constant 1 : index
    %c0_36 = arith.constant 0 : index
    %c0_37 = arith.constant 0 : index
    %c0_38 = arith.constant 0 : index
    %39 = vector.load %arg2[%c0_34, %c1_35, %c0_36, %c0_37, %c0_38] : memref<2x2x2x72x24xbf16, #tpu.memory_space<vmem>>, vector<1x1x1x72x24xbf16>
    %40 = vector.shape_cast %39 : vector<1x1x1x72x24xbf16> to vector<72x24xbf16>
    %cst_39 = arith.constant dense<0.000000e+00> : vector<64x24xf32>
    %41 = tpu.matmul %38, %40, %cst_39 {dimension_numbers = #tpu.dot_dimension_numbers<[1], [0], [0], [1], [0, 0, 1, 1], [], []>} : vector<64x72xbf16>, vector<72x24xbf16>, vector<64x24xf32> -> vector<64x24xf32>
    %42 = arith.addf %37, %41 : vector<64x24xf32>
    %c16_40 = arith.constant 16 : index
    %c0_41 = arith.constant 0 : index
    %43 = vector.load %arg6[%c16_40, %c0_41] : memref<96x72xbf16, #tpu.memory_space<vmem>>, vector<64x72xbf16>
    %c0_42 = arith.constant 0 : index
    %c1_43 = arith.constant 1 : index
    %c1_44 = arith.constant 1 : index
    %c0_45 = arith.constant 0 : index
    %c0_46 = arith.constant 0 : index
    %44 = vector.load %arg2[%c0_42, %c1_43, %c1_44, %c0_45, %c0_46] : memref<2x2x2x72x24xbf16, #tpu.memory_space<vmem>>, vector<1x1x1x72x24xbf16>
    %45 = vector.shape_cast %44 : vector<1x1x1x72x24xbf16> to vector<72x24xbf16>
    %cst_47 = arith.constant dense<0.000000e+00> : vector<64x24xf32>
    %46 = tpu.matmul %43, %45, %cst_47 {dimension_numbers = #tpu.dot_dimension_numbers<[1], [0], [0], [1], [0, 0, 1, 1], [], []>} : vector<64x72xbf16>, vector<72x24xbf16>, vector<64x24xf32> -> vector<64x24xf32>
    %47 = arith.addf %42, %46 : vector<64x24xf32>
    %c0_48 = arith.constant 0 : index
    %c0_49 = arith.constant 0 : index
    %48 = vector.load %arg3[%c0_48, %c0_49] : memref<1x24xf32, #tpu.memory_space<vmem>>, vector<1x24xf32>
    %49 = vector.broadcast %48 : vector<1x24xf32> to vector<64x24xf32>
    %50 = arith.addf %47, %49 : vector<64x24xf32>
    %cst_50 = arith.constant 0.000000e+00 : f32
    %51 = vector.broadcast %cst_50 : f32 to vector<64x24xf32>
    %c16_51 = arith.constant 16 : index
    %c0_52 = arith.constant 0 : index
    %52 = vector.load %arg6[%c16_51, %c0_52] : memref<96x72xbf16, #tpu.memory_space<vmem>>, vector<64x72xbf16>
    %c1_53 = arith.constant 1 : index
    %c0_54 = arith.constant 0 : index
    %c0_55 = arith.constant 0 : index
    %c0_56 = arith.constant 0 : index
    %c0_57 = arith.constant 0 : index
    %53 = vector.load %arg2[%c1_53, %c0_54, %c0_55, %c0_56, %c0_57] : memref<2x2x2x72x24xbf16, #tpu.memory_space<vmem>>, vector<1x1x1x72x24xbf16>
    %54 = vector.shape_cast %53 : vector<1x1x1x72x24xbf16> to vector<72x24xbf16>
    %cst_58 = arith.constant dense<0.000000e+00> : vector<64x24xf32>
    %55 = tpu.matmul %52, %54, %cst_58 {dimension_numbers = #tpu.dot_dimension_numbers<[1], [0], [0], [1], [0, 0, 1, 1], [], []>} : vector<64x72xbf16>, vector<72x24xbf16>, vector<64x24xf32> -> vector<64x24xf32>
    %56 = arith.addf %51, %55 : vector<64x24xf32>
    %c24_59 = arith.constant 24 : index
    %c0_60 = arith.constant 0 : index
    %57 = vector.load %arg6[%c24_59, %c0_60] : memref<96x72xbf16, #tpu.memory_space<vmem>>, vector<64x72xbf16>
    %c1_61 = arith.constant 1 : index
    %c0_62 = arith.constant 0 : index
    %c1_63 = arith.constant 1 : index
    %c0_64 = arith.constant 0 : index
    %c0_65 = arith.constant 0 : index
    %58 = vector.load %arg2[%c1_61, %c0_62, %c1_63, %c0_64, %c0_65] : memref<2x2x2x72x24xbf16, #tpu.memory_space<vmem>>, vector<1x1x1x72x24xbf16>
    %59 = vector.shape_cast %58 : vector<1x1x1x72x24xbf16> to vector<72x24xbf16>
    %cst_66 = arith.constant dense<0.000000e+00> : vector<64x24xf32>
    %60 = tpu.matmul %57, %59, %cst_66 {dimension_numbers = #tpu.dot_dimension_numbers<[1], [0], [0], [1], [0, 0, 1, 1], [], []>} : vector<64x72xbf16>, vector<72x24xbf16>, vector<64x24xf32> -> vector<64x24xf32>
    %61 = arith.addf %56, %60 : vector<64x24xf32>
    %c0_67 = arith.constant 0 : index
    %c0_68 = arith.constant 0 : index
    %62 = vector.load %arg3[%c0_67, %c0_68] : memref<1x24xf32, #tpu.memory_space<vmem>>, vector<1x24xf32>
    %63 = vector.broadcast %62 : vector<1x24xf32> to vector<64x24xf32>
    %64 = arith.addf %61, %63 : vector<64x24xf32>
    %cst_69 = arith.constant 0.000000e+00 : f32
    %65 = vector.broadcast %cst_69 : f32 to vector<64x24xf32>
    %c16_70 = arith.constant 16 : index
    %c0_71 = arith.constant 0 : index
    %66 = vector.load %arg6[%c16_70, %c0_71] : memref<96x72xbf16, #tpu.memory_space<vmem>>, vector<64x72xbf16>
    %c1_72 = arith.constant 1 : index
    %c1_73 = arith.constant 1 : index
    %c0_74 = arith.constant 0 : index
    %c0_75 = arith.constant 0 : index
    %c0_76 = arith.constant 0 : index
    %67 = vector.load %arg2[%c1_72, %c1_73, %c0_74, %c0_75, %c0_76] : memref<2x2x2x72x24xbf16, #tpu.memory_space<vmem>>, vector<1x1x1x72x24xbf16>
    %68 = vector.shape_cast %67 : vector<1x1x1x72x24xbf16> to vector<72x24xbf16>
    %cst_77 = arith.constant dense<0.000000e+00> : vector<64x24xf32>
    %69 = tpu.matmul %66, %68, %cst_77 {dimension_numbers = #tpu.dot_dimension_numbers<[1], [0], [0], [1], [0, 0, 1, 1], [], []>} : vector<64x72xbf16>, vector<72x24xbf16>, vector<64x24xf32> -> vector<64x24xf32>
    %70 = arith.addf %65, %69 : vector<64x24xf32>
    %c24_78 = arith.constant 24 : index
    %c0_79 = arith.constant 0 : index
    %71 = vector.load %arg6[%c24_78, %c0_79] : memref<96x72xbf16, #tpu.memory_space<vmem>>, vector<64x72xbf16>
    %c1_80 = arith.constant 1 : index
    %c1_81 = arith.constant 1 : index
    %c1_82 = arith.constant 1 : index
    %c0_83 = arith.constant 0 : index
    %c0_84 = arith.constant 0 : index
    %72 = vector.load %arg2[%c1_80, %c1_81, %c1_82, %c0_83, %c0_84] : memref<2x2x2x72x24xbf16, #tpu.memory_space<vmem>>, vector<1x1x1x72x24xbf16>
    %73 = vector.shape_cast %72 : vector<1x1x1x72x24xbf16> to vector<72x24xbf16>
    %cst_85 = arith.constant dense<0.000000e+00> : vector<64x24xf32>
    %74 = tpu.matmul %71, %73, %cst_85 {dimension_numbers = #tpu.dot_dimension_numbers<[1], [0], [0], [1], [0, 0, 1, 1], [], []>} : vector<64x72xbf16>, vector<72x24xbf16>, vector<64x24xf32> -> vector<64x24xf32>
    %75 = arith.addf %70, %74 : vector<64x24xf32>
    %c0_86 = arith.constant 0 : index
    %c0_87 = arith.constant 0 : index
    %76 = vector.load %arg3[%c0_86, %c0_87] : memref<1x24xf32, #tpu.memory_space<vmem>>, vector<1x24xf32>
    %77 = vector.broadcast %76 : vector<1x24xf32> to vector<64x24xf32>
    %78 = arith.addf %75, %77 : vector<64x24xf32>
    %79 = tpu.concatenate %36, %50, %64, %78 in 1 : vector<64x24xf32>, vector<64x24xf32>, vector<64x24xf32>, vector<64x24xf32> -> vector<64x96xf32>
    %c0_88 = arith.constant 0 : index
    %c0_89 = arith.constant 0 : index
    %c0_90 = arith.constant 0 : index
    %80 = vector.load %arg5[%c0_88, %c0_89, %c0_90] : memref<1x64x96xf32, #tpu.memory_space<vmem>>, vector<1x64x96xf32>
    %81 = vector.shape_cast %80 : vector<1x64x96xf32> to vector<64x96xf32>
    %82 = vector.shape_cast %79 : vector<64x96xf32> to vector<1x64x96xf32>
    tpu.vector_store %arg5[%c0_88, %c0_89, %c0_90], %82 {strides = array<i32>} : memref<1x64x96xf32, #tpu.memory_space<vmem>>, vector<1x64x96xf32>,
    return
  }
  func.func @transform_0(%arg0: i32) -> (i32, i32, i32) {
    %c0_i32 = arith.constant 0 : i32
    %c0_i32_0 = arith.constant 0 : i32
    %c0_i32_1 = arith.constant 0 : i32
    return %arg0, %c0_i32, %c0_i32_0 : i32, i32, i32
  }
  func.func @transform_1(%arg0: i32) -> (i32, i32, i32, i32, i32) {
    %c0_i32 = arith.constant 0 : i32
    %c0_i32_0 = arith.constant 0 : i32
    %c0_i32_1 = arith.constant 0 : i32
    %c0_i32_2 = arith.constant 0 : i32
    %c0_i32_3 = arith.constant 0 : i32
    %c0_i32_4 = arith.constant 0 : i32
    return %c0_i32, %c0_i32_0, %c0_i32_1, %c0_i32_2, %c0_i32_3 : i32, i32, i32, i32, i32
  }
  func.func @transform_2(%arg0: i32) -> (i32, i32) {
    %c0_i32 = arith.constant 0 : i32
    %c0_i32_0 = arith.constant 0 : i32
    %c0_i32_1 = arith.constant 0 : i32
    return %c0_i32, %c0_i32_0 : i32, i32
  }
  func.func @transform_3(%arg0: i32) -> (i32, i32) {
    %c0_i32 = arith.constant 0 : i32
    %c0_i32_0 = arith.constant 0 : i32
    %c0_i32_1 = arith.constant 0 : i32
    return %c0_i32, %c0_i32_0 : i32, i32
  }
  func.func @transform_4(%arg0: i32) -> (i32, i32, i32) {
    %c0_i32 = arith.constant 0 : i32
    %c0_i32_0 = arith.constant 0 : i32
    %c0_i32_1 = arith.constant 0 : i32
    return %arg0, %c0_i32, %c0_i32_0 : i32, i32, i32
  }
}

</mosaic_0001>

<bundles_post_ra>
// kernel: efficient_up_block.3
= control target key start
LH: loop header
LB: loop body
LE: loop exit
PB: predicated region body
PF: predicated region fallthrough
CT: control target
= control target key end

     0   :  { %s1744_s15 = smov 0   ;;  %s2234_s0 = inlined_call_operand.vmem [shape: f32[2,64,24], index: 0, kind: input, shape index: {}]   ;;  %s2235_s1 = inlined_call_operand.vmem [shape: bf16[2,2,2,72,24], index: 1, kind: input, shape index: {}]   ;;  %s2236_s2 = inlined_call_operand.vmem [shape: f32[1,24], index: 2, kind: input, shape index: {}]   ;;  %s2237_s3 = inlined_call_operand.vmem [shape: f32[64,2], index: 3, kind: input, shape index: {}]   ;;  %s2238_s4 = inlined_call_operand.vmem [shape: f32[2,64,96], index: 4, kind: output, shape index: {}]  }
   0x1 LB: > { %s1355_s16 = sadd.s32 4294967295, %s1712_s15   ;;  %p1359_p0 = scmp.ge.s32.totalorder %s1712_s15, 1  ;;  %s1712_s15 = sphi %s1744_s15, %s14_s15  }
   0x2   : > { %p162_p1 = scmp.lt.s32.totalorder %s1712_s15, 3 }
   0x4   : > { %p163_p2 = pnand %p1359_p0, %p162_p1 }
   0x5   : > { %p188_p3 = scmp.lt.s32.totalorder (!%p163_p2), %s1355_s16, 1  ;;  %s1716_s7 = smov (!%p163_p2), 24  }
   0x6   : > { %166 = sbr.rel (%p163_p2) target bundleno = 639 (0x27f), region = 36  ;;  %s1717_s12 = smov (!%p163_p2), 48  }
   0x7   : > { %s1718_s10 = smov (!%p163_p2), 72  }
   0xb   : > { %v206_v0 = vld [vmem:[%s2237_s3 + $0x10] sm:$0xff]  ;;  %v204_v1 = vld [vmem:[%s2237_s3] sm:$0xff]  ;;  %vm199_vm0 = vcmask 584704   ;;  %v1714_v2 = vmov 1   ;;  %v1715_v4 = vmov 0   ;;  %s2240_s16 = smov (!%p188_p3, %s1355_s16), 1 }
   0xc   : > { %1691 = vset.pattern.permute.xlu1 %v1714_v2  ;;  %1690 = vset.pattern.permute.xlu0 %v1714_v2  ;;  %v1763_v3 = vld [vmem:[%s2237_s3 + $0x20] sm:$0xff]  ;;  %201 = vst.msk [vmem:[#allocation2 + $0x4] sm:$0xf] %vm199_vm0, %v1715_v4  ;;  %v207_v5 = vld [vmem:[%s2237_s3 + $0x18] sm:$0xff]  ;;  %v205_v6 = vld [vmem:[%s2237_s3 + $0x8] sm:$0xff]  ;;  %s1605_s27 = sshll.u32 %s2240_s16, 6 }
   0xd   : > { %335 = vperm.xlu1 %1691, %v206_v0   ;;  %327 = vperm.xlu0 %1690, %v204_v1   ;;  %202 = vst.msk [vmem:[#allocation2 + $0x28] sm:$0xf] %vm199_vm0, %v1715_v4  ;;  %v1779_v7 = vld [vmem:[%s2237_s3 + $0x28] sm:$0xff]  ;;  %s1786_s6 = scalar_lea.vmem %s2234_s0, %s1605_s27  ;;  %v1803_v12 = vld [vmem:[%s2237_s3 + $0x30] sm:$0xff]  ;;  %v1811_v13 = vld [vmem:[%s2237_s3 + $0x38] sm:$0xff]  ;;  %vm301_vm1 = vcmask 1046528   ;;  %s2179_s11 = scalar_lea.vmem %s2238_s4, %s1605_s27 }
   0xe   : > { %1692 = vset.pattern.permute.xlu2 %v1714_v2  ;;  %v1790_v8 = vld [vmem:[%s1786_s6] sm:$0xff]  ;;  %v1796_v10 = vld [vmem:[%s1786_s6 + $0x8] sm:$0xff]  ;;  %v1815_v14 = vld [vmem:[%s1786_s6 + $0x10] sm:$0xff]  ;;  %vm228_vm2 = vcmask 1040384   ;;  %vm374_vm3 = vcmask 191488   ;;  %vm423_vm4 = vcmask 388288  }
   0xf   : > { %343 = vperm.xlu2 %1692, %v1763_v3   ;;  %v383_v9 = vpack.c.bf16 %v1790_v8, %v1790_v8  ;;  %v384_v11 = vpack.c.bf16 %v1796_v10, %v1796_v10  ;;  %v385_v15 = vpack.c.bf16 %v1815_v14, %v1815_v14  ;;  %v302_v16 = vrot.slane %v1790_v8, 1  ;;  %v1824_v20 = vld [vmem:[%s1786_s6 + $0x18] sm:$0xff]  ;;  %v1827_v21 = vld [vmem:[%s1786_s6 + $0x20] sm:$0xff]  ;;  %v1836_v36 = vld [vmem:[%s1786_s6 + $0x28] sm:$0xff] }
  0x10   : > { %v303_v17 = vrot.slane %v1796_v10, 1  ;;  %v305_v25 = vrot.slane %v1815_v14, 1  ;;  %v307_v26 = vrot.slane %v1824_v20, 1  ;;  %v309_v27 = vrot.slane %v1827_v21, 1  ;;  %v1839_v39 = vld [vmem:[%s1786_s6 + $0x30] sm:$0xff] }
  0x11   : > { %v229_v40 = vrot.slane %v1790_v8, 7  ;;  %v230_v41 = vrot.slane %v1796_v10, 7  ;;  %v311_v42 = vrot.slane %v1836_v36, 1  ;;  %v313_v43 = vrot.slane %v1839_v39, 1  ;;  %v1618_v10 = vld [vmem:[%s2235_s1 + $0x60] sm:$0xff] }
  0x12   : > { %v304_v19 = vsel %vm301_vm1, %v302_v16, %v303_v17  ;;  %v310_v29 = vsel %vm301_vm1, %v307_v26, %v309_v27  ;;  %v306_v30 = vsel %vm301_vm1, %v303_v17, %v305_v25  ;;  %v387_v46 = vpack.c.bf16 %v1827_v21, %v1827_v21 }
  0x13   : > { %v231_v44 = vsel %vm228_vm2, %v229_v40, %v230_v41  ;;  %v308_v48 = vsel %vm301_vm1, %v305_v25, %v307_v26  ;;  %v314_v49 = vsel %vm301_vm1, %v311_v42, %v313_v43  ;;  %v386_v50 = vpack.c.bf16 %v1824_v20, %v1824_v20 }
  0x14   : > { %v252_v56 = vsel %vm228_vm2, 0.0, %v229_v40  ;;  %v312_v61 = vsel %vm301_vm1, %v309_v27, %v311_v42  ;;  %vm569_vm5 = vcmask 1043456   ;;  %vm472_vm6 = vcmask 585088  }
  0x15   : > { %339 = vperm.xlu1 %1691, %v207_v5   ;;  %331 = vperm.xlu0 %1690, %v205_v6   ;;  %vm556_vm7 = vcmask 588800   ;;  %vm1265_vm8 = vcmask 195584   ;;  %vm1274_vm9 = vcmask 392192   ;;  %vm1291_vm10 = vcmask 785408  }
  0x17   : > { %347 = vperm.xlu2 %1692, %v1779_v7  }
  0x1d   : > { %1694 = vset.pattern.permute.xlu1 %v1715_v4  ;;  %1693 = vset.pattern.permute.xlu0 %v1715_v4 }
  0x1e   : > { %260 = vperm.xlu1 %1694, %v205_v6   ;;  %255 = vperm.xlu0 %1693, %v204_v1  }
  0x1f   : > { %399 = vrot.lane.b32.xlu2 %v383_v9, %s1716_s7 }
  0x26   : > { %1695 = vset.pattern.permute.xlu1 %v1714_v2  ;;  %265 = vperm.xlu0 %1693, %v206_v0   ;;  %v1866_v0 = vld [vmem:[%s1786_s6 + $0x38] sm:$0xff] }
  0x27   : > { %351 = vperm.xlu1 %1695, %v1803_v12   ;;  %401 = vrot.lane.b32.xlu2 %v384_v11, %s1716_s7  ;;  %v315_v1 = vrot.slane %v1866_v0, 1  ;;  %v390_v17 = vpack.c.bf16 %v1866_v0, %v1866_v0 }
  0x29   : > { %v325_v6 = vsel %vm301_vm1, %v315_v1, 0.0 }
  0x2f   : > { %355 = vperm.xlu2 %1692, %v1811_v13   ;;  %1696 = vset.pattern.permute.xlu1 %v1715_v4  ;;  %v389_v4 = vpack.c.bf16 %v1839_v39, %v1839_v39 }
  0x37   : > { %403 = vrot.lane.b32.xlu2 %v385_v15, %s1716_s7  ;;  %v316_v15 = vsel %vm301_vm1, %v313_v43, %v315_v1 }
  0x69   : > { %v344_v18 = vpop.permute.xlu2 %343 }
  0x6a   : > { %v362_v63 = vmul.f32 %v344_v18, %v312_v61 }
  0x71   : > { %v348_v31 = vpop.permute.xlu2 %347 }
  0x72   : > { %v363_v54 = vmul.f32 %v348_v31, %v314_v49  ;;  %v1613_v49 = vld [vmem:[%s2235_s1 + $0x34] sm:$0xff] }
  0x74   : > { %v437_v59 = vpack.c.bf16 %v363_v54, %v363_v54  ;;  %v1620_v54 = vld [vmem:[%s2235_s1 + $0x74] sm:$0xff] }
  0x79   : > { %v400_v45 = vpop.permute.xlu2 %399 }
  0x7f   : > { %v336_v22 = vpop.permute.xlu1 %335  ;;  %v328_v23 = vpop.permute.xlu0 %327 }
  0x80   : > { %v358_v24 = vmul.f32 %v328_v23, %v304_v19  ;;  %v360_v53 = vmul.f32 %v336_v22, %v308_v48  ;;  %v497_v19 = vld [vmem:[%s2235_s1 + $0x20] sm:$0xf]  ;;  %v232_v22 = vrot.slane %v1815_v14, 7  ;;  %v1616_v48 = vld [vmem:[%s2235_s1 + $0x50] sm:$0xff] }
  0x81   : > { %v402_v62 = vpop.permute.xlu2 %401  ;;  %v625_v23 = vunpack.c.l.b16 %v497_v19 }
  0x82   : > { %v432_v28 = vpack.c.bf16 %v358_v24, %v358_v24  ;;  %v434_v58 = vpack.c.bf16 %v360_v53, %v360_v53  ;;  %v1612_v53 = vld [vmem:[%s2235_s1 + $0x2c] sm:$0xff] }
  0x83   : > { %v630_v25 = vpack.c.b16 %v625_v23, %v625_v23 }
  0x84   : > { %448 = vrot.lane.b32.xlu1 %v432_v28, %s1717_s12 }
  0x85   : > { %v648_v28 = vsel %vm569_vm5, %v630_v25, 0 }
  0x86   : > { %653 = vmatpush.bf16.msra.mxu1 %v648_v28 }
  0x87   : > { %v340_v32 = vpop.permute.xlu1 %339  ;;  %v332_v33 = vpop.permute.xlu0 %331 }
  0x88   : > { %v361_v34 = vmul.f32 %v340_v32, %v310_v29  ;;  %v359_v35 = vmul.f32 %v332_v33, %v306_v30  ;;  %v1610_v32 = vld [vmem:[%s2235_s1 + $0x18] sm:$0xff]  ;;  %v1372_v33 = vld [vmem:[%s2235_s1 + $0x44] sm:$0xf] }
  0x89   : > { %v356_v8 = vpop.permute.xlu2 %355 }
  0x8a   : > { %v435_v37 = vpack.c.bf16 %v361_v34, %v361_v34  ;;  %v433_v38 = vpack.c.bf16 %v359_v35, %v359_v35  ;;  %v546_v34 = vunpack.c.l.b16 %v1372_v33  ;;  %v1430_v35 = vld [vmem:[%s2235_s1 + $0x8c] sm:$0xf]  ;;  %654 = vmatpush.bf16.msra.mxu1 %v1610_v32  ;;  %v238_v33 = vrot.slane %v1836_v36, 7 }
  0x8c   : > { %450 = vrot.lane.b32.xlu0 %v433_v38, %s1717_s12  ;;  %454 = vrot.lane.b32.xlu2 %v435_v37, %s1717_s12  ;;  %v728_v37 = vunpack.c.l.b16 %v1430_v35  ;;  %v1609_v38 = vld [vmem:[%s2235_s1 + $0x10] sm:$0xff]  ;;  %v551_v40 = vpack.c.b16 %v546_v34, %v546_v34  ;;  %v1637_v35 = vld [vmem:[%s2235_s1 + $0xe8] sm:$0xff] }
  0x8d   : > { %270 = vperm.xlu1 %1696, %v207_v5   ;;  %v388_v5 = vpack.c.bf16 %v1836_v36, %v1836_v36  ;;  %v1641_v34 = vld [vmem:[%s2235_s1 + $0x10c] sm:$0xff] }
  0x8e   : > { %v733_v42 = vpack.c.b16 %v728_v37, %v728_v37  ;;  %v571_v43 = vsel %vm569_vm5, %v551_v40, 0  ;;  %655 = vmatpush.bf16.msra.mxu1 %v1609_v38  ;;  %v1632_v37 = vld [vmem:[%s2235_s1 + $0xbc] sm:$0xff] }
  0x8f   : > { %576 = vmatpush.bf16.msra.mxu0 %v571_v43  ;;  %v1624_v38 = vld [vmem:[%s2235_s1 + $0x98] sm:$0xff] }
  0x90   : > { %v261_v47 = vpop.permute.xlu1 %260  ;;  %v256_v55 = vpop.permute.xlu0 %255 }
  0x91   : > { %v294_v51 = vmul.f32 %v261_v47, %v231_v44  ;;  %v293_v57 = vmul.f32 %v256_v55, %v252_v56  ;;  %v404_v31 = vpop.permute.xlu2 %403  ;;  %v739_v44 = vsel %vm569_vm5, %v733_v42, 0  ;;  %v1608_v47 = vld [vmem:[%s2235_s1 + $0x8] sm:$0xff] }
  0x92   : > { %744 = vmatpush.bf16.msra.mxu2 %v739_v44  ;;  %656 = vmatpush.bf16.msra.mxu1 %v1608_v47  ;;  %v1611_v55 = vld [vmem:[%s2235_s1 + $0x24] sm:$0xff]  ;;  %v1619_v56 = vld [vmem:[%s2235_s1 + $0x6c] sm:$0xff] }
  0x93   : > { %v367_v52 = vpack.c.bf16 %v294_v51, %v294_v51  ;;  %v366_v60 = vpack.c.bf16 %v293_v57, %v293_v57  ;;  %v1607_v51 = vld [vmem:[%s2235_s1] sm:$0xff]  ;;  %v1488_v57 = vld [vmem:[%s2235_s1 + $0xd4] sm:$0xf] }
  0x94   : > { %275 = vperm.xlu0 %1693, %v1763_v3   ;;  %407 = vrot.lane.b32.xlu2 %v387_v46, %s1716_s7  ;;  %v436_v3 = vpack.c.bf16 %v362_v63, %v362_v63  ;;  %v1622_v46 = vld [vmem:[%s2235_s1 + $0x84] sm:$0xff] }
  0x95   : > { %405 = vrot.lane.b32.xlu1 %v386_v50, %s1716_s7  ;;  %376 = vst.msk [vmem:[#allocation2 + $0xc] sm:$0xf] %vm374_vm3, %v367_v52  ;;  %v1621_v50 = vld [vmem:[%s2235_s1 + $0x7c] sm:$0xff]  ;;  %v1615_v52 = vld [vmem:[%s2235_s1 + $0x48] sm:$0xff] }
  0x96   : > { %375 = vst.msk [vmem:[#allocation2 + $0x8] sm:$0xf] %vm374_vm3, %v366_v60  ;;  %745 = vmatpush.bf16.msra.mxu2 %v1622_v46  ;;  %657 = vmatpush.bf16.msra.mxu1 %v1607_v51  ;;  %v1636_v51 = vld [vmem:[%s2235_s1 + $0xe0] sm:$0xff] }
  0x97   : > { %424 = vst.msk [vmem:[#allocation2 + $0x8] sm:$0xf] %vm423_vm4, %v400_v45  ;;  %v1614_v45 = vld [vmem:[%s2235_s1 + $0x3c] sm:$0xff] }
  0x98   : > { %425 = vst.msk [vmem:[#allocation2 + $0xc] sm:$0xf] %vm423_vm4, %v402_v62  ;;  %577 = vmatpush.bf16.msra.mxu0 %v1614_v45 }
  0x99   : > { %v352_v11 = vpop.permute.xlu1 %351 }
  0x9a   : > { %v364_v16 = vmul.f32 %v352_v11, %v316_v15  ;;  %746 = vmatpush.bf16.msra.mxu2 %v1621_v50  ;;  %v1640_v50 = vld [vmem:[%s2235_s1 + $0x104] sm:$0xff] }
  0x9c   : > { %452 = vrot.lane.b32.xlu0 %v434_v58, %s1717_s12  ;;  %458 = vrot.lane.b32.xlu2 %v437_v59, %s1717_s12  ;;  %v438_v18 = vpack.c.bf16 %v364_v16, %v364_v16  ;;  %v1479_v58 = vld [vmem:[%s2235_s1 + $0xb0] sm:$0xf]  ;;  %v902_v59 = vunpack.c.l.b16 %v1488_v57  ;;  %v234_v16 = vrot.slane %v1824_v20, 7  ;;  %v236_v20 = vrot.slane %v1827_v21, 7  ;;  %v1625_v21 = vld [vmem:[%s2235_s1 + $0xa0] sm:$0xff] }
  0x9d   : > { %280 = vperm.xlu1 %1696, %v1779_v7   ;;  %v365_v7 = vmul.f32 %v356_v8, %v325_v6  ;;  %578 = vmatpush.bf16.msra.mxu0 %v1613_v49  ;;  %v973_v60 = vunpack.c.l.b16 %v1479_v58  ;;  %v240_v49 = vrot.slane %v1839_v39, 7  ;;  %v1623_v39 = vld [vmem:[%s2235_s1 + $0x90] sm:$0xff] }
  0x9e   : > { %747 = vmatpush.bf16.msra.mxu2 %v1620_v54  ;;  %v907_v61 = vpack.c.b16 %v902_v59, %v902_v59  ;;  %v235_v19 = vsel %vm228_vm2, %v232_v22, %v234_v16  ;;  %v237_v14 = vsel %vm228_vm2, %v234_v16, %v236_v20  ;;  %v239_v36 = vsel %vm228_vm2, %v236_v20, %v238_v33  ;;  %v1639_v54 = vld [vmem:[%s2235_s1 + $0xfc] sm:$0xff] }
  0x9f   : > { %v439_v9 = vpack.c.bf16 %v365_v7, %v365_v7  ;;  %v978_v62 = vpack.c.b16 %v973_v60, %v973_v60  ;;  %v1626_v7 = vld [vmem:[%s2235_s1 + $0xa8] sm:$0xff] }
  0xa0   : > { %v925_v63 = vsel %vm569_vm5, %v907_v61, 0 }
  0xa1   : > { %579 = vmatpush.bf16.msra.mxu0 %v1612_v53  ;;  %v984_v1 = vsel %vm569_vm5, %v978_v62, 0  ;;  %v242_v53 = vrot.slane %v1866_v0, 7 }
  0xa2   : > { %748 = vmatpush.bf16.msra.mxu2 %v1619_v56  ;;  %989 = vmatpush.bf16.msrb.mxu1 %v984_v1  ;;  %v241_v56 = vsel %vm228_vm2, %v238_v33, %v240_v49 }
  0xa3   : > { %v243_v0 = vsel %vm228_vm2, %v240_v49, %v242_v53 }
  0xa4   : > { %456 = vrot.lane.b32.xlu0 %v436_v3, %s1717_s12  ;;  %411 = vrot.lane.b32.xlu2 %v389_v4, %s1716_s7  ;;  %v1562_v3 = vld [vmem:[%s2235_s1 + $0x11c] sm:$0xf]  ;;  %v1553_v4 = vld [vmem:[%s2235_s1 + $0xf8] sm:$0xf] }
  0xa5   : > { %409 = vrot.lane.b32.xlu1 %v388_v5, %s1716_s7  ;;  %580 = vmatpush.bf16.msra.mxu0 %v1611_v55  ;;  %v1634_v5 = vld [vmem:[%s2235_s1 + $0xcc] sm:$0xff]  ;;  %v1060_v6 = vunpack.c.l.b16 %v1562_v3  ;;  %v1119_v8 = vunpack.c.l.b16 %v1553_v4  ;;  %v1635_v55 = vld [vmem:[%s2235_s1 + $0xd8] sm:$0xff] }
  0xa6   : > { %990 = vmatpush.bf16.msrb.mxu1 %v1626_v7 }
  0xa7   : > { %v1065_v11 = vpack.c.b16 %v1060_v6, %v1060_v6  ;;  %v1124_v15 = vpack.c.b16 %v1119_v8, %v1119_v8 }
  0xa9   : > { %930 = vmatpush.bf16.msrb.mxu0 %v925_v63 }
  0xaa   : > { %991 = vmatpush.bf16.msrb.mxu1 %v1625_v21 }
  0xac   : > { %285 = vperm.xlu0 %1693, %v1803_v12   ;;  %462 = vrot.lane.b32.xlu2 %v439_v9, %s1717_s12  ;;  %v1421_v12 = vld [vmem:[%s2235_s1 + $0x68] sm:$0xf] }
  0xad   : > { %290 = vperm.xlu1 %1696, %v1811_v13   ;;  %v266_v13 = vpop.permute.xlu0 %265  ;;  %v787_v24 = vunpack.c.l.b16 %v1421_v12  ;;  %931 = vmatpush.bf16.msrb.mxu0 %v1634_v5 }
  0xae   : > { %992 = vmatpush.bf16.msrb.mxu1 %v1624_v38 }
  0xaf   : > { %v792_v26 = vpack.c.b16 %v787_v24, %v787_v24 }
  0xb1   : > { %v798_v29 = vsel %vm569_vm5, %v792_v26, 0  ;;  %v1638_v26 = vld [vmem:[%s2235_s1 + $0xf0] sm:$0xff] }
  0xb2   : > { %803 = vmatpush.bf16.msra.mxu3 %v798_v29  ;;  %993 = vmatpush.bf16.msrb.mxu1 %v1623_v39 }
  0xb4   : > { %413 = vrot.lane.b32.xlu0 %v390_v17, %s1716_s7  ;;  %v1071_v17 = vsel %vm569_vm5, %v1065_v11, 0 }
  0xb5   : > { %460 = vrot.lane.b32.xlu1 %v438_v18, %s1717_s12  ;;  %1697 = vset.pattern.permute.xlu0 %v1714_v2  ;;  %v233_v2 = vsel %vm228_vm2, %v230_v41, %v232_v22  ;;  %v1617_v41 = vld [vmem:[%s2235_s1 + $0x58] sm:$0xff]  ;;  %v1130_v18 = vsel %vm569_vm5, %v1124_v15, 0 }
  0xb6   : > { %v295_v27 = vmul.f32 %v266_v13, %v233_v2  ;;  %804 = vmatpush.bf16.msra.mxu3 %v1618_v10  ;;  %1076 = vmatpush.bf16.msrb.mxu2 %v1071_v17  ;;  %v1642_v22 = vld [vmem:[%s2235_s1 + $0x114] sm:$0xff] }
  0xb8   : > { %v368_v30 = vpack.c.bf16 %v295_v27, %v295_v27  ;;  %v1633_v27 = vld [vmem:[%s2235_s1 + $0xc4] sm:$0xff] }
  0xb9   : > { %932 = vmatpush.bf16.msrb.mxu0 %v1633_v27 }
  0xba   : > { %377 = vst.msk [vmem:[#allocation2 + $0x10] sm:$0xf] %vm374_vm3, %v368_v30  ;;  %805 = vmatpush.bf16.msra.mxu3 %v1617_v41  ;;  %1077 = vmatpush.bf16.msrb.mxu2 %v1642_v22 }
  0xbb   : > { %426 = vst.msk [vmem:[#allocation2 + $0x10] sm:$0xf] %vm423_vm4, %v404_v31 }
  0xbd   : > { %933 = vmatpush.bf16.msrb.mxu0 %v1632_v37 }
  0xbe   : > { %806 = vmatpush.bf16.msra.mxu3 %v1616_v48  ;;  %1078 = vmatpush.bf16.msrb.mxu2 %v1641_v34 }
  0xc2   : > { %807 = vmatpush.bf16.msra.mxu3 %v1615_v52  ;;  %v1631_v52 = vld [vmem:[%s2235_s1 + $0xb4] sm:$0xff]  ;;  %1079 = vmatpush.bf16.msrb.mxu2 %v1640_v50 }
  0xc3   : > { %934 = vmatpush.bf16.msrb.mxu0 %v1631_v52 }
  0xc6   : > { %1135 = vmatpush.bf16.msrb.mxu3 %v1130_v18  ;;  %1080 = vmatpush.bf16.msrb.mxu2 %v1639_v54 }
  0xca   : > { %1136 = vmatpush.bf16.msrb.mxu3 %v1638_v26 }
  0xce   : > { %1137 = vmatpush.bf16.msrb.mxu3 %v1637_v35 }
  0xd2   : > { %1138 = vmatpush.bf16.msrb.mxu3 %v1636_v51 }
  0xd6   : > { %1139 = vmatpush.bf16.msrb.mxu3 %v1635_v55 }
  0xe6   : > { %v455_v23 = vpop.permute.xlu2 %454 }
  0xee   : > { %v408_v32 = vpop.permute.xlu2 %407 }
  0xf6   : > { %v449_v9 = vpop.permute.xlu1 %448  ;;  %v459_v44 = vpop.permute.xlu2 %458 }
  0xf7   : > { %473 = vst.msk [vmem:[#allocation2 + $0x8] sm:$0xf] %vm472_vm6, %v449_v9 }
  0xfe   : > { %v451_v12 = vpop.permute.xlu0 %450  ;;  %v1673_v13 = vld [vmem:[#allocation2 + $0x4] sm:$0xff]   ;;  %v412_v57 = vpop.permute.xlu2 %411 }
  0xff   : > { %474 = vst.msk [vmem:[#allocation2 + $0xc] sm:$0xf] %vm472_vm6, %v451_v12  ;;  %v271_v24 = vpop.permute.xlu1 %270  ;;  %1409 = vmatmul.msk.bf16.vlgmr.msra.gmra.mxu1 %vm556_vm7, %v1673_v13  ;;  %1467 = vmatmul.msk.bf16.vlgmr.msra.gmra.mxu3 %vm556_vm7, %v1673_v13 }
 0x100   : > { %v296_v2 = vmul.f32 %v271_v24, %v235_v19 }
 0x102   : > { %v369_v25 = vpack.c.bf16 %v296_v2, %v296_v2  ;;  %v2104_v2 = vld [vmem:[%s2236_s2] ss:$0 sm:$0xff] }
 0x104   : > { %378 = vst.msk [vmem:[#allocation2 + $0x14] sm:$0xf] %vm374_vm3, %v369_v25 }
 0x106   : > { %v276_v28 = vpop.permute.xlu0 %275  ;;  %v2003_v29 = vld [vmem:[#allocation2 + $0x8] sm:$0xff]   ;;  %v463_v6 = vpop.permute.xlu2 %462 }
 0x107   : > { %v297_v30 = vmul.f32 %v276_v28, %v237_v14  ;;  %v406_v31 = vpop.permute.xlu1 %405  ;;  %1389 = vmatmul.msk.bf16.vlgmr.msra.gmra.mxu0 %vm556_vm7, %v2003_v29  ;;  %1447 = vmatmul.msk.bf16.vlgmr.msra.gmra.mxu2 %vm556_vm7, %v2003_v29 }
 0x108   : > { %427 = vst.msk [vmem:[#allocation2 + $0x14] sm:$0xf] %vm423_vm4, %v406_v31 }
 0x109   : > { %v370_v10 = vpack.c.bf16 %v297_v30, %v297_v30  ;;  %476 = vst.msk [vmem:[#allocation2 + $0x14] sm:$0xf] %vm472_vm6, %v455_v23 }
 0x10b   : > { %379 = vst.msk [vmem:[#allocation2 + $0x18] sm:$0xf] %vm374_vm3, %v370_v10 }
 0x10c   : > { %428 = vst.msk [vmem:[#allocation2 + $0x18] sm:$0xf] %vm423_vm4, %v408_v32 }
 0x10e   : > { %v453_v40 = vpop.permute.xlu0 %452 }
 0x10f   : > { %475 = vst.msk [vmem:[#allocation2 + $0x10] sm:$0xf] %vm472_vm6, %v453_v40  ;;  %v281_v41 = vpop.permute.xlu1 %280 }
 0x110   : > { %v298_v42 = vmul.f32 %v281_v41, %v239_v36 }
 0x112   : > { %v371_v43 = vpack.c.bf16 %v298_v42, %v298_v42 }
 0x114   : > { %380 = vst.msk [vmem:[#allocation2 + $0x1c] sm:$0xf] %vm374_vm3, %v371_v43 }
 0x116   : > { %v457_v45 = vpop.permute.xlu0 %456  ;;  %v2032_v46 = vld [vmem:[#allocation2 + $0x10] sm:$0xff]  }
 0x117   : > { %v1675_v47 = vld [vmem:[#allocation2 + $0xc] sm:$0xff]   ;;  %477 = vst.msk [vmem:[#allocation2 + $0x18] sm:$0xf] %vm472_vm6, %v457_v45  ;;  %v410_v48 = vpop.permute.xlu1 %409  ;;  %1390 = vmatmul.msk.bf16.gmra.mxu0 %vm556_vm7, %v2032_v46  ;;  %1448 = vmatmul.msk.bf16.gmra.mxu2 %vm556_vm7, %v2032_v46 }
 0x118   : > { %429 = vst.msk [vmem:[#allocation2 + $0x1c] sm:$0xf] %vm423_vm4, %v410_v48  ;;  %1410 = vmatmul.msk.bf16.gmra.mxu1 %vm556_vm7, %v1675_v47  ;;  %1468 = vmatmul.msk.bf16.gmra.mxu3 %vm556_vm7, %v1675_v47  ;;  %v1627_v15 = vld [vmem:[#allocation2 + $0xc] sm:$0xff] }
 0x119   : > { %478 = vst.msk [vmem:[#allocation2 + $0x1c] sm:$0xf] %vm472_vm6, %v459_v44 }
 0x11e   : > { %v286_v58 = vpop.permute.xlu0 %285  ;;  %v1676_v5 = vld [vmem:[#allocation2 + $0x14] sm:$0xff]  }
 0x11f   : > { %v299_v59 = vmul.f32 %v286_v58, %v241_v56  ;;  %v291_v60 = vpop.permute.xlu1 %290  ;;  %v1628_v16 = vld [vmem:[#allocation2 + $0x14] sm:$0xff] }
 0x120   : > { %v300_v61 = vmul.f32 %v291_v60, %v243_v0  ;;  %v1657_v3 = vld [vmem:[#allocation2 + $0x18] sm:$0xff]  }
 0x121   : > { %v372_v62 = vpack.c.bf16 %v299_v59, %v299_v59  ;;  %v1708_v4 = vld [vmem:[#allocation2 + $0x1c] sm:$0xf] }
 0x122   : > { %v373_v63 = vpack.c.bf16 %v300_v61, %v300_v61 }
 0x123   : > { %381 = vst.msk [vmem:[#allocation2 + $0x20] sm:$0xf] %vm374_vm3, %v372_v62 }
 0x124   : > { %430 = vst.msk [vmem:[#allocation2 + $0x20] sm:$0xf] %vm423_vm4, %v412_v57 }
 0x125   : > { %382 = vst.msk [vmem:[#allocation2 + $0x24] sm:$0xf] %vm374_vm3, %v373_v63 }
 0x126   : > { %v414_v1 = vpop.permute.xlu0 %413 }
 0x127   : > { %431 = vst.msk [vmem:[#allocation2 + $0x24] sm:$0xf] %vm423_vm4, %v414_v1  ;;  %v461_v8 = vpop.permute.xlu1 %460  ;;  %1391 = vmatmul.msk.bf16.gmra.mxu0 %vm556_vm7, %v1657_v3  ;;  %1449 = vmatmul.msk.bf16.gmra.mxu2 %vm556_vm7, %v1657_v3 }
 0x128   : > { %480 = vst.msk [vmem:[#allocation2 + $0x24] sm:$0xf] %vm472_vm6, %v463_v6  ;;  %1411 = vmatmul.msk.bf16.gmra.mxu1 %vm556_vm7, %v1676_v5  ;;  %1469 = vmatmul.msk.bf16.gmra.mxu3 %vm556_vm7, %v1676_v5 }
 0x129   : > { %479 = vst.msk [vmem:[#allocation2 + $0x20] sm:$0xf] %vm472_vm6, %v461_v8 }
 0x12f   : > { %v1630_v18 = vld [vmem:[#allocation2 + $0x24] sm:$0xff] }
 0x130   : > { %v488_v7 = vld [vmem:[#allocation2 + $0x20] sm:$0xff]  }
 0x131   : > { %v1709_v9 = vld [vmem:[#allocation2 + $0x1c] sm:$0xf0]  }
 0x132   : > { %v1703_v11 = vor.u32 %v1709_v9, %v1708_v4  ;;  %v1629_v17 = vld [vmem:[#allocation2 + $0x1c] sm:$0xff] }
 0x137   : > { %1392 = vmatmul.msk.bf16.gmra.mxu0 %vm556_vm7, %v488_v7  ;;  %1450 = vmatmul.msk.bf16.gmra.mxu2 %vm556_vm7, %v488_v7 }
 0x138   : > { %1412 = vmatmul.msk.bf16.gmra.mxu1 %vm556_vm7, %v1703_v11  ;;  %1470 = vmatmul.msk.bf16.gmra.mxu3 %vm556_vm7, %v1703_v11 }
 0x147   : > { %1521 = vmatmul.msk.bf16.vlgmr.msrb.gmra.mxu0 %vm556_vm7, %v1627_v15  ;;  %1579 = vmatmul.msk.bf16.vlgmr.msrb.gmra.mxu2 %vm556_vm7, %v1627_v15 }
 0x148   : > { %1541 = vmatmul.msk.bf16.vlgmr.msrb.gmra.mxu1 %vm556_vm7, %v2003_v29  ;;  %1599 = vmatmul.msk.bf16.vlgmr.msrb.gmra.mxu3 %vm556_vm7, %v2003_v29 }
 0x157   : > { %1522 = vmatmul.msk.bf16.gmra.mxu0 %vm556_vm7, %v1628_v16  ;;  %1580 = vmatmul.msk.bf16.gmra.mxu2 %vm556_vm7, %v1628_v16 }
 0x158   : > { %1542 = vmatmul.msk.bf16.gmra.mxu1 %vm556_vm7, %v2032_v46  ;;  %1600 = vmatmul.msk.bf16.gmra.mxu3 %vm556_vm7, %v2032_v46 }
 0x167   : > { %1523 = vmatmul.msk.bf16.gmra.mxu0 %vm556_vm7, %v1629_v17  ;;  %1581 = vmatmul.msk.bf16.gmra.mxu2 %vm556_vm7, %v1629_v17 }
 0x168   : > { %1543 = vmatmul.msk.bf16.gmra.mxu1 %vm556_vm7, %v1657_v3  ;;  %1601 = vmatmul.msk.bf16.gmra.mxu3 %vm556_vm7, %v1657_v3 }
 0x177   : > { %1524 = vmatmul.msk.bf16.gmra.mxu0 %vm556_vm7, %v1630_v18  ;;  %1582 = vmatmul.msk.bf16.gmra.mxu2 %vm556_vm7, %v1630_v18 }
 0x178   : > { %1544 = vmatmul.msk.bf16.gmra.mxu1 %vm556_vm7, %v488_v7  ;;  %1602 = vmatmul.msk.bf16.gmra.mxu3 %vm556_vm7, %v488_v7 }
 0x17c   : > { %v659_v19 = vpop.f32.mrf.mxu1 }
 0x182   : > { %v809_v23 = vpop.f32.mrf.mxu3 }
 0x184   : > { %v582_v12 = vpop.f32.mrf.mxu0  ;;  %v661_v25 = vpop.f32.mrf.mxu1 }
 0x185   : > { %v2099_v13 = vadd.f32 %v659_v19, %v582_v12 }
 0x18a   : > { %v750_v24 = vpop.f32.mrf.mxu2  ;;  %v811_v27 = vpop.f32.mrf.mxu3 }
 0x18b   : > { %v810_v20 = vadd.f32 %v809_v23, %v750_v24 }
 0x18c   : > { %v584_v14 = vpop.f32.mrf.mxu0 }
 0x18d   : > { %v829_v22 = vadd.f32 %v2104_v2, %v810_v20  ;;  %v2107_v26 = vadd.f32 %v661_v25, %v584_v14 }
 0x18f   : > { %1177 = vrot.lane.b32.xlu0 %v829_v22, %s1716_s7 }
 0x192   : > { %v752_v28 = vpop.f32.mrf.mxu2 }
 0x193   : > { %v812_v29 = vadd.f32 %v811_v27, %v752_v28 }
 0x194   : > { %v587_v21 = vpop.f32.mrf.mxu0 }
 0x195   : > { %v830_v30 = vadd.f32 %v2104_v2, %v812_v29  ;;  %v664_v31 = vpop.f32.mrf.mxu1 }
 0x196   : > { %v2111_v32 = vadd.f32 %v664_v31, %v587_v21 }
 0x197   : > { %1179 = vrot.lane.b32.xlu1 %v830_v30, %s1716_s7 }
 0x19a   : > { %v755_v10 = vpop.f32.mrf.mxu2 }
 0x19b   : > { %v814_v33 = vpop.f32.mrf.mxu3 }
 0x19c   : > { %v589_v34 = vpop.f32.mrf.mxu0  ;;  %v815_v35 = vadd.f32 %v814_v33, %v755_v10 }
 0x19d   : > { %v666_v37 = vpop.f32.mrf.mxu1 }
 0x19e   : > { %v831_v38 = vadd.f32 %v2104_v2, %v815_v35  ;;  %v2115_v36 = vadd.f32 %v666_v37, %v589_v34 }
 0x1a0   : > { %1181 = vrot.lane.b32.xlu2 %v831_v38, %s1716_s7 }
 0x1a2   : > { %v757_v40 = vpop.f32.mrf.mxu2 }
 0x1a3   : > { %v816_v41 = vpop.f32.mrf.mxu3 }
 0x1a4   : > { %v592_v42 = vpop.f32.mrf.mxu0  ;;  %v817_v43 = vadd.f32 %v816_v41, %v757_v40 }
 0x1a5   : > { %v669_v44 = vpop.f32.mrf.mxu1 }
 0x1a6   : > { %v832_v45 = vadd.f32 %v2104_v2, %v817_v43  ;;  %v2119_v46 = vadd.f32 %v669_v44, %v592_v42 }
 0x1a8   : > { %1183 = vrot.lane.b32.xlu0 %v832_v45, %s1716_s7 }
 0x1aa   : > { %v760_v47 = vpop.f32.mrf.mxu2 }
 0x1ab   : > { %v819_v48 = vpop.f32.mrf.mxu3 }
 0x1ac   : > { %v594_v49 = vpop.f32.mrf.mxu0  ;;  %v820_v50 = vadd.f32 %v819_v48, %v760_v47 }
 0x1ad   : > { %v671_v51 = vpop.f32.mrf.mxu1 }
 0x1ae   : > { %v833_v52 = vadd.f32 %v2104_v2, %v820_v50  ;;  %v2123_v53 = vadd.f32 %v671_v51, %v594_v49 }
 0x1b0   : > { %1185 = vrot.lane.b32.xlu1 %v833_v52, %s1716_s7 }
 0x1b2   : > { %v762_v39 = vpop.f32.mrf.mxu2 }
 0x1b3   : > { %v821_v54 = vpop.f32.mrf.mxu3 }
 0x1b4   : > { %v597_v55 = vpop.f32.mrf.mxu0  ;;  %v822_v56 = vadd.f32 %v821_v54, %v762_v39 }
 0x1b5   : > { %v674_v57 = vpop.f32.mrf.mxu1 }
 0x1b6   : > { %v834_v0 = vadd.f32 %v2104_v2, %v822_v56  ;;  %v2127_v58 = vadd.f32 %v674_v57, %v597_v55 }
 0x1b8   : > { %1187 = vrot.lane.b32.xlu2 %v834_v0, %s1716_s7 }
 0x1ba   : > { %v765_v59 = vpop.f32.mrf.mxu2 }
 0x1bb   : > { %v824_v60 = vpop.f32.mrf.mxu3 }
 0x1bc   : > { %v599_v61 = vpop.f32.mrf.mxu0  ;;  %v825_v62 = vadd.f32 %v824_v60, %v765_v59 }
 0x1bd   : > { %v676_v63 = vpop.f32.mrf.mxu1 }
 0x1be   : > { %v835_v1 = vadd.f32 %v2104_v2, %v825_v62  ;;  %v2131_v3 = vadd.f32 %v676_v63, %v599_v61 }
 0x1c0   : > { %1189 = vrot.lane.b32.xlu0 %v835_v1, %s1716_s7 }
 0x1c2   : > { %v767_v4 = vpop.f32.mrf.mxu2 }
 0x1c3   : > { %v826_v5 = vpop.f32.mrf.mxu3 }
 0x1c4   : > { %v827_v6 = vadd.f32 %v826_v5, %v767_v4  ;;  %v936_v8 = vpop.f32.mrf.mxu0 }
 0x1c5   : > { %v995_v7 = vpop.f32.mrf.mxu1 }
 0x1c6   : > { %v836_v9 = vadd.f32 %v2104_v2, %v827_v6  ;;  %v996_v11 = vadd.f32 %v995_v7, %v936_v8 }
 0x1c8   : > { %v1015_v15 = vadd.f32 %v2104_v2, %v996_v11  ;;  %1191 = vrot.lane.b32.xlu1 %v836_v9, %s1716_s7 }
 0x1ca   : > { %v1082_v16 = vpop.f32.mrf.mxu2  ;;  %1209 = vrot.lane.b32.xlu2 %v1015_v15, %s1717_s12 }
 0x1cb   : > { %v1141_v17 = vpop.f32.mrf.mxu3 }
 0x1cc   : > { %v938_v18 = vpop.f32.mrf.mxu0  ;;  %v1142_v19 = vadd.f32 %v1141_v17, %v1082_v16 }
 0x1cd   : > { %v997_v12 = vpop.f32.mrf.mxu1 }
 0x1ce   : > { %v1161_v23 = vadd.f32 %v2104_v2, %v1142_v19  ;;  %v998_v24 = vadd.f32 %v997_v12, %v938_v18 }
 0x1d0   : > { %v1016_v20 = vadd.f32 %v2104_v2, %v998_v24  ;;  %1241 = vrot.lane.b32.xlu1 %v1161_v23, %s1718_s10  ;;  %v688_v24 = vadd.f32 %v2104_v2, %v2123_v53  ;;  %v684_v53 = vadd.f32 %v2104_v2, %v2107_v26  ;;  %v685_v26 = vadd.f32 %v2104_v2, %v2111_v32 }
 0x1d1   : > { %v687_v32 = vadd.f32 %v2104_v2, %v2119_v46 }
 0x1d2   : > { %v1084_v25 = vpop.f32.mrf.mxu2  ;;  %1211 = vrot.lane.b32.xlu0 %v1016_v20, %s1717_s12 }
 0x1d3   : > { %v1143_v14 = vpop.f32.mrf.mxu3 }
 0x1d4   : > { %v941_v22 = vpop.f32.mrf.mxu0  ;;  %v1144_v27 = vadd.f32 %v1143_v14, %v1084_v25 }
 0x1d5   : > { %v1000_v28 = vpop.f32.mrf.mxu1 }
 0x1d6   : > { %v1162_v29 = vadd.f32 %v2104_v2, %v1144_v27  ;;  %v1001_v21 = vadd.f32 %v1000_v28, %v941_v22 }
 0x1d8   : > { %v1017_v30 = vadd.f32 %v2104_v2, %v1001_v21  ;;  %1243 = vrot.lane.b32.xlu2 %v1162_v29, %s1718_s10 }
 0x1da   : > { %v1087_v31 = vpop.f32.mrf.mxu2  ;;  %1213 = vrot.lane.b32.xlu1 %v1017_v30, %s1717_s12 }
 0x1db   : > { %v1146_v10 = vpop.f32.mrf.mxu3 }
 0x1dc   : > { %v943_v33 = vpop.f32.mrf.mxu0  ;;  %v1147_v34 = vadd.f32 %v1146_v10, %v1087_v31  ;;  %v683_v31 = vadd.f32 %v2104_v2, %v2099_v13 }
 0x1dd   : > { %v1002_v35 = vpop.f32.mrf.mxu1 }
 0x1de   : > { %v1163_v37 = vadd.f32 %v2104_v2, %v1147_v34  ;;  %v1003_v38 = vadd.f32 %v1002_v35, %v943_v33 }
 0x1e0   : > { %v1018_v40 = vadd.f32 %v2104_v2, %v1003_v38  ;;  %1245 = vrot.lane.b32.xlu0 %v1163_v37, %s1718_s10 }
 0x1e2   : > { %v1089_v41 = vpop.f32.mrf.mxu2  ;;  %1215 = vrot.lane.b32.xlu2 %v1018_v40, %s1717_s12 }
 0x1e3   : > { %v1148_v42 = vpop.f32.mrf.mxu3 }
 0x1e4   : > { %v946_v43 = vpop.f32.mrf.mxu0  ;;  %v1149_v44 = vadd.f32 %v1148_v42, %v1089_v41 }
 0x1e5   : > { %v1005_v45 = vpop.f32.mrf.mxu1 }
 0x1e6   : > { %v1164_v47 = vadd.f32 %v2104_v2, %v1149_v44  ;;  %v1006_v48 = vadd.f32 %v1005_v45, %v946_v43 }
 0x1e8   : > { %v1019_v49 = vadd.f32 %v2104_v2, %v1006_v48  ;;  %1247 = vrot.lane.b32.xlu1 %v1164_v47, %s1718_s10 }
 0x1ea   : > { %v1092_v50 = vpop.f32.mrf.mxu2  ;;  %1217 = vrot.lane.b32.xlu0 %v1019_v49, %s1717_s12  ;;  %v686_v49 = vadd.f32 %v2104_v2, %v2115_v36 }
 0x1eb   : > { %v1151_v51 = vpop.f32.mrf.mxu3 }
 0x1ec   : > { %v948_v52 = vpop.f32.mrf.mxu0  ;;  %v1152_v39 = vadd.f32 %v1151_v51, %v1092_v50 }
 0x1ed   : > { %v1007_v54 = vpop.f32.mrf.mxu1 }
 0x1ee   : > { %v1165_v55 = vadd.f32 %v2104_v2, %v1152_v39  ;;  %v1008_v56 = vadd.f32 %v1007_v54, %v948_v52 }
 0x1f0   : > { %v1020_v57 = vadd.f32 %v2104_v2, %v1008_v56  ;;  %1249 = vrot.lane.b32.xlu2 %v1165_v55, %s1718_s10 }
 0x1f2   : > { %v1094_v0 = vpop.f32.mrf.mxu2  ;;  %1219 = vrot.lane.b32.xlu1 %v1020_v57, %s1717_s12 }
 0x1f3   : > { %v1153_v59 = vpop.f32.mrf.mxu3 }
 0x1f4   : > { %v951_v60 = vpop.f32.mrf.mxu0  ;;  %v1154_v17 = vadd.f32 %v1153_v59, %v1094_v0  ;;  %v689_v59 = vadd.f32 %v2104_v2, %v2127_v58 }
 0x1f5   : > { %v1010_v61 = vpop.f32.mrf.mxu1 }
 0x1f6   : > { %v1011_v62 = vadd.f32 %v1010_v61, %v951_v60  ;;  %v1166_v12 = vadd.f32 %v2104_v2, %v1154_v17  ;;  %v690_v61 = vadd.f32 %v2104_v2, %v2131_v3 }
 0x1f8   : > { %v1021_v63 = vadd.f32 %v2104_v2, %v1011_v62 }
 0x1fa   : > { %v1097_v1 = vpop.f32.mrf.mxu2  ;;  %1221 = vrot.lane.b32.xlu2 %v1021_v63, %s1717_s12  ;;  %v1182_v23 = vpop.permute.xlu2 %1181 }
 0x1fb   : > { %v1156_v4 = vpop.f32.mrf.mxu3  ;;  %v1268_v43 = vsel %vm1265_vm8, %v685_v26, %v1182_v23 }
 0x1fc   : > { %v953_v5 = vpop.f32.mrf.mxu0  ;;  %v1157_v6 = vadd.f32 %v1156_v4, %v1097_v1 }
 0x1fd   : > { %v1012_v8 = vpop.f32.mrf.mxu1 }
 0x1fe   : > { %v1167_v7 = vadd.f32 %v2104_v2, %v1157_v6  ;;  %v1013_v9 = vadd.f32 %v1012_v8, %v953_v5 }
 0x200   : > { %v1022_v11 = vadd.f32 %v2104_v2, %v1013_v9  ;;  %1253 = vrot.lane.b32.xlu1 %v1167_v7, %s1718_s10 }
 0x201   : > { %v1178_v22 = vpop.permute.xlu0 %1177 }
 0x202   : > { %v1099_v15 = vpop.f32.mrf.mxu2  ;;  %1223 = vrot.lane.b32.xlu0 %v1022_v11, %s1717_s12  ;;  %v1266_v10 = vsel %vm1265_vm8, %v683_v31, %v1178_v22 }
 0x203   : > { %v1158_v16 = vpop.f32.mrf.mxu3 }
 0x204   : > { %v1159_v18 = vadd.f32 %v1158_v16, %v1099_v15 }
 0x206   : > { %v1168_v19 = vadd.f32 %v2104_v2, %v1159_v18 }
 0x208   : > { %1255 = vrot.lane.b32.xlu2 %v1168_v19, %s1718_s10 }
 0x209   : > { %v1180_v14 = vpop.permute.xlu1 %1179 }
 0x20a   : > { %1251 = vrot.lane.b32.xlu0 %v1166_v12, %s1718_s10  ;;  %v1267_v35 = vsel %vm1265_vm8, %v684_v53, %v1180_v14 }
 0x212   : > { %v1188_v20 = vpop.permute.xlu2 %1187 }
 0x213   : > { %v1271_v25 = vsel %vm1265_vm8, %v688_v24, %v1188_v20 }
 0x21a   : > { %v1184_v28 = vpop.permute.xlu0 %1183 }
 0x21b   : > { %v1269_v50 = vsel %vm1265_vm8, %v686_v49, %v1184_v28 }
 0x222   : > { %v1186_v27 = vpop.permute.xlu1 %1185 }
 0x223   : > { %v1270_v54 = vsel %vm1265_vm8, %v687_v32, %v1186_v27 }
 0x224   : > { %v1210_v30 = vpop.permute.xlu2 %1209 }
 0x225   : > { %v1275_v33 = vsel %vm1274_vm9, %v1266_v10, %v1210_v30 }
 0x232   : > { %v1190_v21 = vpop.permute.xlu0 %1189  ;;  %v1244_v38 = vpop.permute.xlu2 %1243 }
 0x233   : > { %v1272_v60 = vsel %vm1265_vm8, %v689_v59, %v1190_v21 }
 0x23a   : > { %v1192_v29 = vpop.permute.xlu1 %1191 }
 0x23b   : > { %v1273_v4 = vsel %vm1265_vm8, %v690_v61, %v1192_v29 }
 0x23c   : > { %v1216_v48 = vpop.permute.xlu2 %1215 }
 0x23d   : > { %v1278_v51 = vsel %vm1274_vm9, %v1269_v50, %v1216_v48 }
 0x242   : > { %v1242_v34 = vpop.permute.xlu1 %1241 }
 0x243   : > { %v1283_v13 = vsel %vm556_vm7, %v1275_v33, %v1242_v34 }
 0x244   : > { %1292 = vst.msk [vmem:[%s2179_s11] sm:$0xff] %vm1291_vm10, %v1283_v13  ;;  %v1212_v37 = vpop.permute.xlu0 %1211 }
 0x245   : > { %v1276_v40 = vsel %vm1274_vm9, %v1267_v35, %v1212_v37 }
 0x246   : > { %v1284_v41 = vsel %vm556_vm7, %v1276_v40, %v1244_v38 }
 0x247   : > { %1293 = vst.msk [vmem:[%s2179_s11 + $0x8] sm:$0xff] %vm1291_vm10, %v1284_v41 }
 0x24a   : > { %v1250_v56 = vpop.permute.xlu2 %1249 }
 0x24c   : > { %v1214_v42 = vpop.permute.xlu1 %1213 }
 0x24d   : > { %v1277_v44 = vsel %vm1274_vm9, %v1268_v43, %v1214_v42 }
 0x252   : > { %v1246_v45 = vpop.permute.xlu0 %1245 }
 0x253   : > { %v1285_v47 = vsel %vm556_vm7, %v1277_v44, %v1246_v45 }
 0x254   : > { %1294 = vst.msk [vmem:[%s2179_s11 + $0x10] sm:$0xff] %vm1291_vm10, %v1285_v47  ;;  %v1222_v0 = vpop.permute.xlu2 %1221 }
 0x255   : > { %v1281_v62 = vsel %vm1274_vm9, %v1272_v60, %v1222_v0 }
 0x25a   : > { %v1248_v52 = vpop.permute.xlu1 %1247 }
 0x25b   : > { %v1286_v39 = vsel %vm556_vm7, %v1278_v51, %v1248_v52 }
 0x25c   : > { %1295 = vst.msk [vmem:[%s2179_s11 + $0x18] sm:$0xff] %vm1291_vm10, %v1286_v39  ;;  %v1218_v55 = vpop.permute.xlu0 %1217 }
 0x25d   : > { %v1279_v57 = vsel %vm1274_vm9, %v1270_v54, %v1218_v55 }
 0x25e   : > { %v1287_v36 = vsel %vm556_vm7, %v1279_v57, %v1250_v56 }
 0x25f   : > { %1296 = vst.msk [vmem:[%s2179_s11 + $0x20] sm:$0xff] %vm1291_vm10, %v1287_v36 }
 0x262   : > { %v1256_v6 = vpop.permute.xlu2 %1255 }
 0x264   : > { %v1220_v46 = vpop.permute.xlu1 %1219 }
 0x265   : > { %v1280_v7 = vsel %vm1274_vm9, %v1271_v25, %v1220_v46 }
 0x272   : > { %v1254_v63 = vpop.permute.xlu1 %1253 }
 0x273   : > { %v1289_v1 = vsel %vm556_vm7, %v1281_v62, %v1254_v63 }
 0x274   : > { %1298 = vst.msk [vmem:[%s2179_s11 + $0x30] sm:$0xff] %vm1291_vm10, %v1289_v1  ;;  %v1224_v5 = vpop.permute.xlu0 %1223 }
 0x275   : > { %v1282_v8 = vsel %vm1274_vm9, %v1273_v4, %v1224_v5 }
 0x276   : > { %v1290_v58 = vsel %vm556_vm7, %v1282_v8, %v1256_v6 }
 0x277   : > { %1299 = vst.msk [vmem:[%s2179_s11 + $0x38] sm:$0xff] %vm1291_vm10, %v1290_v58 }
 0x27c   : > { %v1252_v2 = vpop.permute.xlu0 %1251 }
 0x27d   : > { %v1288_v3 = vsel %vm556_vm7, %v1280_v7, %v1252_v2 }
 0x27e   : > { %1297 = vst.msk [vmem:[%s2179_s11 + $0x28] sm:$0xff] %vm1291_vm10, %v1288_v3 }
 0x27f PF: > { %s14_s15 = sadd.s32 1, %s1712_s15  }
 0x280   : > { %p11_p4 = scmp.ge.s32.totalorder %s14_s15, 4  }
 0x282   :  { %13 = sbr.rel (!%p11_p4) target bundleno = 1 (0x1), region = 73 }

// kernel: efficient_up_block.2
= control target key start
LH: loop header
LB: loop body
LE: loop exit
PB: predicated region body
PF: predicated region fallthrough
CT: control target
= control target key end

     0   :  { %s2964_s18 = smov 0   ;;  %s4035_s0 = inlined_call_operand.vmem [shape: f32[2,64,8], index: 0, kind: input, shape index: {}]   ;;  %s4036_s1 = inlined_call_operand.vmem [shape: f32[2,64,8], index: 1, kind: input, shape index: {}]   ;;  %s4037_s2 = inlined_call_operand.vmem [shape: f32[2,16], index: 2, kind: input, shape index: {}]   ;;  %s4038_s3 = inlined_call_operand.vmem [shape: f32[16,8], index: 3, kind: input, shape index: {}]   ;;  %s4039_s4 = inlined_call_operand.vmem [shape: f32[8,16], index: 4, kind: input, shape index: {}]   ;;  %s4040_s5 = inlined_call_operand.vmem [shape: bf16[3,48,24], index: 5, kind: input, shape index: {}]   ;;  %s4041_s6 = inlined_call_operand.vmem [shape: f32[2,1,24], index: 6, kind: input, shape index: {}]   ;;  %s4042_s7 = inlined_call_operand.vmem [shape: f32[2,24], index: 7, kind: input, shape index: {}]   ;;  %s4043_s8 = inlined_call_operand.vmem [shape: f32[24,8], index: 8, kind: input, shape index: {}]   ;;  %s4044_s9 = inlined_call_operand.vmem [shape: f32[8,24], index: 9, kind: input, shape index: {}]   ;;  %s4045_s10 = inlined_call_operand.vmem [shape: bf16[3,72,24], index: 10, kind: input, shape index: {}]   ;;  %s4046_s11 = inlined_call_operand.vmem [shape: f32[1,24], index: 11, kind: input, shape index: {}]   ;;  %s4047_s12 = inlined_call_operand.vmem [shape: bf16[16,24], index: 12, kind: input, shape index: {}]   ;;  %s4048_s13 = inlined_call_operand.vmem [shape: f32[1,24], index: 13, kind: input, shape index: {}]   ;;  %s4049_s14 = inlined_call_operand.vmem [shape: f32[64,2], index: 14, kind: input, shape index: {}]   ;;  %s4050_s15 = inlined_call_operand.vmem [shape: f32[2,64,24], index: 15, kind: output, shape index: {}]  }
   0x1 LB: > { %s2443_s19 = sadd.s32 4294967295, %s2875_s18   ;;  %p2447_p0 = scmp.ge.s32.totalorder %s2875_s18, 1  ;;  %s2875_s18 = sphi %s2964_s18, %s25_s18  }
   0x2   : > { %p455_p1 = scmp.lt.s32.totalorder %s2875_s18, 3 }
   0x4   : > { %p456_p2 = pnand %p2447_p0, %p455_p1 }
   0x6   : > { %459 = sbr.rel (%p456_p2) target bundleno = 1497 (0x5d9), region = 80 }
   0xb   : > { %p511_p3 = scmp.lt.s32.totalorder %s2443_s19, 1  ;;  %s2877_s27 = smov 8   ;;  %v2657_v8 = vld [vmem:[%s4047_s12] sm:$0xff]  ;;  %v716_v9 = vld [vmem:[%s4038_s3 + $0x8] sm:$0xff]  ;;  %vm4051_vm0 = vcmask 64512   ;;  %vm621_vm1 = vcmask 130048  }
   0xc   : > { %641 = vmatpush.bf16.msra.mxu0 %v2657_v8  ;;  %v715_v10 = vld [vmem:[%s4038_s3] sm:$0xff]  ;;  %734 = vmatpush.msra.mxu1 %v716_v9  ;;  %vm4052_vm2 = vcmask 1040384  }
   0xd   : > { %s4139_s19 = smov (!%p511_p3, %s2443_s19), 1 }
   0xe   : > { %s2975_s20 = sshll.u32 %s4139_s19, 6  ;;  %s523_s23 = scalar_lea.vmem %s4041_s6, %s4139_s19  ;;  %735 = vmatpush.msra.mxu1 %v715_v10 }
   0xf   : > { %s520_s26 = scalar_lea.vmem %s4036_s1, %s2975_s20  ;;  %s2998_s25 = scalar_lea.vmem %s4035_s0, %s2975_s20 }
  0x10   : > { %v558_v0 = vld [vmem:[%s520_s26 + $0x10] sm:$0xff]  ;;  %v556_v1 = vld [vmem:[%s520_s26] sm:$0xff]  ;;  %v559_v3 = vld [vmem:[%s520_s26 + $0x18] sm:$0xff]  ;;  %s3993_s24 = scalar_lea.vmem %s4050_s15, %s2975_s20 }
  0x11   : > { %576 = vrot.lane.b32.xlu1 %v558_v0, %s2877_s27  ;;  %572 = vrot.lane.b32.xlu0 %v556_v1, %s2877_s27  ;;  %v560_v2 = vld [vmem:[%s520_s26 + $0x20] sm:$0xff]  ;;  %v557_v4 = vld [vmem:[%s520_s26 + $0x8] sm:$0xff] }
  0x12   : > { %580 = vrot.lane.b32.xlu2 %v560_v2, %s2877_s27  ;;  %v561_v5 = vld [vmem:[%s520_s26 + $0x28] sm:$0xff]  ;;  %v563_v6 = vld [vmem:[%s520_s26 + $0x38] sm:$0xff]  ;;  %v562_v7 = vld [vmem:[%s520_s26 + $0x30] sm:$0xff]  ;;  %s2880_s26 = smov 32  }
  0x13   : > { %v548_v14 = vld [vmem:[%s2998_s25] sm:$0xff]  ;;  %v550_v15 = vld [vmem:[%s2998_s25 + $0x10] sm:$0xff]  ;;  %v551_v19 = vld [vmem:[%s2998_s25 + $0x18] sm:$0xff] }
  0x14   : > { %v552_v16 = vld [vmem:[%s2998_s25 + $0x20] sm:$0xff]  ;;  %v549_v20 = vld [vmem:[%s2998_s25 + $0x8] sm:$0xff]  ;;  %v555_v47 = vld [vmem:[%s2998_s25 + $0x38] sm:$0xff] }
  0x15   : > { %v553_v30 = vld [vmem:[%s2998_s25 + $0x28] sm:$0xff]  ;;  %v554_v48 = vld [vmem:[%s2998_s25 + $0x30] sm:$0xff]  ;;  %s2882_s25 = smov 24  }
  0x19   : > { %578 = vrot.lane.b32.xlu1 %v559_v3, %s2877_s27  ;;  %574 = vrot.lane.b32.xlu0 %v557_v4, %s2877_s27 }
  0x1a   : > { %582 = vrot.lane.b32.xlu2 %v561_v5, %s2877_s27 }
  0x21   : > { %586 = vrot.lane.b32.xlu1 %v563_v6, %s2877_s27  ;;  %584 = vrot.lane.b32.xlu0 %v562_v7, %s2877_s27  ;;  %s2881_s27 = smov 16  }
  0x6c   : > { %v581_v11 = vpop.permute.xlu2 %580 }
  0x6d   : > { %v3012_v21 = vsel %vm4051_vm0, %v552_v16, %v581_v11 }
  0x6e   : > { %v688_v34 = vmul.f32 %v3012_v21, %v3012_v21  ;;  %v670_v51 = vsel %vm621_vm1, %v3012_v21, 0.0 }
  0x70   : > { %v699_v52 = vsel %vm621_vm1, %v688_v34, 0.0  ;;  %v2878_v34 = vmov 1  }
  0x71   : > { %2775 = vset.pattern.permute.xlu1 %v2878_v34  ;;  %2774 = vset.pattern.permute.xlu0 %v2878_v34 }
  0x72   : > { %2773 = vset.pattern.permute.xlu2 %v2878_v34 }
  0x74   : > { %v583_v29 = vpop.permute.xlu2 %582 }
  0x75   : > { %v3044_v41 = vsel %vm4051_vm0, %v553_v30, %v583_v29 }
  0x76   : > { %v689_v45 = vmul.f32 %v3044_v41, %v3044_v41  ;;  %v672_v53 = vsel %vm621_vm1, %v3044_v41, 0.0  ;;  %v607_v29 = vpack.c.bf16 %v3044_v41, %v3012_v21 }
  0x78   : > { %v701_v60 = vsel %vm621_vm1, %v689_v45, 0.0 }
  0x83   : > { %v577_v12 = vpop.permute.xlu1 %576  ;;  %v573_v13 = vpop.permute.xlu0 %572 }
  0x84   : > { %v3004_v17 = vsel %vm4051_vm0, %v548_v14, %v573_v13  ;;  %v3007_v18 = vsel %vm4051_vm0, %v550_v15, %v577_v12 }
  0x85   : > { %v684_v22 = vmul.f32 %v3004_v17, %v3004_v17  ;;  %v686_v25 = vmul.f32 %v3007_v18, %v3007_v18  ;;  %v663_v28 = vsel %vm621_vm1, %v3004_v17, 0.0  ;;  %v666_v37 = vsel %vm621_vm1, %v3007_v18, 0.0 }
  0x87   : > { %v692_v38 = vsel %vm621_vm1, %v684_v22, 0.0  ;;  %v695_v44 = vsel %vm621_vm1, %v686_v25, 0.0 }
  0x8b   : > { %v579_v23 = vpop.permute.xlu1 %578  ;;  %v575_v24 = vpop.permute.xlu0 %574 }
  0x8c   : > { %v3019_v26 = vsel %vm4051_vm0, %v551_v19, %v579_v23  ;;  %v3022_v27 = vsel %vm4051_vm0, %v549_v20, %v575_v24 }
  0x8d   : > { %v687_v31 = vmul.f32 %v3019_v26, %v3019_v26  ;;  %v664_v32 = vsel %vm621_vm1, %v3022_v27, 0.0  ;;  %v685_v33 = vmul.f32 %v3022_v27, %v3022_v27  ;;  %v605_v36 = vpack.c.bf16 %v3022_v27, %v3004_v17 }
  0x8e   : > { %v665_v35 = vadd.f32 %v664_v32, %v663_v28  ;;  %v668_v39 = vsel %vm621_vm1, %v3019_v26, 0.0  ;;  %v606_v11 = vpack.c.bf16 %v3019_v26, %v3007_v18  ;;  %v542_v32 = vld [vmem:[%s4049_s14 + $0x10] sm:$0xff] }
  0x8f   : > { %v693_v40 = vsel %vm621_vm1, %v685_v33, 0.0  ;;  %2458 = vmatmul.msk.bf16.vlgmr.msra.gmra.mxu0 %vm621_vm1, %v605_v36  ;;  %v697_v46 = vsel %vm621_vm1, %v687_v31, 0.0  ;;  %v741_v31 = vld [vmem:[%s4039_s4] sm:$0xff]  ;;  %v541_v33 = vld [vmem:[%s4049_s14 + $0x8] sm:$0xff]  ;;  %1093 = vperm.xlu1 %2775, %v542_v32  }
  0x90   : > { %v667_v42 = vadd.f32 %v666_v37, %v665_v35  ;;  %v694_v43 = vadd.f32 %v693_v40, %v692_v38  ;;  %760 = vmatpush.msrb.mxu1 %v741_v31  ;;  %v540_v35 = vld [vmem:[%s4049_s14] sm:$0xff]  ;;  %1089 = vperm.xlu0 %2774, %v541_v33   ;;  %v4053_v40 = vmov 0  }
  0x91   : > { %1085 = vperm.xlu2 %2773, %v540_v35   ;;  %v3105_v38 = vld [vmem:[%s4049_s14 + $0x20] sm:$0xff] }
  0x92   : > { %v669_v49 = vadd.f32 %v668_v39, %v667_v42  ;;  %v696_v50 = vadd.f32 %v695_v44, %v694_v43  ;;  %v3110_v39 = vld [vmem:[%s4049_s14 + $0x18] sm:$0xff]  ;;  %v3118_v42 = vld [vmem:[%s4049_s14 + $0x28] sm:$0xff]  ;;  %v3125_v43 = vld [vmem:[%s4049_s14 + $0x30] sm:$0xff] }
  0x93   : > { %v587_v54 = vpop.permute.xlu1 %586  ;;  %v585_v55 = vpop.permute.xlu0 %584  ;;  %v3131_v44 = vld [vmem:[%s4049_s14 + $0x38] sm:$0xff] }
  0x94   : > { %v698_v56 = vadd.f32 %v697_v46, %v696_v50  ;;  %v3059_v57 = vsel %vm4051_vm0, %v555_v47, %v587_v54  ;;  %v3062_v58 = vsel %vm4051_vm0, %v554_v48, %v585_v55  ;;  %v671_v59 = vadd.f32 %v670_v51, %v669_v49 }
  0x95   : > { %v691_v61 = vmul.f32 %v3059_v57, %v3059_v57  ;;  %v674_v62 = vsel %vm621_vm1, %v3062_v58, 0.0  ;;  %v690_v63 = vmul.f32 %v3062_v58, %v3062_v58  ;;  %v676_v2 = vsel %vm621_vm1, %v3059_v57, 0.0 }
  0x96   : > { %v673_v0 = vadd.f32 %v672_v53, %v671_v59  ;;  %v700_v1 = vadd.f32 %v699_v52, %v698_v56  ;;  %v608_v30 = vpack.c.bf16 %v3059_v57, %v3062_v58 }
  0x97   : > { %v703_v3 = vsel %vm621_vm1, %v690_v63, 0.0  ;;  %v705_v6 = vsel %vm621_vm1, %v691_v61, 0.0  ;;  %1101 = vperm.xlu1 %2775, %v3105_v38  }
  0x98   : > { %v675_v4 = vadd.f32 %v674_v62, %v673_v0  ;;  %v702_v5 = vadd.f32 %v701_v60, %v700_v1  ;;  %2776 = vset.pattern.permute.xlu0 %v4053_v40  ;;  %v2782_v62 = vld [vmem:[%s4037_s2] ss:$0 sm:$0xff] }
  0x99   : > { %1013 = vperm.xlu0 %2776, %v540_v35   ;;  %1097 = vperm.xlu2 %2773, %v3110_v39  }
  0x9a   : > { %v677_v7 = vadd.f32 %v676_v2, %v675_v4  ;;  %v704_v8 = vadd.f32 %v703_v3, %v702_v5  ;;  %v2783_v4 = vld [vmem:[%s4037_s2 + $0x1] ss:$0 sm:$0xff] }
  0x9c   : > { %v678_v9 = vrot.slane %v677_v7, 4  ;;  %v706_v10 = vadd.f32 %v705_v6, %v704_v8 }
  0x9e   : > { %v679_v12 = vadd.f32 %v678_v9, %v677_v7  ;;  %v707_v13 = vrot.slane %v706_v10, 4 }
  0x9f   : > { %2459 = vmatmul.msk.bf16.gmra.mxu0 %vm621_vm1, %v606_v11  ;;  %2777 = vset.pattern.permute.xlu1 %v4053_v40 }
  0xa0   : > { %v680_v14 = vrot.slane %v679_v12, 2  ;;  %v708_v15 = vadd.f32 %v707_v13, %v706_v10  ;;  %1018 = vperm.xlu1 %2777, %v541_v33  }
  0xa1   : > { %1023 = vperm.xlu0 %2776, %v542_v32   ;;  %1105 = vperm.xlu2 %2773, %v3118_v42  }
  0xa2   : > { %v681_v16 = vadd.f32 %v680_v14, %v679_v12  ;;  %v709_v19 = vrot.slane %v708_v15, 2 }
  0xa4   : > { %v682_v20 = vrot.slane %v681_v16, 1  ;;  %v710_v22 = vadd.f32 %v709_v19, %v708_v15 }
  0xa6   : > { %v711_v23 = vrot.slane %v710_v22, 1  ;;  %v683_v24 = vadd.f32 %v682_v20, %v681_v16 }
  0xa8   : > { %v712_v25 = vadd.f32 %v711_v23, %v710_v22 }
  0xa9   : > { %1109 = vperm.xlu2 %2773, %v3125_v43  }
  0xaa   : > { %v714_v28 = vsel %vm4052_vm2, %v683_v24, %v712_v25 }
  0xab   : > { %2462 = vmatmul.msk.f32.vlgmr.msra.gmra.mxu1 %vm621_vm1, %v714_v28 }
  0xaf   : > { %2460 = vmatmul.msk.bf16.gmra.mxu0 %vm621_vm1, %v607_v29 }
  0xb1   : > { %1113 = vperm.xlu2 %2773, %v3131_v44  }
  0xb9   : > { %2778 = vset.pattern.permute.xlu2 %v4053_v40 }
  0xbf   : > { %2461 = vmatmul.msk.bf16.gmra.mxu0 %vm621_vm1, %v608_v30 }
 0x128   : > { %v737_v36 = vpop.f32.mrf.mxu1 }
 0x129   : > { %v740_v37 = vmul.f32 0.0078125, %v737_v36 }
 0x12b   : > { %2463 = vmatmul.msk.f32.vlgmr.msrb.gmra.mxu1 %vm4051_vm0, %v740_v37 }
 0x1a8   : > { %v762_v45 = vpop.f32.mrf.mxu1 }
 0x1a9   : > { %v765_v46 = vmul.f32 %v762_v45, %v762_v45  ;;  %v770_v54 = vperm.slane %v762_v45, 0 }
 0x1ab   : > { %v767_v47 = vrot.slane %v765_v46, 7  ;;  %v771_v60 = vsub.f32 %v3004_v17, %v770_v54  ;;  %v772_v63 = vsub.f32 %v3022_v27, %v770_v54  ;;  %v774_v0 = vsub.f32 %v3019_v26, %v770_v54 }
 0x1ac   : > { %v775_v1 = vsub.f32 %v3012_v21, %v770_v54  ;;  %v776_v2 = vsub.f32 %v3044_v41, %v770_v54  ;;  %v777_v3 = vsub.f32 %v3062_v58, %v770_v54  ;;  %v773_v27 = vsub.f32 %v3007_v18, %v770_v54 }
 0x1ad   : > { %v769_v48 = vsub.f32 %v762_v45, %v767_v47  ;;  %v778_v26 = vsub.f32 %v3059_v57, %v770_v54 }
 0x1af   : > { %v779_v49 = vadd.f32 1e-06, %v769_v48 }
 0x1b1   : > { %2787 = vrsqrt.f32 %v779_v49  ;;  %vm786_vm4 = vweird.f32 %v779_v49 }
 0x1b7   : > { %v2788_v50 = vpop.eup %2787 }
 0x1b8   : > { %v781_v51 = vmul.f32 %v2788_v50, %v779_v49  ;;  %vm787_vm3 = vweird.f32 %v2788_v50 }
 0x1b9   : > { %vm788_vm5 = vmor %vm786_vm4, %vm787_vm3 }
 0x1ba   : > { %v782_v52 = vmul.f32 %v2788_v50, %v781_v51 }
 0x1bc   : > { %v783_v53 = vmul.f32 0.5, %v782_v52 }
 0x1be   : > { %v784_v55 = vsub.f32 1.5, %v783_v53 }
 0x1c0   : > { %v785_v56 = vmul.f32 %v2788_v50, %v784_v55 }
 0x1c2   : > { %v789_v59 = vsel %vm788_vm5, %v2788_v50, %v785_v56 }
 0x1c3   : > { %v790_v61 = vperm.slane %v789_v59, 1 }
 0x1c5   : > { %v791_v17 = vmul.f32 %v790_v61, %v771_v60  ;;  %v792_v5 = vmul.f32 %v790_v61, %v772_v63  ;;  %v794_v6 = vmul.f32 %v790_v61, %v774_v0  ;;  %v795_v7 = vmul.f32 %v790_v61, %v775_v1 }
 0x1c6   : > { %v796_v8 = vmul.f32 %v790_v61, %v776_v2  ;;  %v797_v9 = vmul.f32 %v790_v61, %v777_v3  ;;  %v793_v13 = vmul.f32 %v790_v61, %v773_v27  ;;  %v798_v14 = vmul.f32 %v790_v61, %v778_v26 }
 0x1c7   : > { %v801_v10 = vmul.f32 %v2782_v62, %v791_v17  ;;  %v802_v21 = vmul.f32 %v2782_v62, %v792_v5  ;;  %v804_v11 = vmul.f32 %v2782_v62, %v794_v6  ;;  %v805_v41 = vmul.f32 %v2782_v62, %v795_v7 }
 0x1c8   : > { %v806_v12 = vmul.f32 %v2782_v62, %v796_v8  ;;  %v807_v58 = vmul.f32 %v2782_v62, %v797_v9  ;;  %v803_v28 = vmul.f32 %v2782_v62, %v793_v13  ;;  %v808_v30 = vmul.f32 %v2782_v62, %v798_v14 }
 0x1c9   : > { %v3149_v15 = vadd.f32 %v2783_v4, %v801_v10  ;;  %v3151_v16 = vadd.f32 %v2783_v4, %v802_v21  ;;  %v3153_v19 = vadd.f32 %v2783_v4, %v804_v11  ;;  %v3155_v20 = vadd.f32 %v2783_v4, %v805_v41  ;;  %v3213_v41 = vpop.permute.xlu1 %1093 }
 0x1ca   : > { %v3157_v22 = vadd.f32 %v2783_v4, %v806_v12  ;;  %v3159_v18 = vadd.f32 %v2783_v4, %v807_v58  ;;  %v3167_v32 = vadd.f32 %v2783_v4, %v803_v28  ;;  %v3169_v33 = vadd.f32 %v2783_v4, %v808_v30 }
 0x1cb   : > { %v2464_v57 = vmul.f32 -1.442695, %v3149_v15  ;;  %v2465_v23 = vmul.f32 -1.442695, %v3151_v16  ;;  %v2467_v24 = vmul.f32 -1.442695, %v3153_v19 }
 0x1cc   : > { %v2468_v25 = vmul.f32 -1.442695, %v3155_v20  ;;  %v2469_v29 = vmul.f32 -1.442695, %v3157_v22  ;;  %v2470_v31 = vmul.f32 -1.442695, %v3159_v18 }
 0x1cd   : > { %2789 = vpow2.f32 %v2464_v57  ;;  %v2466_v45 = vmul.f32 -1.442695, %v3167_v32  ;;  %v2471_v48 = vmul.f32 -1.442695, %v3169_v33 }
 0x1ce   : > { %2791 = vpow2.f32 %v2465_v23 }
 0x1cf   : > { %2793 = vpow2.f32 %v2467_v24 }
 0x1d0   : > { %2795 = vpow2.f32 %v2468_v25 }
 0x1d1   : > { %2797 = vpow2.f32 %v2469_v29 }
 0x1d2   : > { %2799 = vpow2.f32 %v2470_v31 }
 0x1d3   : > { %v2790_v35 = vpop.eup %2789 }
 0x1d4   : > { %v2792_v36 = vpop.eup %2791  ;;  %v3171_v37 = vadd.f32 1.0, %v2790_v35 }
 0x1d5   : > { %v2794_v46 = vpop.eup %2793  ;;  %v3174_v47 = vadd.f32 1.0, %v2792_v36 }
 0x1d6   : > { %v2796_v49 = vpop.eup %2795  ;;  %2801 = vrcp.f32 %v3171_v37  ;;  %v3179_v52 = vadd.f32 1.0, %v2794_v46  ;;  %v860_v55 = vand.u32 2147483647, %v3171_v37  ;;  %v862_v56 = vand.u32 2147483648, %v3171_v37 }
 0x1d7   : > { %v2798_v50 = vpop.eup %2797  ;;  %2803 = vrcp.f32 %v3174_v47  ;;  %v3181_v53 = vadd.f32 1.0, %v2796_v49  ;;  %v875_v59 = vand.u32 2147483647, %v3174_v47  ;;  %v877_v60 = vand.u32 2147483648, %v3174_v47 }
 0x1d8   : > { %v2800_v51 = vpop.eup %2799  ;;  %2805 = vpow2.f32 %v2466_v45  ;;  %v3183_v54 = vadd.f32 1.0, %v2798_v50  ;;  %vm856_vm6 = vweird.f32 %v3171_v37  ;;  %v907_v63 = vand.u32 2147483648, %v3179_v52 }
 0x1d9   : > { %2807 = vpow2.f32 %v2471_v48  ;;  %v3191_v61 = vadd.f32 1.0, %v2800_v51  ;;  %vm871_vm7 = vweird.f32 %v3174_v47  ;;  %v905_v2 = vand.u32 2147483647, %v3179_v52 }
 0x1da   : > { %2809 = vrcp.f32 %v3179_v52  ;;  %v922_v3 = vand.u32 2147483648, %v3181_v53  ;;  %vm3200_vm8 = vcmp.eq.f32.partialorder %v860_v55, 8.507059e+37  ;;  %v863_v5 = vor.u32 1.1754944e-38, %v862_v56 }
 0x1db   : > { %2811 = vrcp.f32 %v3181_v53  ;;  %v920_v7 = vand.u32 2147483647, %v3181_v53  ;;  %vm3206_vm9 = vcmp.eq.f32.partialorder %v875_v59, 8.507059e+37  ;;  %v878_v26 = vor.u32 1.1754944e-38, %v877_v60 }
 0x1dc   : > { %v2802_v62 = vpop.eup %2801  ;;  %2813 = vrcp.f32 %v3183_v54  ;;  %vm901_vm10 = vweird.f32 %v3179_v52  ;;  %v908_v11 = vor.u32 1.1754944e-38, %v907_v63  ;;  %vm916_vm11 = vweird.f32 %v3181_v53 }
 0x1dd   : > { %v2804_v0 = vpop.eup %2803  ;;  %v852_v1 = vmul.f32 %v2802_v62, %v3171_v37  ;;  %2815 = vrcp.f32 %v3191_v61  ;;  %vm857_vm13 = vweird.f32 %v2802_v62  ;;  %vm3216_vm14 = vcmp.eq.f32.partialorder %v905_v2, 8.507059e+37 }
 0x1de   : > { %v2806_v4 = vpop.eup %2805  ;;  %v867_v6 = vmul.f32 %v2804_v0, %v3174_v47  ;;  %v923_v57 = vor.u32 1.1754944e-38, %v922_v3  ;;  %vm872_vm15 = vweird.f32 %v2804_v0  ;;  %vm3223_vm1 = vcmp.eq.f32.partialorder %v920_v7, 8.507059e+37  ;;  %vm858_vm5 = vmor %vm856_vm6, %vm857_vm13  ;;  %v3255_v3 = vpop.permute.xlu0 %1089 }
 0x1df   : > { %v2808_v8 = vpop.eup %2807  ;;  %v853_v9 = vsub.f32 1.0, %v852_v1  ;;  %v937_v29 = vand.u32 2147483648, %v3183_v54  ;;  %vm931_vm4 = vweird.f32 %v3183_v54  ;;  %vm873_vm12 = vmor %vm871_vm7, %vm872_vm15  ;;  %v3238_v51 = vadd.f32 1.0, %v2806_v4 }
 0x1e0   : > { %v2810_v10 = vpop.eup %2809  ;;  %v868_v21 = vsub.f32 1.0, %v867_v6  ;;  %v3257_v4 = vadd.f32 1.0, %v2808_v8  ;;  %v3268_v8 = vpop.permute.xlu1 %1101  ;;  %v935_v27 = vand.u32 2147483647, %v3183_v54 }
 0x1e1   : > { %v2812_v12 = vpop.eup %2811  ;;  %v854_v58 = vmul.f32 %v2802_v62, %v853_v9  ;;  %v897_v13 = vmul.f32 %v2810_v10, %v3179_v52  ;;  %vm902_vm3 = vweird.f32 %v2810_v10  ;;  %2817 = vrcp.f32 %v3238_v51 }
 0x1e2   : > { %v3220_v23 = vpop.eup %2813  ;;  %v869_v24 = vmul.f32 %v2804_v0, %v868_v21  ;;  %v912_v25 = vmul.f32 %v2812_v12, %v3181_v53  ;;  %vm917_vm0 = vweird.f32 %v2812_v12  ;;  %vm903_vm6 = vmor %vm901_vm10, %vm902_vm3  ;;  %v3274_v53 = vpop.permute.xlu2 %1085  ;;  %2819 = vrcp.f32 %v3257_v4 }
 0x1e3   : > { %v855_v30 = vadd.f32 %v2802_v62, %v854_v58  ;;  %v898_v31 = vsub.f32 1.0, %v897_v13  ;;  %v927_v35 = vmul.f32 %v3220_v23, %v3183_v54  ;;  %vm932_vm2 = vweird.f32 %v3220_v23  ;;  %v2816_v46 = vpop.eup %2815  ;;  %vm918_vm7 = vmor %vm916_vm11, %vm917_vm0 }
 0x1e4   : > { %v870_v36 = vadd.f32 %v2804_v0, %v869_v24  ;;  %v913_v45 = vsub.f32 1.0, %v912_v25  ;;  %v942_v59 = vmul.f32 %v2816_v46, %v3191_v61  ;;  %vm946_vm0 = vweird.f32 %v3191_v61  ;;  %vm3283_vm10 = vmor %vm931_vm4, %vm932_vm2 }
 0x1e5   : > { %v859_v48 = vsel %vm858_vm5, %v2802_v62, %v855_v30  ;;  %v899_v49 = vmul.f32 %v2810_v10, %v898_v31  ;;  %v928_v50 = vsub.f32 1.0, %v927_v35  ;;  %vm936_vm11 = vcmp.eq.f32.partialorder %v935_v27, 8.507059e+37 }
 0x1e6   : > { %v864_v55 = vsel %vm3200_vm8, %v863_v5, %v859_v48  ;;  %v874_v37 = vsel %vm873_vm12, %v2804_v0, %v870_v36  ;;  %v914_v56 = vmul.f32 %v2812_v12, %v913_v45  ;;  %v943_v2 = vsub.f32 1.0, %v942_v59  ;;  %v3311_v45 = vpop.permute.xlu0 %1013 }
 0x1e7   : > { %v879_v60 = vsel %vm3206_vm9, %v878_v26, %v874_v37  ;;  %v3246_v62 = vmul.f32 %v864_v55, %v3149_v15  ;;  %v900_v63 = vadd.f32 %v2810_v10, %v899_v49  ;;  %v929_v47 = vmul.f32 %v3220_v23, %v928_v50 }
 0x1e8   : > { %v3250_v1 = vmul.f32 %v879_v60, %v3151_v16  ;;  %v915_v0 = vadd.f32 %v2812_v12, %v914_v56  ;;  %v944_v7 = vmul.f32 %v2816_v46, %v943_v2  ;;  %vm947_vm8 = vweird.f32 %v2816_v46  ;;  %v3323_v56 = vpop.permute.xlu1 %1018 }
 0x1e9   : > { %v1060_v17 = vrot.slane %v3246_v62, 1  ;;  %v904_v15 = vsel %vm903_vm6, %v2810_v10, %v900_v63  ;;  %v930_v16 = vadd.f32 %v3220_v23, %v929_v47  ;;  %vm4064_vm9 = vcmask 1046528   ;;  %vm3299_vm2 = vmor %vm946_vm0, %vm947_vm8 }
 0x1ea   : > { %v1061_v52 = vrot.slane %v3250_v1, 1  ;;  %v909_v5 = vsel %vm3216_vm14, %v908_v11, %v904_v15  ;;  %v919_v6 = vsel %vm918_vm7, %v2812_v12, %v915_v0  ;;  %v945_v21 = vadd.f32 %v2816_v46, %v944_v7 }
 0x1eb   : > { %v924_v9 = vsel %vm3223_vm1, %v923_v57, %v919_v6  ;;  %v950_v11 = vand.u32 2147483647, %v3191_v61  ;;  %v952_v12 = vand.u32 2147483648, %v3191_v61  ;;  %v3291_v13 = vmul.f32 %v909_v5, %v3153_v19  ;;  %v2818_v61 = vpop.eup %2817  ;;  %vm4071_vm1 = vmmov %vm4064_vm9 }
 0x1ec   : > { %v1062_v26 = vsel %vm4064_vm9, %v1060_v17, %v1061_v52  ;;  %v3294_v14 = vmul.f32 %v924_v9, %v3155_v20  ;;  %v934_v54 = vsel %vm3283_vm10, %v3220_v23, %v930_v16  ;;  %v938_v57 = vor.u32 1.1754944e-38, %v937_v29  ;;  %v2820_v50 = vpop.eup %2819 }
 0x1ed   : > { %v1116_v58 = vmul.f32 %v3274_v53, %v1062_v26  ;;  %v949_v19 = vsel %vm3299_vm2, %v2816_v46, %v945_v21  ;;  %v953_v20 = vor.u32 1.1754944e-38, %v952_v12  ;;  %v882_v30 = vmul.f32 %v2818_v61, %v3238_v51 }
 0x1ee   : > { %v939_v28 = vsel %vm936_vm11, %v938_v57, %v934_v54  ;;  %v890_v31 = vand.u32 2147483647, %v3238_v51  ;;  %v1065_v23 = vrot.slane %v3291_v13, 1  ;;  %v1067_v29 = vrot.slane %v3294_v14, 1  ;;  %vm4076_vm11 = vmmov %vm4071_vm1 }
 0x1ef   : > { %v1190_v25 = vpack.c.bf16 %v1116_v58, %v1116_v58  ;;  %vm951_vm12 = vcmp.eq.f32.partialorder %v950_v11, 8.507059e+37  ;;  %v883_v36 = vsub.f32 1.0, %v882_v30  ;;  %v3314_v46 = vmul.f32 %v939_v28, %v3157_v22 }
 0x1f0   : > { %v954_v35 = vsel %vm951_vm12, %v953_v20, %v949_v19  ;;  %vm886_vm13 = vweird.f32 %v3238_v51  ;;  %v892_v48 = vand.u32 2147483648, %v3238_v51  ;;  %v987_v49 = vrot.slane %v3246_v62, 7 }
 0x1f1   : > { %1206 = vrot.lane.b32.xlu2 %v1190_v25, %s2880_s26  ;;  %v884_v55 = vmul.f32 %v2818_v61, %v883_v36  ;;  %vm887_vm14 = vweird.f32 %v2818_v61  ;;  %vm3319_vm15 = vcmp.eq.f32.partialorder %v890_v31, 8.507059e+37  ;;  %v988_v59 = vrot.slane %v3250_v1, 7  ;;  %v3373_v36 = vpop.permute.xlu2 %1097 }
 0x1f2   : > { %v1068_v22 = vsel %vm4071_vm1, %v1065_v23, %v1067_v29  ;;  %v3332_v60 = vmul.f32 %v954_v35, %v3159_v18  ;;  %v957_v63 = vmul.f32 %v2820_v50, %v3257_v4  ;;  %v967_v47 = vand.u32 2147483648, %v3257_v4  ;;  %vm888_vm5 = vmor %vm886_vm13, %vm887_vm14 }
 0x1f3   : > { %v885_v0 = vadd.f32 %v2818_v61, %v884_v55  ;;  %vm4072_vm3 = vcmask 1040384   ;;  %v1142_v15 = vpack.c.bf16 %v3250_v1, %v3250_v1  ;;  %v893_v16 = vor.u32 1.1754944e-38, %v892_v48  ;;  %vm4078_vm13 = vmmov %vm4071_vm1 }
 0x1f4   : > { %v1010_v2 = vsel %vm4072_vm3, 0.0, %v987_v49  ;;  %vm4073_vm4 = vmmov %vm4072_vm3  ;;  %v958_v5 = vsub.f32 1.0, %v957_v63  ;;  %vm962_vm6 = vweird.f32 %v2820_v50  ;;  %v965_v9 = vand.u32 2147483647, %v3257_v4 }
 0x1f5   : > { %v989_v17 = vsel %vm4073_vm4, %v987_v49, %v988_v59  ;;  %v1051_v18 = vmul.f32 %v3311_v45, %v1010_v2  ;;  %v889_v7 = vsel %vm888_vm5, %v2818_v61, %v885_v0  ;;  %1159 = vrot.lane.b32.xlu0 %v1142_v15, %s2881_s27  ;;  %v1141_v27 = vpack.c.bf16 %v3246_v62, %v3246_v62  ;;  %v3358_v61 = vpop.permute.xlu0 %1023  ;;  %vm4074_vm10 = vmmov %vm4072_vm3 }
 0x1f6   : > { %v1052_v6 = vmul.f32 %v3323_v56, %v989_v17  ;;  %v894_v51 = vsel %vm3319_vm15, %v893_v16, %v889_v7  ;;  %v959_v26 = vmul.f32 %v2820_v50, %v958_v5  ;;  %vm961_vm7 = vweird.f32 %v3257_v4  ;;  %vm4075_vm2 = vmmov %vm4072_vm3 }
 0x1f7   : > { %v1124_v10 = vpack.c.bf16 %v1051_v18, %v1051_v18  ;;  %v973_v11 = vmul.f32 %v894_v51, %v3167_v32  ;;  %v968_v12 = vor.u32 1.1754944e-38, %v967_v47  ;;  %1157 = vrot.lane.b32.xlu1 %v1141_v27, %s2881_s27  ;;  %vm1132_vm0 = vcmask 125952   ;;  %vm963_vm8 = vmor %vm961_vm7, %vm962_vm6 }
 0x1f8   : > { %v1125_v21 = vpack.c.bf16 %v1052_v6, %v1052_v6  ;;  %v960_v58 = vadd.f32 %v2820_v50, %v959_v26  ;;  %v992_v54 = vrot.slane %v3291_v13, 7  ;;  %v994_v62 = vrot.slane %v3294_v14, 7  ;;  %vm4077_vm12 = vmmov %vm4075_vm2 }
 0x1f9   : > { %1133 = vst.msk [vmem:[#allocation2 + $0x8] sm:$0xf] %vm1132_vm0, %v1124_v10  ;;  %v996_v57 = vrot.slane %v3314_v46, 7  ;;  %v1063_v24 = vrot.slane %v973_v11, 1  ;;  %v990_v32 = vrot.slane %v973_v11, 7  ;;  %v1143_v4 = vpack.c.bf16 %v973_v11, %v973_v11  ;;  %vm4079_vm14 = vmmov %vm4075_vm2  ;;  %v3401_v17 = vpop.permute.xlu2 %1105 }
 0x1fa   : > { %1134 = vst.msk [vmem:[#allocation2 + $0xc] sm:$0xf] %vm1132_vm0, %v1125_v21  ;;  %v998_v25 = vrot.slane %v3332_v60, 7  ;;  %v964_v19 = vsel %vm963_vm8, %v2820_v50, %v960_v58  ;;  %vm966_vm9 = vcmp.eq.f32.partialorder %v965_v9, 8.507059e+37  ;;  %v3363_v28 = vsel %vm4074_vm10, %v992_v54, %v994_v62  ;;  %vm4080_vm15 = vmmov %vm4075_vm2  ;;  %v2659_v58 = vld [vmem:[%s4040_s5 + $0x8] sm:$0xff] }
 0x1fb   : > { %v3366_v20 = vsel %vm4075_vm2, %v994_v62, %v996_v57  ;;  %v1064_v30 = vsel %vm4076_vm11, %v1061_v52, %v1063_v24  ;;  %v969_v31 = vsel %vm966_vm9, %v968_v12, %v964_v19  ;;  %v991_v35 = vsel %vm4077_vm12, %v988_v59, %v990_v32  ;;  %1161 = vrot.lane.b32.xlu2 %v1143_v4, %s2881_s27  ;;  %vm4081_vm1 = vmmov %vm4075_vm2  ;;  %v2660_v12 = vld [vmem:[%s4040_s5 + $0x10] sm:$0xff]  ;;  %v2658_v62 = vld [vmem:[%s4040_s5] sm:$0xff] }
 0x1fc   : > { %v1066_v48 = vsel %vm4078_vm13, %v1063_v24, %v1065_v23  ;;  %v1117_v49 = vmul.f32 %v3255_v3, %v1064_v30  ;;  %v978_v50 = vmul.f32 %v969_v31, %v3169_v33  ;;  %v1053_v55 = vmul.f32 %v3358_v61, %v991_v35  ;;  %vm4082_vm3 = vmmov %vm4076_vm11  ;;  %1382 = vmatpush.bf16.msra.mxu2 %v2660_v12  ;;  %v2669_v24 = vld [vmem:[%s4040_s5 + $0x38] sm:$0xff]  ;;  %v3519_v12 = vpop.f32.mrf.mxu0 }
 0x1fd   : > { %v1119_v1 = vmul.f32 %v3373_v36, %v1068_v22  ;;  %1033 = vperm.xlu0 %2776, %v3105_v38   ;;  %v3384_v52 = vsel %vm4079_vm14, %v996_v57, %v998_v25  ;;  %v3387_v37 = vsel %vm4080_vm15, %v990_v32, %v992_v54  ;;  %v1118_v23 = vmul.f32 %v3213_v41, %v1066_v48  ;;  %vm4083_vm4 = vmmov %vm4082_vm3  ;;  %v2662_v57 = vld [vmem:[%s4040_s5 + $0x20] sm:$0xff]  ;;  %v2661_v32 = vld [vmem:[%s4040_s5 + $0x18] sm:$0xff] }
 0x1fe   : > { %v1191_v59 = vpack.c.bf16 %v1117_v49, %v1117_v49  ;;  %v1126_v63 = vpack.c.bf16 %v1053_v55, %v1053_v55  ;;  %v1000_v47 = vrot.slane %v978_v50, 7  ;;  %v1069_v0 = vrot.slane %v3314_v46, 1  ;;  %vm4084_vm5 = vmmov %vm4082_vm3 }
 0x1ff   : > { %v1193_v33 = vpack.c.bf16 %v1119_v1, %v1119_v1  ;;  %v1192_v22 = vpack.c.bf16 %v1118_v23, %v1118_v23  ;;  %v1071_v16 = vrot.slane %v3332_v60, 1  ;;  %v1145_v5 = vpack.c.bf16 %v3294_v14, %v3294_v14  ;;  %vm4085_vm6 = vmmov %vm4082_vm3 }
 0x200   : > { %1208 = vrot.lane.b32.xlu1 %v1191_v59, %s2880_s26  ;;  %1135 = vst.msk [vmem:[#allocation2 + $0x10] sm:$0xf] %vm1132_vm0, %v1126_v63  ;;  %v3394_v38 = vsel %vm4081_vm1, %v998_v25, %v1000_v47  ;;  %v1070_v2 = vsel %vm4082_vm3, %v1067_v29, %v1069_v0  ;;  %v1144_v6 = vpack.c.bf16 %v3291_v13, %v3291_v13  ;;  %v1073_v9 = vrot.slane %v978_v50, 1  ;;  %v2668_v25 = vld [vmem:[%s4040_s5 + $0x30] sm:$0xff]  ;;  %vm4092_vm2 = vmmov %vm4081_vm1 }
 0x201   : > { %v1120_v15 = vmul.f32 %v3268_v8, %v1070_v2  ;;  %v1072_v29 = vsel %vm4083_vm4, %v1069_v0, %v1071_v16  ;;  %v3415_v7 = vpop.permute.xlu2 %1109  ;;  %v1148_v11 = vpack.c.bf16 %v978_v50, %v978_v50  ;;  %1383 = vmatpush.bf16.msra.mxu2 %v2659_v58  ;;  %vm1181_vm7 = vcmask 257152  }
 0x202   : > { %v1074_v14 = vsel %vm4084_vm5, %v1071_v16, %v1073_v9  ;;  %v1083_v13 = vsel %vm4085_vm6, %v1073_v9, 0.0  ;;  %vm530_vm8 = vcmask 388096   ;;  %vm1230_vm9 = vcmask 388352  }
 0x203   : > { %1212 = vrot.lane.b32.xlu2 %v1193_v33, %s2880_s26  ;;  %v1194_v18 = vpack.c.bf16 %v1120_v15, %v1120_v15  ;;  %v1122_v27 = vmul.f32 %v3415_v7, %v1074_v14  ;;  %532 = vst.msk [vmem:[#allocation2 + $0x4] sm:$0xf] %vm530_vm8, %v4053_v40  ;;  %vm1299_vm10 = vcmask 392192   ;;  %vm4093_vm11 = vcmask 64512  }
 0x204   : > { %533 = vst.msk [vmem:[#allocation2 + $0x28] sm:$0xf] %vm530_vm8, %v4053_v40 }
 0x205   : > { %1210 = vrot.lane.b32.xlu0 %v1192_v22, %s2880_s26  ;;  %v1196_v26 = vpack.c.bf16 %v1122_v27, %v1122_v27  ;;  %1384 = vmatpush.bf16.msra.mxu2 %v2658_v62 }
 0x206   : > { %2779 = vset.pattern.permute.xlu0 %v2878_v34  ;;  %v1121_v34 = vmul.f32 %v3401_v17, %v1072_v29 }
 0x208   : > { %1028 = vperm.xlu1 %2777, %v3110_v39   ;;  %v1195_v39 = vpack.c.bf16 %v1121_v34, %v1121_v34 }
 0x209   : > { %v3423_v51 = vpop.permute.xlu2 %1113 }
 0x20a   : > { %v1123_v10 = vmul.f32 %v3423_v51, %v1083_v13 }
 0x20b   : > { %1165 = vrot.lane.b32.xlu2 %v1145_v5, %s2881_s27 }
 0x20c   : > { %v1197_v21 = vpack.c.bf16 %v1123_v10, %v1123_v10 }
 0x20d   : > { %1214 = vrot.lane.b32.xlu0 %v1194_v18, %s2880_s26 }
 0x210   : > { %1163 = vrot.lane.b32.xlu1 %v1144_v6, %s2881_s27 }
 0x213   : > { %1043 = vperm.xlu2 %2778, %v3125_v43   ;;  %v1146_v43 = vpack.c.bf16 %v3314_v46, %v3314_v46 }
 0x215   : > { %1216 = vrot.lane.b32.xlu0 %v1195_v39, %s2880_s26 }
 0x218   : > { %1038 = vperm.xlu1 %2777, %v3118_v42   ;;  %v1147_v42 = vpack.c.bf16 %v3332_v60, %v3332_v60  ;;  %v2663_v60 = vld [vmem:[%s4040_s5 + $0x28] sm:$0xff] }
 0x219   : > { %1317 = vmatpush.bf16.msra.mxu3 %v2663_v60  ;;  %v3521_v60 = vpop.f32.mrf.mxu0 }
 0x21b   : > { %1048 = vperm.xlu2 %2778, %v3131_v44   ;;  %v2670_v44 = vld [vmem:[%s4040_s5 + $0x40] sm:$0xff] }
 0x21c   : > { %1476 = vmatpush.bf16.msrb.mxu0 %v2670_v44  ;;  %2755 = vmatpush.bf16.msra.mxu1 %v2670_v44 }
 0x21d   : > { %1218 = vrot.lane.b32.xlu0 %v1196_v26, %s2880_s26  ;;  %1318 = vmatpush.bf16.msra.mxu3 %v2662_v57 }
 0x220   : > { %1167 = vrot.lane.b32.xlu1 %v1146_v43, %s2881_s27  ;;  %1477 = vmatpush.bf16.msrb.mxu0 %v2669_v24 }
 0x221   : > { %2756 = vmatpush.bf16.msra.mxu1 %v2669_v24  ;;  %1319 = vmatpush.bf16.msra.mxu3 %v2661_v32  ;;  %v3523_v58 = vpop.f32.mrf.mxu0 }
 0x222   : > { %4086 = vst [vmem:[#allocation4_spill] sm:$0xff] %v3523_v58 }
 0x223   : > { %1220 = vrot.lane.b32.xlu2 %v1197_v21, %s2880_s26  ;;  %s2883_s26 = smov 48  }
 0x224   : > { %1478 = vmatpush.bf16.msrb.mxu0 %v2668_v25 }
 0x225   : > { %2757 = vmatpush.bf16.msra.mxu1 %v2668_v25 }
 0x228   : > { %1169 = vrot.lane.b32.xlu1 %v1147_v42, %s2881_s27 }
 0x230   : > { %1171 = vrot.lane.b32.xlu1 %v1148_v11, %s2881_s27 }
 0x24b   : > { %v1207_v46 = vpop.permute.xlu2 %1206 }
 0x255   : > { %v1162_v54 = vpop.permute.xlu2 %1161 }
 0x256   : > { %1184 = vst.msk [vmem:[#allocation2 + $0x10] sm:$0xf] %vm1181_vm7, %v1162_v54  ;;  %v3525_v54 = vpop.f32.mrf.mxu0 }
 0x257   : > { %4087 = vst [vmem:[#allocation5_spill] sm:$0xff] %v3525_v54 }
 0x25d   : > { %v1213_v4 = vpop.permute.xlu2 %1212 }
 0x25e   : > { %v3527_v62 = vpop.f32.mrf.mxu0 }
 0x25f   : > { %4088 = vst [vmem:[#allocation6_spill] sm:$0xff] %v3527_v62 }
 0x265   : > { %v1166_v19 = vpop.permute.xlu2 %1165 }
 0x266   : > { %v3529_v57 = vpop.f32.mrf.mxu0 }
 0x267   : > { %v1160_v30 = vpop.permute.xlu0 %1159  ;;  %4089 = vst [vmem:[#allocation7_spill] sm:$0xff] %v3529_v57 }
 0x268   : > { %1183 = vst.msk [vmem:[#allocation2 + $0xc] sm:$0xf] %vm1181_vm7, %v1160_v30 }
 0x269   : > { %v1158_v31 = vpop.permute.xlu1 %1157 }
 0x26a   : > { %1182 = vst.msk [vmem:[#allocation2 + $0x8] sm:$0xf] %vm1181_vm7, %v1158_v31 }
 0x26b   : > { %1231 = vst.msk [vmem:[#allocation2 + $0x8] sm:$0xf] %vm1230_vm9, %v1207_v46 }
 0x26d   : > { %v3470_v35 = vpop.permute.xlu2 %1043 }
 0x26e   : > { %v1057_v48 = vmul.f32 %v3470_v35, %v3384_v52  ;;  %v3531_v32 = vpop.f32.mrf.mxu0 }
 0x26f   : > { %v3474_v49 = vpop.permute.xlu0 %1033  ;;  %4090 = vst [vmem:[#allocation8_spill] sm:$0xff] %v3531_v32 }
 0x270   : > { %v1055_v50 = vmul.f32 %v3474_v49, %v3363_v28  ;;  %v1130_v55 = vpack.c.bf16 %v1057_v48, %v1057_v48 }
 0x272   : > { %v1128_v1 = vpack.c.bf16 %v1055_v50, %v1055_v50  ;;  %v1209_v59 = vpop.permute.xlu1 %1208  ;;  %v2746_v63 = vld [vmem:[#allocation2 + $0x4] sm:$0xff]   ;;  %1139 = vst.msk [vmem:[#allocation2 + $0x20] sm:$0xf] %vm1132_vm0, %v1130_v55 }
 0x273   : > { %1232 = vst.msk [vmem:[#allocation2 + $0xc] sm:$0xf] %vm1230_vm9, %v1209_v59  ;;  %2506 = vmatmul.msk.bf16.vlgmr.msra.gmra.mxu2 %vm1299_vm10, %v2746_v63  ;;  %v1574_v63 = vld [vmem:[%s4043_s8 + $0x10] sm:$0xff] }
 0x274   : > { %1137 = vst.msk [vmem:[#allocation2 + $0x18] sm:$0xf] %vm1132_vm0, %v1128_v1  ;;  %1591 = vmatpush.msra.mxu0 %v1574_v63 }
 0x275   : > { %1186 = vst.msk [vmem:[#allocation2 + $0x18] sm:$0xf] %vm1181_vm7, %v1166_v19  ;;  %v3483_v52 = vpop.permute.xlu2 %1048 }
 0x276   : > { %v1058_v28 = vmul.f32 %v3483_v52, %v3394_v38  ;;  %v3533_v19 = vpop.f32.mrf.mxu0 }
 0x277   : > { %v1211_v23 = vpop.permute.xlu0 %1210  ;;  %4091 = vst [vmem:[#allocation9_spill] sm:$0xff] %v3533_v19 }
 0x278   : > { %1233 = vst.msk [vmem:[#allocation2 + $0x10] sm:$0xf] %vm1230_vm9, %v1211_v23  ;;  %v1131_v47 = vpack.c.bf16 %v1058_v28, %v1058_v28 }
 0x27a   : > { %v3488_v0 = vpop.permute.xlu1 %1028  ;;  %v2711_v33 = vld [vmem:[#allocation2 + $0x8] sm:$0xff]   ;;  %1140 = vst.msk [vmem:[#allocation2 + $0x24] sm:$0xf] %vm1132_vm0, %v1131_v47 }
 0x27b   : > { %v1054_v22 = vmul.f32 %v3488_v0, %v3387_v37  ;;  %2490 = vmatmul.msk.bf16.vlgmr.msra.gmra.mxu3 %vm1299_vm10, %v2711_v33 }
 0x27d   : > { %v1127_v2 = vpack.c.bf16 %v1054_v22, %v1054_v22  ;;  %v1221_v43 = vpop.permute.xlu2 %1220 }
 0x27f   : > { %1136 = vst.msk [vmem:[#allocation2 + $0x14] sm:$0xf] %vm1132_vm0, %v1127_v2  ;;  %v1215_v15 = vpop.permute.xlu0 %1214  ;;  %v2664_v16 = vld [vmem:[#allocation2 + $0xc] sm:$0xff] }
 0x280   : > { %1235 = vst.msk [vmem:[#allocation2 + $0x18] sm:$0xf] %vm1230_vm9, %v1215_v15  ;;  %v2748_v38 = vld [vmem:[#allocation2 + $0xc] sm:$0xff]   ;;  %2544 = vmatmul.msk.bf16.vlgmr.msrb.gmra.mxu0 %vm1299_vm10, %v2664_v16 }
 0x282   : > { %v1164_v5 = vpop.permute.xlu1 %1163 }
 0x283   : > { %1185 = vst.msk [vmem:[#allocation2 + $0x14] sm:$0xf] %vm1181_vm7, %v1164_v5  ;;  %2507 = vmatmul.msk.bf16.gmra.mxu2 %vm1299_vm10, %v2748_v38 }
 0x284   : > { %1234 = vst.msk [vmem:[#allocation2 + $0x14] sm:$0xf] %vm1230_vm9, %v1213_v4 }
 0x287   : > { %v1217_v9 = vpop.permute.xlu0 %1216 }
 0x28a   : > { %v3500_v37 = vpop.permute.xlu1 %1038 }
 0x28b   : > { %v1056_v18 = vmul.f32 %v3500_v37, %v3366_v20  ;;  %v2712_v29 = vld [vmem:[#allocation2 + $0x10] sm:$0xff]  }
 0x28c   : > { %2491 = vmatmul.msk.bf16.gmra.mxu3 %vm1299_vm10, %v2712_v29  ;;  %v2665_v34 = vld [vmem:[#allocation2 + $0x14] sm:$0xff]  ;;  %v3543_v29 = vld [vmem:[%s523_s23] ss:$0 sm:$0xff] }
 0x28d   : > { %v1129_v6 = vpack.c.bf16 %v1056_v18, %v1056_v18  ;;  %v2749_v14 = vld [vmem:[#allocation2 + $0x14] sm:$0xff]  }
 0x28f   : > { %1138 = vst.msk [vmem:[#allocation2 + $0x1c] sm:$0xf] %vm1132_vm0, %v1129_v6  ;;  %v1219_v20 = vpop.permute.xlu0 %1218  ;;  %vm4055_vm0 = vcmask 195584  }
 0x290   : > { %2545 = vmatmul.msk.bf16.gmra.mxu0 %vm1299_vm10, %v2665_v34 }
 0x292   : > { %v1168_v39 = vpop.permute.xlu1 %1167 }
 0x293   : > { %1187 = vst.msk [vmem:[#allocation2 + $0x1c] sm:$0xf] %vm1181_vm7, %v1168_v39  ;;  %2508 = vmatmul.msk.bf16.gmra.mxu2 %vm1299_vm10, %v2749_v14  ;;  %v1573_v39 = vld [vmem:[%s4043_s8 + $0x8] sm:$0xff]  ;;  %v1572_v14 = vld [vmem:[%s4043_s8] sm:$0xff] }
 0x294   : > { %1236 = vst.msk [vmem:[#allocation2 + $0x1c] sm:$0xf] %vm1230_vm9, %v1217_v9  ;;  %1592 = vmatpush.msra.mxu0 %v1573_v39 }
 0x296   : > { %1593 = vmatpush.msra.mxu0 %v1572_v14 }
 0x29a   : > { %v1170_v27 = vpop.permute.xlu1 %1169 }
 0x29b   : > { %1188 = vst.msk [vmem:[#allocation2 + $0x20] sm:$0xf] %vm1181_vm7, %v1170_v27  ;;  %v2713_v13 = vld [vmem:[#allocation2 + $0x18] sm:$0xff]  }
 0x29c   : > { %v2869_v26 = vld [vmem:[#allocation2 + $0x1c] sm:$0xf]  ;;  %1237 = vst.msk [vmem:[#allocation2 + $0x20] sm:$0xf] %vm1230_vm9, %v1219_v20  ;;  %2492 = vmatmul.msk.bf16.gmra.mxu3 %vm1299_vm10, %v2713_v13 }
 0x2a2   : > { %v1172_v10 = vpop.permute.xlu1 %1171 }
 0x2a3   : > { %1189 = vst.msk [vmem:[#allocation2 + $0x24] sm:$0xf] %vm1181_vm7, %v1172_v10  ;;  %v2666_v21 = vld [vmem:[#allocation2 + $0x1c] sm:$0xff] }
 0x2a4   : > { %1238 = vst.msk [vmem:[#allocation2 + $0x24] sm:$0xf] %vm1230_vm9, %v1221_v43  ;;  %2546 = vmatmul.msk.bf16.vlgmr.msra.gmra.mxu1 %vm1299_vm10, %v2666_v21  ;;  %v2870_v11 = vld [vmem:[#allocation2 + $0x1c] sm:$0xf0]  }
 0x2a5   : > { %v2863_v44 = vor.u32 %v2870_v11, %v2869_v26 }
 0x2a7   : > { %2509 = vmatmul.msk.bf16.gmra.mxu2 %vm1299_vm10, %v2863_v44 }
 0x2ab   : > { %v1246_v42 = vld [vmem:[#allocation2 + $0x20] sm:$0xff]  }
 0x2ac   : > { %2493 = vmatmul.msk.bf16.gmra.mxu3 %vm1299_vm10, %v1246_v42  ;;  %v2667_v46 = vld [vmem:[#allocation2 + $0x24] sm:$0xff] }
 0x2b4   : > { %2547 = vmatmul.msk.bf16.gmra.mxu1 %vm1299_vm10, %v2667_v46 }
 0x2f6   : > { %v1386_v24 = vpop.f32.mrf.mxu2 }
 0x2fd   : > { %v1480_v31 = vpop.f32.mrf.mxu0 }
 0x2fe   : > { %v1321_v4 = vpop.f32.mrf.mxu3  ;;  %v1388_v25 = vpop.f32.mrf.mxu2 }
 0x2ff   : > { %v1387_v2 = vadd.f32 %v1386_v24, %v1321_v4 }
 0x301   : > { %v1500_v6 = vadd.f32 %v1480_v31, %v1387_v2 }
 0x303   : > { %v3555_v43 = vadd.f32 %v3543_v29, %v1500_v6 }
 0x305   : > { %v1482_v55 = vpop.f32.mrf.mxu0  ;;  %v1542_v4 = vmul.f32 %v3555_v43, %v3555_v43 }
 0x306   : > { %v1323_v30 = vpop.f32.mrf.mxu3  ;;  %v1391_v48 = vpop.f32.mrf.mxu2 }
 0x307   : > { %v1389_v22 = vadd.f32 %v1388_v25, %v1323_v30 }
 0x309   : > { %v1501_v16 = vadd.f32 %v1482_v55, %v1389_v22  ;;  %v1550_v22 = vsel %vm4055_vm0, %v1542_v4, 0.0 }
 0x30b   : > { %v3552_v13 = vadd.f32 %v3543_v29, %v1501_v16 }
 0x30d   : > { %v1485_v28 = vpop.f32.mrf.mxu0  ;;  %v1543_v11 = vmul.f32 %v3552_v13, %v3552_v13  ;;  %v1522_v31 = vsel %vm4055_vm0, %v3552_v13, 0.0 }
 0x30e   : > { %v1393_v1 = vpop.f32.mrf.mxu2 }
 0x30f   : > { %v1326_v50 = vpop.f32.mrf.mxu3  ;;  %v1551_v63 = vsel %vm4055_vm0, %v1543_v11, 0.0 }
 0x310   : > { %v1392_v15 = vadd.f32 %v1391_v48, %v1326_v50 }
 0x312   : > { %v1502_v27 = vadd.f32 %v1485_v28, %v1392_v15 }
 0x314   : > { %v3558_v21 = vadd.f32 %v3543_v29, %v1502_v27 }
 0x315   : > { %v1487_v5 = vpop.f32.mrf.mxu0 }
 0x316   : > { %v1396_v23 = vpop.f32.mrf.mxu2  ;;  %v1544_v48 = vmul.f32 %v3558_v21, %v3558_v21  ;;  %v1524_v28 = vsel %vm4055_vm0, %v3558_v21, 0.0 }
 0x317   : > { %v1328_v59 = vpop.f32.mrf.mxu3 }
 0x318   : > { %v1394_v38 = vadd.f32 %v1393_v1, %v1328_v59  ;;  %v1599_v1 = vld [vmem:[%s4044_s9] sm:$0xff]  ;;  %v1521_v59 = vsel %vm4055_vm0, %v3555_v43, 0.0  ;;  %v1553_v15 = vsel %vm4055_vm0, %v1544_v48, 0.0 }
 0x319   : > { %1618 = vmatpush.msrb.mxu0 %v1599_v1  ;;  %v1523_v2 = vadd.f32 %v1522_v31, %v1521_v59 }
 0x31a   : > { %v1503_v26 = vadd.f32 %v1487_v5, %v1394_v38 }
 0x31b   : > { %v1525_v6 = vadd.f32 %v1524_v28, %v1523_v2 }
 0x31c   : > { %v3563_v44 = vadd.f32 %v3543_v29, %v1503_v26 }
 0x31e   : > { %v1398_v34 = vpop.f32.mrf.mxu2  ;;  %v1526_v16 = vsel %vm4055_vm0, %v3563_v44, 0.0 }
 0x31f   : > { %v1331_v47 = vpop.f32.mrf.mxu3  ;;  %v1527_v27 = vadd.f32 %v1526_v16, %v1525_v6 }
 0x320   : > { %v1397_v20 = vadd.f32 %v1396_v23, %v1331_v47  ;;  %v1545_v23 = vmul.f32 %v3563_v44, %v3563_v44 }
 0x321   : > { %v1490_v33 = vpop.f32.mrf.mxu1 }
 0x322   : > { %v1504_v42 = vadd.f32 %v1490_v33, %v1397_v20 }
 0x324   : > { %v3572_v50 = vadd.f32 %v3543_v29, %v1504_v42 }
 0x326   : > { %v1546_v38 = vmul.f32 %v3572_v50, %v3572_v50 }
 0x327   : > { %v1333_v9 = vpop.f32.mrf.mxu3 }
 0x328   : > { %v1399_v10 = vadd.f32 %v1398_v34, %v1333_v9  ;;  %v1555_v34 = vsel %vm4055_vm0, %v1545_v23, 0.0  ;;  %v1528_v9 = vsel %vm4055_vm0, %v3572_v50, 0.0 }
 0x329   : > { %v1492_v18 = vpop.f32.mrf.mxu1  ;;  %v1529_v4 = vadd.f32 %v1528_v9, %v1527_v27 }
 0x32a   : > { %v1505_v46 = vadd.f32 %v1492_v18, %v1399_v10  ;;  %v1401_v25 = vpop.f32.mrf.mxu2  ;;  %v1552_v18 = vadd.f32 %v1551_v63, %v1550_v22  ;;  %v1557_v10 = vsel %vm4055_vm0, %v1546_v38, 0.0 }
 0x32c   : > { %v3585_v47 = vadd.f32 %v3543_v29, %v1505_v46  ;;  %v1554_v14 = vadd.f32 %v1553_v15, %v1552_v18 }
 0x32e   : > { %v1547_v39 = vmul.f32 %v3585_v47, %v3585_v47  ;;  %v1530_v42 = vsel %vm4055_vm0, %v3585_v47, 0.0 }
 0x32f   : > { %v1336_v30 = vpop.f32.mrf.mxu3  ;;  %v1531_v1 = vadd.f32 %v1530_v42, %v1529_v4 }
 0x330   : > { %v1402_v55 = vadd.f32 %v1401_v25, %v1336_v30  ;;  %v1559_v30 = vsel %vm4055_vm0, %v1547_v39, 0.0 }
 0x331   : > { %v1495_v24 = vpop.f32.mrf.mxu1 }
 0x332   : > { %v1506_v33 = vadd.f32 %v1495_v24, %v1402_v55  ;;  %v1403_v20 = vpop.f32.mrf.mxu2  ;;  %v1556_v24 = vadd.f32 %v1555_v34, %v1554_v14 }
 0x334   : > { %v3594_v5 = vadd.f32 %v3543_v29, %v1506_v33  ;;  %v1558_v55 = vadd.f32 %v1557_v10, %v1556_v24 }
 0x336   : > { %v1548_v11 = vmul.f32 %v3594_v5, %v3594_v5  ;;  %v1532_v31 = vsel %vm4055_vm0, %v3594_v5, 0.0  ;;  %v1560_v28 = vadd.f32 %v1559_v30, %v1558_v55 }
 0x337   : > { %v1338_v26 = vpop.f32.mrf.mxu3  ;;  %v1533_v23 = vadd.f32 %v1532_v31, %v1531_v1 }
 0x338   : > { %v1404_v46 = vadd.f32 %v1403_v20, %v1338_v26  ;;  %v1561_v59 = vsel %vm4055_vm0, %v1548_v11, 0.0 }
 0x339   : > { %v1497_v25 = vpop.f32.mrf.mxu1  ;;  %v1562_v2 = vadd.f32 %v1561_v59, %v1560_v28 }
 0x33a   : > { %v1507_v48 = vadd.f32 %v1497_v25, %v1404_v46 }
 0x33c   : > { %v3611_v63 = vadd.f32 %v3543_v29, %v1507_v48 }
 0x33e   : > { %v1534_v33 = vsel %vm4055_vm0, %v3611_v63, 0.0  ;;  %v1549_v22 = vmul.f32 %v3611_v63, %v3611_v63 }
 0x33f   : > { %v1535_v15 = vadd.f32 %v1534_v33, %v1533_v23 }
 0x340   : > { %v1563_v16 = vsel %vm4055_vm0, %v1549_v22, 0.0 }
 0x341   : > { %v1536_v38 = vrot.slane %v1535_v15, 4  ;;  %v1564_v18 = vadd.f32 %v1563_v16, %v1562_v2 }
 0x343   : > { %v1537_v6 = vadd.f32 %v1536_v38, %v1535_v15  ;;  %v1565_v34 = vrot.slane %v1564_v18, 4  ;;  %v2784_v38 = vld [vmem:[%s4042_s7] ss:$0 sm:$0xff] }
 0x345   : > { %v1538_v9 = vrot.slane %v1537_v6, 2  ;;  %v1566_v39 = vadd.f32 %v1565_v34, %v1564_v18 }
 0x347   : > { %v1539_v29 = vadd.f32 %v1538_v9, %v1537_v6  ;;  %v1567_v14 = vrot.slane %v1566_v39, 2 }
 0x349   : > { %v1540_v27 = vrot.slane %v1539_v29, 1  ;;  %v1568_v20 = vadd.f32 %v1567_v14, %v1566_v39 }
 0x34b   : > { %v1569_v26 = vrot.slane %v1568_v20, 1  ;;  %v1541_v10 = vadd.f32 %v1540_v27, %v1539_v29 }
 0x34d   : > { %v1570_v42 = vadd.f32 %v1569_v26, %v1568_v20 }
 0x34f   : > { %v1571_v11 = vsel %vm4092_vm2, %v1541_v10, %v1570_v42 }
 0x350   : > { %2548 = vmatmul.msk.f32.vlgmr.msra.gmra.mxu0 %vm4055_vm0, %v1571_v11 }
 0x3cd   : > { %v1595_v46 = vpop.f32.mrf.mxu0 }
 0x3ce   : > { %v1598_v24 = vmul.f32 0.0052083335, %v1595_v46 }
 0x3d0   : > { %2549 = vmatmul.msk.f32.vlgmr.msrb.gmra.mxu0 %vm4093_vm11, %v1598_v24 }
 0x44d   : > { %v1620_v4 = vpop.f32.mrf.mxu0 }
 0x44e   : > { %v1623_v25 = vmul.f32 %v1620_v4, %v1620_v4  ;;  %v1628_v23 = vperm.slane %v1620_v4, 0 }
 0x450   : > { %v1625_v30 = vrot.slane %v1623_v25, 7  ;;  %v1630_v15 = vsub.f32 %v3552_v13, %v1628_v23  ;;  %v1629_v18 = vsub.f32 %v3555_v43, %v1628_v23  ;;  %v1631_v6 = vsub.f32 %v3558_v21, %v1628_v23  ;;  %v2785_v13 = vld [vmem:[%s4042_s7 + $0x1] ss:$0 sm:$0xff] }
 0x451   : > { %v1632_v34 = vsub.f32 %v3563_v44, %v1628_v23  ;;  %v1633_v9 = vsub.f32 %v3572_v50, %v1628_v23  ;;  %v1634_v39 = vsub.f32 %v3585_v47, %v1628_v23  ;;  %v1635_v29 = vsub.f32 %v3594_v5, %v1628_v23 }
 0x452   : > { %v1627_v31 = vsub.f32 %v1620_v4, %v1625_v30  ;;  %v1636_v21 = vsub.f32 %v3611_v63, %v1628_v23 }
 0x454   : > { %v1637_v48 = vadd.f32 1e-06, %v1627_v31 }
 0x456   : > { %2821 = vrsqrt.f32 %v1637_v48  ;;  %vm1644_vm13 = vweird.f32 %v1637_v48 }
 0x45c   : > { %v2822_v55 = vpop.eup %2821 }
 0x45d   : > { %v1639_v1 = vmul.f32 %v2822_v55, %v1637_v48  ;;  %vm1645_vm12 = vweird.f32 %v2822_v55 }
 0x45e   : > { %vm1646_vm14 = vmor %vm1644_vm13, %vm1645_vm12 }
 0x45f   : > { %v1640_v59 = vmul.f32 %v2822_v55, %v1639_v1 }
 0x461   : > { %v1641_v28 = vmul.f32 0.5, %v1640_v59 }
 0x463   : > { %v1642_v33 = vsub.f32 1.5, %v1641_v28 }
 0x465   : > { %v1643_v22 = vmul.f32 %v2822_v55, %v1642_v33 }
 0x467   : > { %v1647_v2 = vsel %vm1646_vm14, %v2822_v55, %v1643_v22 }
 0x468   : > { %v1648_v16 = vperm.slane %v1647_v2, 1 }
 0x46a   : > { %v1650_v14 = vmul.f32 %v1648_v16, %v1630_v15  ;;  %v1649_v27 = vmul.f32 %v1648_v16, %v1629_v18  ;;  %v1651_v20 = vmul.f32 %v1648_v16, %v1631_v6  ;;  %v1652_v26 = vmul.f32 %v1648_v16, %v1632_v34 }
 0x46b   : > { %v1653_v10 = vmul.f32 %v1648_v16, %v1633_v9  ;;  %v1654_v43 = vmul.f32 %v1648_v16, %v1634_v39  ;;  %v1655_v42 = vmul.f32 %v1648_v16, %v1635_v29  ;;  %v1656_v4 = vmul.f32 %v1648_v16, %v1636_v21 }
 0x46c   : > { %v1660_v44 = vmul.f32 %v2784_v38, %v1650_v14  ;;  %v1659_v11 = vmul.f32 %v2784_v38, %v1649_v27  ;;  %v1661_v50 = vmul.f32 %v2784_v38, %v1651_v20  ;;  %v1662_v46 = vmul.f32 %v2784_v38, %v1652_v26 }
 0x46d   : > { %v1663_v47 = vmul.f32 %v2784_v38, %v1653_v10  ;;  %v1664_v24 = vmul.f32 %v2784_v38, %v1654_v43  ;;  %v1665_v5 = vmul.f32 %v2784_v38, %v1655_v42  ;;  %v1666_v2 = vmul.f32 %v2784_v38, %v1656_v4 }
 0x46e   : > { %v3635_v25 = vadd.f32 %v2785_v13, %v1660_v44  ;;  %v3637_v30 = vadd.f32 %v2785_v13, %v1659_v11  ;;  %v3639_v31 = vadd.f32 %v2785_v13, %v1661_v50  ;;  %v3641_v48 = vadd.f32 %v2785_v13, %v1662_v46 }
 0x46f   : > { %v3643_v55 = vadd.f32 %v2785_v13, %v1663_v47  ;;  %v3645_v1 = vadd.f32 %v2785_v13, %v1664_v24  ;;  %v3652_v22 = vadd.f32 %v2785_v13, %v1665_v5  ;;  %v3656_v18 = vadd.f32 %v2785_v13, %v1666_v2 }
 0x470   : > { %v2551_v63 = vmul.f32 -1.442695, %v3635_v25  ;;  %v2550_v59 = vmul.f32 -1.442695, %v3637_v30  ;;  %v2552_v28 = vmul.f32 -1.442695, %v3639_v31 }
 0x471   : > { %v2553_v23 = vmul.f32 -1.442695, %v3641_v48  ;;  %v2554_v33 = vmul.f32 -1.442695, %v3643_v55  ;;  %v2555_v15 = vmul.f32 -1.442695, %v3645_v1 }
 0x472   : > { %2823 = vpow2.f32 %v2551_v63  ;;  %v2556_v16 = vmul.f32 -1.442695, %v3652_v22  ;;  %v2557_v38 = vmul.f32 -1.442695, %v3656_v18 }
 0x473   : > { %2825 = vpow2.f32 %v2550_v59 }
 0x474   : > { %2827 = vpow2.f32 %v2552_v28 }
 0x475   : > { %2829 = vpow2.f32 %v2553_v23 }
 0x476   : > { %2831 = vpow2.f32 %v2554_v33 }
 0x477   : > { %2833 = vpow2.f32 %v2555_v15 }
 0x478   : > { %v2824_v6 = vpop.eup %2823  ;;  %2835 = vpow2.f32 %v2556_v16 }
 0x479   : > { %v2826_v34 = vpop.eup %2825  ;;  %v3658_v9 = vadd.f32 1.0, %v2824_v6 }
 0x47a   : > { %v2828_v39 = vpop.eup %2827  ;;  %v3660_v29 = vadd.f32 1.0, %v2826_v34 }
 0x47b   : > { %v2830_v14 = vpop.eup %2829  ;;  %2837 = vrcp.f32 %v3658_v9  ;;  %v3665_v13 = vadd.f32 1.0, %v2828_v39  ;;  %v1733_v10 = vand.u32 2147483647, %v3658_v9  ;;  %v1735_v43 = vand.u32 2147483648, %v3658_v9 }
 0x47c   : > { %v2832_v27 = vpop.eup %2831  ;;  %2839 = vrcp.f32 %v3660_v29  ;;  %v3667_v26 = vadd.f32 1.0, %v2830_v14  ;;  %v1718_v21 = vand.u32 2147483647, %v3660_v29  ;;  %v1720_v44 = vand.u32 2147483648, %v3660_v29 }
 0x47d   : > { %v2834_v20 = vpop.eup %2833  ;;  %v3671_v42 = vadd.f32 1.0, %v2832_v27  ;;  %2841 = vpow2.f32 %v2557_v38  ;;  %v1750_v50 = vand.u32 2147483648, %v3665_v13  ;;  %vm1729_vm15 = vweird.f32 %v3658_v9 }
 0x47e   : > { %2843 = vrcp.f32 %v3665_v13  ;;  %v2836_v11 = vpop.eup %2835  ;;  %v3678_v46 = vadd.f32 1.0, %v2834_v20  ;;  %vm1714_vm1 = vweird.f32 %v3660_v29  ;;  %v1765_v24 = vand.u32 2147483648, %v3667_v26 }
 0x47f   : > { %2845 = vrcp.f32 %v3667_v26  ;;  %vm3685_vm3 = vcmp.eq.f32.partialorder %v1733_v10, 8.507059e+37  ;;  %v1736_v59 = vor.u32 1.1754944e-38, %v1735_v43  ;;  %v1748_v28 = vand.u32 2147483647, %v3665_v13 }
 0x480   : > { %2847 = vrcp.f32 %v3671_v42  ;;  %vm3691_vm4 = vcmp.eq.f32.partialorder %v1718_v21, 8.507059e+37  ;;  %v1721_v2 = vor.u32 1.1754944e-38, %v1720_v44  ;;  %v1763_v15 = vand.u32 2147483647, %v3667_v26 }
 0x481   : > { %v2838_v47 = vpop.eup %2837  ;;  %v1780_v16 = vand.u32 2147483648, %v3671_v42  ;;  %vm1744_vm5 = vweird.f32 %v3665_v13  ;;  %v1751_v39 = vor.u32 1.1754944e-38, %v1750_v50  ;;  %v1778_v38 = vand.u32 2147483647, %v3671_v42 }
 0x482   : > { %v2840_v5 = vpop.eup %2839  ;;  %v1725_v4 = vmul.f32 %v2838_v47, %v3658_v9  ;;  %2849 = vrcp.f32 %v3678_v46  ;;  %vm1730_vm6 = vweird.f32 %v2838_v47  ;;  %vm1759_vm7 = vweird.f32 %v3667_v26 }
 0x483   : > { %v1710_v23 = vmul.f32 %v2840_v5, %v3660_v29  ;;  %v3697_v6 = vpop.eup %2841  ;;  %v1766_v20 = vor.u32 1.1754944e-38, %v1765_v24  ;;  %v3703_v10 = vadd.f32 1.0, %v2836_v11  ;;  %vm1715_vm8 = vweird.f32 %v2840_v5  ;;  %vm1731_vm13 = vmor %vm1729_vm15, %vm1730_vm6 }
 0x484   : > { %v1726_v34 = vsub.f32 1.0, %v1725_v4  ;;  %v2844_v14 = vpop.eup %2843  ;;  %vm3706_vm9 = vcmp.eq.f32.partialorder %v1748_v28, 8.507059e+37  ;;  %v1781_v50 = vor.u32 1.1754944e-38, %v1780_v16  ;;  %vm3712_vm11 = vcmp.eq.f32.partialorder %v1763_v15, 8.507059e+37  ;;  %vm1716_vm0 = vmor %vm1714_vm1, %vm1715_vm8 }
 0x485   : > { %v1711_v27 = vsub.f32 1.0, %v1710_v23  ;;  %v2846_v43 = vpop.eup %2845  ;;  %v1740_v44 = vmul.f32 %v2844_v14, %v3665_v13  ;;  %vm1745_vm2 = vweird.f32 %v2844_v14  ;;  %v1793_v24 = vand.u32 2147483647, %v3678_v46 }
 0x486   : > { %v1727_v21 = vmul.f32 %v2838_v47, %v1726_v34  ;;  %v2848_v40 = vpop.eup %2847  ;;  %v1755_v23 = vmul.f32 %v2846_v43, %v3667_v26  ;;  %vm3718_vm12 = vcmp.eq.f32.partialorder %v1778_v38, 8.507059e+37  ;;  %v1795_v16 = vand.u32 2147483648, %v3678_v46  ;;  %vm1746_vm15 = vmor %vm1744_vm5, %vm1745_vm2 }
 0x487   : > { %v1712_v19 = vmul.f32 %v2840_v5, %v1711_v27  ;;  %v1741_v32 = vsub.f32 1.0, %v1740_v44  ;;  %v1770_v28 = vmul.f32 %v2848_v40, %v3671_v42  ;;  %vm1760_vm14 = vweird.f32 %v2846_v43 }
 0x488   : > { %v1728_v34 = vadd.f32 %v2838_v47, %v1727_v21  ;;  %v1756_v27 = vsub.f32 1.0, %v1755_v23  ;;  %2851 = vrcp.f32 %v3703_v10  ;;  %v3727_v62 = vpop.eup %2849  ;;  %vm1775_vm10 = vweird.f32 %v2848_v40  ;;  %vm1761_vm1 = vmor %vm1759_vm7, %vm1760_vm14 }
 0x489   : > { %v1713_v15 = vadd.f32 %v2840_v5, %v1712_v19  ;;  %v1742_v38 = vmul.f32 %v2844_v14, %v1741_v32  ;;  %v1771_v44 = vsub.f32 1.0, %v1770_v28  ;;  %v1785_v19 = vmul.f32 %v3727_v62, %v3678_v46 }
 0x48a   : > { %v1732_v21 = vsel %vm1731_vm13, %v2838_v47, %v1728_v34  ;;  %v1757_v58 = vmul.f32 %v2846_v43, %v1756_v27  ;;  %vm4105_vm5 = vcmask 1046528   ;;  %vm1789_vm6 = vweird.f32 %v3678_v46 }
 0x48b   : > { %v1737_v54 = vsel %vm3685_vm3, %v1736_v59, %v1732_v21  ;;  %v1717_v9 = vsel %vm1716_vm0, %v2840_v5, %v1713_v15  ;;  %v1743_v34 = vadd.f32 %v2844_v14, %v1742_v38  ;;  %v1772_v29 = vmul.f32 %v2848_v40, %v1771_v44  ;;  %vm4106_vm8 = vmmov %vm4105_vm5 }
 0x48c   : > { %v3737_v23 = vmul.f32 %v1737_v54, %v3635_v25  ;;  %v1722_v47 = vsel %vm3691_vm4, %v1721_v2, %v1717_v9  ;;  %v1758_v5 = vadd.f32 %v2846_v43, %v1757_v58  ;;  %v1786_v63 = vsub.f32 1.0, %v1785_v19  ;;  %vm4108_vm2 = vmmov %vm4105_vm5 }
 0x48d   : > { %v3742_v32 = vmul.f32 %v1722_v47, %v3637_v30  ;;  %vm1790_vm0 = vweird.f32 %v3727_v62  ;;  %v1747_v59 = vsel %vm1746_vm15, %v2844_v14, %v1743_v34  ;;  %v1773_v30 = vadd.f32 %v2848_v40, %v1772_v29  ;;  %vm4111_vm15 = vmmov %vm4108_vm2 }
 0x48e   : > { %v1927_v54 = vpack.c.bf16 %v3737_v23, %v3737_v23  ;;  %v1878_v25 = vrot.slane %v3737_v23, 1  ;;  %v3754_v33 = vpop.eup %2851  ;;  %v1752_v2 = vsel %vm3706_vm9, %v1751_v39, %v1747_v59  ;;  %v1762_v28 = vsel %vm1761_vm1, %v2846_v43, %v1758_v5  ;;  %vm1791_vm9 = vmor %vm1789_vm6, %vm1790_vm0  ;;  %v2566_v59 = vld [vmem:[%s4045_s10 + $0x44] sm:$0xf] }
 0x48f   : > { %v1926_v13 = vpack.c.bf16 %v3742_v32, %v3742_v32  ;;  %v1877_v58 = vrot.slane %v3742_v32, 1  ;;  %vm4104_vm3 = vweird.f32 %v3671_v42  ;;  %v1767_v26 = vsel %vm3712_vm11, %v1766_v20, %v1762_v28 }
 0x490   : > { %vm1776_vm4 = vmor %vm4104_vm3, %vm1775_vm10  ;;  %1944 = vrot.lane.b32.xlu2 %v1927_v54, %s2882_s25  ;;  %v3768_v14 = vmul.f32 %v1752_v2, %v3639_v31  ;;  %v1787_v27 = vmul.f32 %v3727_v62, %v1786_v63  ;;  %v3774_v43 = vmul.f32 %v1767_v26, %v3641_v48  ;;  %v1800_v4 = vmul.f32 %v3754_v33, %v3703_v10 }
 0x491   : > { %v1777_v15 = vsel %vm1776_vm4, %v2848_v40, %v1773_v30  ;;  %1942 = vrot.lane.b32.xlu0 %v1926_v13, %s2882_s25  ;;  %v1879_v39 = vsel %vm4105_vm5, %v1877_v58, %v1878_v25  ;;  %vm1794_vm7 = vcmp.eq.f32.partialorder %v1793_v24, 8.507059e+37  ;;  %vm4107_vm10 = vmmov %vm4105_vm5  ;;  %vm1805_vm11 = vweird.f32 %v3754_v33 }
 0x492   : > { %v1782_v42 = vsel %vm3718_vm12, %v1781_v50, %v1777_v15  ;;  %v1901_v20 = vmul.f32 %v1879_v39, %v3274_v53  ;;  %v1880_v31 = vrot.slane %v3768_v14, 1  ;;  %v1882_v11 = vrot.slane %v3774_v43, 1  ;;  %vm4112_vm3 = vmmov %vm4108_vm2 }
 0x493   : > { %v3783_v40 = vmul.f32 %v1782_v42, %v3643_v55  ;;  %v1788_v48 = vadd.f32 %v3727_v62, %v1787_v27  ;;  %v1801_v21 = vsub.f32 1.0, %v1800_v4  ;;  %v1796_v53 = vor.u32 1.1754944e-38, %v1795_v16 }
 0x494   : > { %v1975_v57 = vpack.c.bf16 %v1901_v20, %v1901_v20  ;;  %v1881_v50 = vsel %vm4106_vm8, %v1878_v25, %v1880_v31  ;;  %v1883_v55 = vsel %vm4107_vm10, %v1880_v31, %v1882_v11  ;;  %vm1804_vm12 = vweird.f32 %v3703_v10 }
 0x495   : > { %v1884_v38 = vrot.slane %v3783_v40, 1  ;;  %v1902_v44 = vmul.f32 %v1881_v50, %v3255_v3  ;;  %v1792_v46 = vsel %vm1791_vm9, %v3727_v62, %v1788_v48  ;;  %v1802_v9 = vmul.f32 %v3754_v33, %v1801_v21  ;;  %vm3803_vm13 = vmor %vm1804_vm12, %vm1805_vm11 }
 0x496   : > { %1991 = vrot.lane.b32.xlu1 %v1975_v57, %s2883_s26  ;;  %v1903_v24 = vmul.f32 %v1883_v55, %v3213_v41  ;;  %v1797_v47 = vsel %vm1794_vm7, %v1796_v53, %v1792_v46  ;;  %v1808_v3 = vand.u32 2147483647, %v3703_v10  ;;  %v1810_v5 = vand.u32 2147483648, %v3703_v10 }
 0x497   : > { %v1885_v19 = vsel %vm4108_vm2, %v1882_v11, %v1884_v38  ;;  %v1976_v34 = vpack.c.bf16 %v1902_v44, %v1902_v44  ;;  %v1803_v16 = vadd.f32 %v3754_v33, %v1802_v9  ;;  %v3809_v41 = vmul.f32 %v1797_v47, %v3645_v1  ;;  %v2040_v1 = vld [vmem:[%s4045_s10 + $0x20] sm:$0xf] }
 0x498   : > { %v1977_v62 = vpack.c.bf16 %v1903_v24, %v1903_v24  ;;  %v3812_v63 = vadd.f32 1.0, %v3697_v6  ;;  %v1904_v54 = vmul.f32 %v1885_v19, %v3373_v36  ;;  %v1811_v6 = vor.u32 1.1754944e-38, %v1810_v5 }
 0x499   : > { %1993 = vrot.lane.b32.xlu0 %v1976_v34, %s2883_s26  ;;  %v1807_v25 = vsel %vm3803_vm13, %v3754_v33, %v1803_v16  ;;  %v1886_v10 = vrot.slane %v3809_v41, 1  ;;  %v1928_v36 = vpack.c.bf16 %v3768_v14, %v3768_v14  ;;  %vm1809_vm14 = vcmp.eq.f32.partialorder %v1808_v3, 8.507059e+37 }
 0x49a   : > { %1995 = vrot.lane.b32.xlu2 %v1977_v62, %s2883_s26  ;;  %2853 = vrcp.f32 %v3812_v63  ;;  %v2089_v30 = vunpack.c.l.b16 %v2566_v59  ;;  %v1929_v33 = vpack.c.bf16 %v3774_v43, %v3774_v43  ;;  %v1812_v13 = vsel %vm1809_vm14, %v1811_v6, %v1807_v25  ;;  %vm4120_vm14 = vmmov %vm4112_vm3 }
 0x49b   : > { %v1887_v58 = vsel %vm4111_vm15, %v1884_v38, %v1886_v10  ;;  %v2168_v2 = vunpack.c.l.b16 %v2040_v1  ;;  %v1930_v28 = vpack.c.bf16 %v3783_v40, %v3783_v40  ;;  %v1978_v26 = vpack.c.bf16 %v1904_v54, %v1904_v54 }
 0x49c   : > { %v3836_v15 = vmul.f32 %v1812_v13, %v3652_v22  ;;  %vm2112_vm0 = vcmask 1043456   ;;  %v1905_v27 = vmul.f32 %v1887_v58, %v3268_v8  ;;  %v2094_v39 = vpack.c.b16 %v2089_v30, %v2089_v30 }
 0x49d   : > { %v2173_v42 = vpack.c.b16 %v2168_v2, %v2168_v2  ;;  %v1845_v4 = vrot.slane %v3742_v32, 7  ;;  %vm1819_vm1 = vweird.f32 %v3812_v63  ;;  %v1823_v31 = vand.u32 2147483647, %v3812_v63 }
 0x49e   : > { %1946 = vrot.lane.b32.xlu1 %v1928_v36, %s2882_s25  ;;  %v1888_v20 = vrot.slane %v3836_v15, 1  ;;  %v1825_v11 = vand.u32 2147483648, %v3812_v63  ;;  %v1846_v22 = vrot.slane %v3737_v23, 7  ;;  %v2114_v21 = vsel %vm2112_vm0, %v2094_v39, 0  ;;  %v2678_v23 = vld [vmem:[%s4045_s10 + $0x3c] sm:$0xff] }
 0x49f   : > { %v2191_v57 = vsel %vm2112_vm0, %v2173_v42, 0  ;;  %v1850_v8 = vrot.slane %v3774_v43, 7  ;;  %v1852_v50 = vrot.slane %v3783_v40, 7  ;;  %2119 = vmatpush.bf16.msrb.mxu3 %v2114_v21  ;;  %vm1917_vm4 = vcmask 191488   ;;  %v2674_v40 = vld [vmem:[%s4045_s10 + $0x18] sm:$0xff] }
 0x4a0   : > { %v2854_v48 = vpop.eup %2853  ;;  %v1889_v32 = vsel %vm4112_vm3, %v1886_v10, %v1888_v20  ;;  %vm4113_vm5 = vcmask 1040384   ;;  %v1979_v43 = vpack.c.bf16 %v1905_v27, %v1905_v27  ;;  %2196 = vmatpush.bf16.msrb.mxu2 %v2191_v57  ;;  %v1856_v16 = vrot.slane %v3836_v15, 7 }
 0x4a1   : > { %1948 = vrot.lane.b32.xlu0 %v1929_v33, %s2882_s25  ;;  %v1815_v38 = vmul.f32 %v2854_v48, %v3812_v63  ;;  %v1847_v53 = vsel %vm4113_vm5, %v1845_v4, %v1846_v22  ;;  %vm4114_vm6 = vmmov %vm4113_vm5  ;;  %v1906_v9 = vmul.f32 %v1889_v32, %v3401_v17  ;;  %v1848_v3 = vrot.slane %v3768_v14, 7  ;;  %v2671_v32 = vld [vmem:[%s4045_s10] sm:$0xff] }
 0x4a2   : > { %1950 = vrot.lane.b32.xlu2 %v1930_v28, %s2882_s25  ;;  %v1870_v55 = vmul.f32 %v1847_v53, %v3323_v56  ;;  %v1853_v44 = vsel %vm4114_vm6, %v1850_v8, %v1852_v50  ;;  %vm4115_vm7 = vmmov %vm4113_vm5  ;;  %v1854_v62 = vrot.slane %v3809_v41, 7  ;;  %vm1820_vm8 = vweird.f32 %v2854_v48  ;;  %v2684_v53 = vld [vmem:[%s4045_s10 + $0x50] sm:$0xff] }
 0x4a3   : > { %v1868_v46 = vsel %vm4115_vm7, 0.0, %v1845_v4  ;;  %v1816_v24 = vsub.f32 1.0, %v1815_v38  ;;  %v1873_v19 = vmul.f32 %v1853_v44, %v3474_v49  ;;  %2120 = vmatpush.bf16.msrb.mxu3 %v2678_v23  ;;  %vm4116_vm9 = vmmov %vm4113_vm5  ;;  %v1980_v1 = vpack.c.bf16 %v1906_v9, %v1906_v9  ;;  %v2685_v38 = vld [vmem:[%s4045_s10 + $0x58] sm:$0xff] }
 0x4a4   : > { %v1869_v47 = vmul.f32 %v1868_v46, %v3311_v45  ;;  %v1910_v34 = vpack.c.bf16 %v1870_v55, %v1870_v55  ;;  %2197 = vmatpush.bf16.msrb.mxu2 %v2674_v40  ;;  %v1849_v17 = vsel %vm4116_vm9, %v1846_v22, %v1848_v3  ;;  %vm4117_vm10 = vmmov %vm4113_vm5  ;;  %vm1824_vm12 = vcmp.eq.f32.partialorder %v1823_v31, 8.507059e+37  ;;  %v2615_v22 = vld [vmem:[%s4045_s10 + $0x68] sm:$0xf] }
 0x4a5   : > { %v1817_v29 = vmul.f32 %v2854_v48, %v1816_v24  ;;  %v1913_v56 = vpack.c.bf16 %v1873_v19, %v1873_v19  ;;  %v1851_v45 = vsel %vm4117_vm10, %v1848_v3, %v1850_v8  ;;  %vm4118_vm2 = vmmov %vm4113_vm5  ;;  %v1871_v14 = vmul.f32 %v1849_v17, %v3358_v61  ;;  %v2686_v8 = vld [vmem:[%s4045_s10 + $0x60] sm:$0xff]  ;;  %v2683_v40 = vld [vmem:[%s4045_s10 + $0x48] sm:$0xff] }
 0x4a6   : > { %v1909_v5 = vpack.c.bf16 %v1869_v47, %v1869_v47  ;;  %1997 = vrot.lane.b32.xlu1 %v1978_v26, %s2883_s26  ;;  %1919 = vst.msk [vmem:[#allocation3 + $0xc] sm:$0xf] %vm1917_vm4, %v1910_v34  ;;  %v1855_v49 = vsel %vm4118_vm2, %v1852_v50, %v1854_v62  ;;  %v1872_v25 = vmul.f32 %v1851_v45, %v3488_v0  ;;  %vm1821_vm11 = vmor %vm1819_vm1, %vm1820_vm8  ;;  %v1826_v6 = vor.u32 1.1754944e-38, %v1825_v11  ;;  %v2675_v50 = vld [vmem:[%s4045_s10 + $0x24] sm:$0xff] }
 0x4a7   : > { %v1818_v54 = vadd.f32 %v2854_v48, %v1817_v29  ;;  %1922 = vst.msk [vmem:[#allocation3 + $0x18] sm:$0xf] %vm1917_vm4, %v1913_v56  ;;  %v1874_v59 = vmul.f32 %v1855_v49, %v3500_v37  ;;  %vm4119_vm13 = vmmov %vm4118_vm2  ;;  %v1911_v30 = vpack.c.bf16 %v1871_v14, %v1871_v14  ;;  %v1931_v13 = vpack.c.bf16 %v3809_v41, %v3809_v41 }
 0x4a8   : > { %1918 = vst.msk [vmem:[#allocation3 + $0x8] sm:$0xf] %vm1917_vm4, %v1909_v5  ;;  %v1857_v10 = vsel %vm4119_vm13, %v1854_v62, %v1856_v16  ;;  %v1912_v61 = vpack.c.bf16 %v1872_v25, %v1872_v25  ;;  %vm4121_vm15 = vmmov %vm4118_vm2  ;;  %v4123_v55 = vmov 0   ;;  %vm2099_vm5 = vcmask 588800  }
 0x4a9   : > { %1999 = vrot.lane.b32.xlu0 %v1979_v43, %s2883_s26  ;;  %v1822_v36 = vsel %vm1821_vm11, %v2854_v48, %v1818_v54  ;;  %v1914_v33 = vpack.c.bf16 %v1874_v59, %v1874_v59  ;;  %v1875_v37 = vmul.f32 %v1857_v10, %v3470_v35  ;;  %1920 = vst.msk [vmem:[#allocation3 + $0x10] sm:$0xf] %vm1917_vm4, %v1911_v30  ;;  %vm4122_vm1 = vmmov %vm4112_vm3  ;;  %v2277_v48 = vunpack.c.l.b16 %v2615_v22 }
 0x4aa   : > { %2001 = vrot.lane.b32.xlu2 %v1980_v1, %s2883_s26  ;;  %v1827_v0 = vsel %vm1824_vm12, %v1826_v6, %v1822_v36  ;;  %1921 = vst.msk [vmem:[#allocation3 + $0x14] sm:$0xf] %vm1917_vm4, %v1912_v61  ;;  %v1932_v35 = vpack.c.bf16 %v3836_v15, %v3836_v15  ;;  %vm1966_vm3 = vcmask 388288   ;;  %vm4124_vm6 = vcmask 195584  }
 0x4ab   : > { %v1836_v63 = vmul.f32 %v1827_v0, %v3656_v18  ;;  %v1915_v58 = vpack.c.bf16 %v1875_v37, %v1875_v37  ;;  %1923 = vst.msk [vmem:[#allocation3 + $0x1c] sm:$0xf] %vm1917_vm4, %v1914_v33  ;;  %v2282_v21 = vpack.c.b16 %v2277_v48, %v2277_v48  ;;  %vm4125_vm7 = vmmov %vm4124_vm6  ;;  %v4126_v48 = vld [vmem:[#allocation4_spill] sm:$0xff] }
 0x4ac   : > { %vm4127_vm8 = vmmov %vm4124_vm6 }
 0x4ad   : > { %v1890_v2 = vrot.slane %v1836_v63, 1  ;;  %v1858_v28 = vrot.slane %v1836_v63, 7  ;;  %1924 = vst.msk [vmem:[#allocation3 + $0x20] sm:$0xf] %vm1917_vm4, %v1915_v58  ;;  %v1933_v26 = vpack.c.bf16 %v1836_v63, %v1836_v63  ;;  %v2300_v57 = vsel %vm2112_vm0, %v2282_v21, 0  ;;  %vm4129_vm9 = vmmov %vm4124_vm6 }
 0x4ae   : > { %1952 = vrot.lane.b32.xlu1 %v1931_v13, %s2882_s25  ;;  %2305 = vmatpush.bf16.msrb.mxu1 %v2300_v57  ;;  %vm535_vm0 = vcmask 584704   ;;  %v3979_v13 = vld [vmem:[%s4048_s13] ss:$0 sm:$0xff]  ;;  %vm4131_vm10 = vmmov %vm4124_vm6 }
 0x4af   : > { %v1891_v18 = vsel %vm4120_vm14, %v1888_v20, %v1890_v2  ;;  %v1859_v41 = vsel %vm4121_vm15, %v1856_v16, %v1858_v28  ;;  %v1900_v39 = vsel %vm4122_vm1, %v1890_v2, 0.0  ;;  %v2672_v20 = vld [vmem:[%s4045_s10 + $0x8] sm:$0xff]  ;;  %537 = vst.msk [vmem:[#allocation3 + $0x4] sm:$0xf] %vm535_vm0, %v4123_v55  ;;  %v3984_v28 = vld [vmem:[%s4046_s11] ss:$0 sm:$0xff]  ;;  %v649_v21 = vadd.f32 %v3979_v13, %v4126_v48  ;;  %vm4133_vm2 = vmmov %vm4124_vm6 }
 0x4b0   : > { %v1907_v27 = vmul.f32 %v1891_v18, %v3415_v7  ;;  %v1876_v42 = vmul.f32 %v1859_v41, %v3483_v52  ;;  %v1908_v31 = vmul.f32 %v1900_v39, %v3423_v51  ;;  %v2677_v7 = vld [vmem:[%s4045_s10 + $0x34] sm:$0xff]  ;;  %v2676_v51 = vld [vmem:[%s4045_s10 + $0x2c] sm:$0xff]  ;;  %538 = vst.msk [vmem:[#allocation3 + $0x28] sm:$0xf] %vm535_vm0, %v4123_v55  ;;  %v644_v18 = vadd.f32 %v3979_v13, %v3519_v12  ;;  %vm4135_vm11 = vmmov %vm4133_vm2 }
 0x4b1   : > { %1954 = vrot.lane.b32.xlu0 %v1932_v35, %s2882_s25  ;;  %v2673_v52 = vld [vmem:[%s4045_s10 + $0x10] sm:$0xff]  ;;  %2121 = vmatpush.bf16.msrb.mxu3 %v2677_v7  ;;  %v646_v12 = vadd.f32 %v3979_v13, %v3521_v60  ;;  %vm4137_vm12 = vmmov %vm4133_vm2 }
 0x4b2   : > { %1956 = vrot.lane.b32.xlu2 %v1933_v26, %s2882_s25  ;;  %v1916_v4 = vpack.c.bf16 %v1876_v42, %v1876_v42  ;;  %v1981_v11 = vpack.c.bf16 %v1907_v27, %v1907_v27  ;;  %v1982_v15 = vpack.c.bf16 %v1908_v31, %v1908_v31  ;;  %2198 = vmatpush.bf16.msrb.mxu2 %v2673_v52 }
 0x4b3   : > { %2306 = vmatpush.bf16.msrb.mxu1 %v2686_v8 }
 0x4b4   : > { %1925 = vst.msk [vmem:[#allocation3 + $0x24] sm:$0xf] %vm1917_vm4, %v1916_v4  ;;  %vm2015_vm4 = vcmask 585088  }
 0x4b5   : > { %2122 = vmatpush.bf16.msrb.mxu3 %v2676_v51 }
 0x4b6   : > { %2003 = vrot.lane.b32.xlu1 %v1981_v11, %s2883_s26  ;;  %2199 = vmatpush.bf16.msrb.mxu2 %v2672_v20 }
 0x4b7   : > { %2307 = vmatpush.bf16.msrb.mxu1 %v2685_v38 }
 0x4b9   : > { %2005 = vrot.lane.b32.xlu0 %v1982_v15, %s2883_s26  ;;  %2123 = vmatpush.bf16.msrb.mxu3 %v2675_v50 }
 0x4ba   : > { %2200 = vmatpush.bf16.msrb.mxu2 %v2671_v32 }
 0x4bb   : > { %2308 = vmatpush.bf16.msrb.mxu1 %v2684_v53  ;;  %v4128_v53 = vld [vmem:[#allocation5_spill] sm:$0xff] }
 0x4bf   : > { %2309 = vmatpush.bf16.msrb.mxu1 %v2683_v40 }
 0x4ea   : > { %v1945_v23 = vpop.permute.xlu2 %1944 }
 0x4eb   : > { %1968 = vst.msk [vmem:[#allocation3 + $0xc] sm:$0xf] %vm1966_vm3, %v1945_v23 }
 0x4f4   : > { %v1996_v43 = vpop.permute.xlu2 %1995 }
 0x4fc   : > { %v1951_v44 = vpop.permute.xlu2 %1950 }
 0x4fd   : > { %1971 = vst.msk [vmem:[#allocation3 + $0x18] sm:$0xf] %vm1966_vm3, %v1951_v44 }
 0x503   : > { %v1943_v46 = vpop.permute.xlu0 %1942 }
 0x504   : > { %v2002_v9 = vpop.permute.xlu2 %2001  ;;  %1967 = vst.msk [vmem:[#allocation3 + $0x8] sm:$0xf] %vm1966_vm3, %v1943_v46 }
 0x508   : > { %v1992_v24 = vpop.permute.xlu1 %1991 }
 0x509   : > { %2016 = vst.msk [vmem:[#allocation3 + $0x8] sm:$0xf] %vm2015_vm4, %v1992_v24 }
 0x50b   : > { %v1994_v19 = vpop.permute.xlu0 %1993 }
 0x50c   : > { %v1957_v47 = vpop.permute.xlu2 %1956  ;;  %2017 = vst.msk [vmem:[#allocation3 + $0xc] sm:$0xf] %vm2015_vm4, %v1994_v19 }
 0x50d   : > { %1974 = vst.msk [vmem:[#allocation3 + $0x24] sm:$0xf] %vm1966_vm3, %v1957_v47  ;;  %v4130_v47 = vld [vmem:[#allocation6_spill] sm:$0xff] }
 0x510   : > { %v1947_v34 = vpop.permute.xlu1 %1946  ;;  %v2751_v16 = vld [vmem:[#allocation3 + $0x4] sm:$0xff]  }
 0x511   : > { %1969 = vst.msk [vmem:[#allocation3 + $0x10] sm:$0xf] %vm1966_vm3, %v1947_v34  ;;  %2603 = vmatmul.msk.bf16.vlgmr.msrb.gmra.mxu2 %vm2099_vm5, %v2751_v16  ;;  %v654_v34 = vadd.f32 %v3979_v13, %v4130_v47 }
 0x512   : > { %2018 = vst.msk [vmem:[#allocation3 + $0x10] sm:$0xf] %vm2015_vm4, %v1996_v43  ;;  %v651_v43 = vadd.f32 %v3979_v13, %v4128_v53 }
 0x513   : > { %v1949_v3 = vpop.permute.xlu0 %1948  ;;  %v2728_v62 = vld [vmem:[#allocation3 + $0x8] sm:$0xff]  }
 0x514   : > { %1970 = vst.msk [vmem:[#allocation3 + $0x14] sm:$0xf] %vm1966_vm3, %v1949_v3  ;;  %2583 = vmatmul.msk.bf16.vlgmr.msrb.gmra.mxu3 %vm2099_vm5, %v2728_v62 }
 0x518   : > { %v1998_v29 = vpop.permute.xlu1 %1997 }
 0x519   : > { %2019 = vst.msk [vmem:[#allocation3 + $0x14] sm:$0xf] %vm2015_vm4, %v1998_v29  ;;  %v2679_v56 = vld [vmem:[#allocation3 + $0xc] sm:$0xff] }
 0x51a   : > { %2648 = vmatmul.msk.bf16.vlgmr.msrb.gmra.mxu1 %vm2099_vm5, %v2679_v56  ;;  %v2753_v45 = vld [vmem:[#allocation3 + $0xc] sm:$0xff]  }
 0x51b   : > { %v2000_v5 = vpop.permute.xlu0 %1999 }
 0x51c   : > { %2020 = vst.msk [vmem:[#allocation3 + $0x18] sm:$0xf] %vm2015_vm4, %v2000_v5 }
 0x520   : > { %v1953_v17 = vpop.permute.xlu1 %1952  ;;  %v2729_v54 = vld [vmem:[#allocation3 + $0x10] sm:$0xff]  }
 0x521   : > { %1972 = vst.msk [vmem:[#allocation3 + $0x1c] sm:$0xf] %vm1966_vm3, %v1953_v17  ;;  %2604 = vmatmul.msk.bf16.gmra.mxu2 %vm2099_vm5, %v2753_v45  ;;  %v4132_v45 = vld [vmem:[#allocation7_spill] sm:$0xff] }
 0x522   : > { %2021 = vst.msk [vmem:[#allocation3 + $0x1c] sm:$0xf] %vm2015_vm4, %v2002_v9 }
 0x523   : > { %v1955_v49 = vpop.permute.xlu0 %1954  ;;  %v2680_v25 = vld [vmem:[#allocation3 + $0x14] sm:$0xff] }
 0x524   : > { %1973 = vst.msk [vmem:[#allocation3 + $0x20] sm:$0xf] %vm1966_vm3, %v1955_v49  ;;  %2584 = vmatmul.msk.bf16.gmra.mxu3 %vm2099_vm5, %v2729_v54  ;;  %v2754_v1 = vld [vmem:[#allocation3 + $0x14] sm:$0xff]   ;;  %v656_v49 = vadd.f32 %v3979_v13, %v4132_v45 }
 0x528   : > { %v2004_v14 = vpop.permute.xlu1 %2003 }
 0x529   : > { %2022 = vst.msk [vmem:[#allocation3 + $0x20] sm:$0xf] %vm2015_vm4, %v2004_v14  ;;  %v2730_v6 = vld [vmem:[#allocation3 + $0x18] sm:$0xff]  }
 0x52a   : > { %2649 = vmatmul.msk.bf16.gmra.mxu1 %vm2099_vm5, %v2680_v25  ;;  %v2871_v10 = vld [vmem:[#allocation3 + $0x1c] sm:$0xf] }
 0x52b   : > { %v2006_v59 = vpop.permute.xlu0 %2005 }
 0x52c   : > { %2023 = vst.msk [vmem:[#allocation3 + $0x24] sm:$0xf] %vm2015_vm4, %v2006_v59 }
 0x530   : > { %v2681_v36 = vld [vmem:[#allocation3 + $0x1c] sm:$0xff] }
 0x531   : > { %2605 = vmatmul.msk.bf16.gmra.mxu2 %vm2099_vm5, %v2754_v1  ;;  %v2872_v61 = vld [vmem:[#allocation3 + $0x1c] sm:$0xf0]  }
 0x532   : > { %v2868_v33 = vor.u32 %v2872_v61, %v2871_v10 }
 0x533   : > { %v2031_v30 = vld [vmem:[#allocation3 + $0x20] sm:$0xff]  }
 0x534   : > { %2585 = vmatmul.msk.bf16.gmra.mxu3 %vm2099_vm5, %v2730_v6  ;;  %v2682_v0 = vld [vmem:[#allocation3 + $0x24] sm:$0xff] }
 0x53a   : > { %2650 = vmatmul.msk.bf16.gmra.mxu1 %vm2099_vm5, %v2681_v36  ;;  %v4134_v36 = vld [vmem:[#allocation8_spill] sm:$0xff] }
 0x541   : > { %2606 = vmatmul.msk.bf16.gmra.mxu2 %vm2099_vm5, %v2868_v33 }
 0x544   : > { %2586 = vmatmul.msk.bf16.gmra.mxu3 %vm2099_vm5, %v2031_v30  ;;  %v659_v30 = vadd.f32 %v3979_v13, %v4134_v36 }
 0x54a   : > { %2651 = vmatmul.msk.bf16.gmra.mxu1 %vm2099_vm5, %v2682_v0 }
 0x594   : > { %v2202_v37 = vpop.f32.mrf.mxu2 }
 0x597   : > { %v2125_v63 = vpop.f32.mrf.mxu3  ;;  %v2311_v2 = vpop.f32.mrf.mxu1 }
 0x598   : > { %v2203_v58 = vadd.f32 %v2202_v37, %v2125_v63 }
 0x59a   : > { %v2331_v35 = vadd.f32 %v2311_v2, %v2203_v58 }
 0x59c   : > { %v2343_v41 = vadd.f32 %v3984_v28, %v2331_v35  ;;  %v2204_v26 = vpop.f32.mrf.mxu2  ;;  %v4136_v35 = vld [vmem:[#allocation9_spill] sm:$0xff] }
 0x59e   : > { %v2351_v27 = vadd.f32 %v2343_v41, %v644_v18  ;;  %v661_v18 = vadd.f32 %v3979_v13, %v4136_v35 }
 0x59f   : > { %v2127_v39 = vpop.f32.mrf.mxu3  ;;  %v2313_v4 = vpop.f32.mrf.mxu1 }
 0x5a0   : > { %2359 = vst.msk [vmem:[%s3993_s24] sm:$0xff] %vm4124_vm6, %v2351_v27  ;;  %v2205_v42 = vadd.f32 %v2204_v26, %v2127_v39 }
 0x5a2   : > { %v2332_v31 = vadd.f32 %v2313_v4, %v2205_v42 }
 0x5a4   : > { %v2344_v11 = vadd.f32 %v3984_v28, %v2332_v31  ;;  %v2207_v15 = vpop.f32.mrf.mxu2 }
 0x5a6   : > { %v2352_v7 = vadd.f32 %v2344_v11, %v646_v12 }
 0x5a7   : > { %v2130_v52 = vpop.f32.mrf.mxu3  ;;  %v2316_v20 = vpop.f32.mrf.mxu1 }
 0x5a8   : > { %2360 = vst.msk [vmem:[%s3993_s24 + $0x8] sm:$0xff] %vm4125_vm7, %v2352_v7  ;;  %v2208_v51 = vadd.f32 %v2207_v15, %v2130_v52 }
 0x5aa   : > { %v2333_v22 = vadd.f32 %v2316_v20, %v2208_v51 }
 0x5ac   : > { %v2345_v57 = vadd.f32 %v3984_v28, %v2333_v22  ;;  %v2209_v8 = vpop.f32.mrf.mxu2 }
 0x5ae   : > { %v2353_v50 = vadd.f32 %v2345_v57, %v649_v21 }
 0x5af   : > { %v2132_v32 = vpop.f32.mrf.mxu3  ;;  %v2318_v38 = vpop.f32.mrf.mxu1 }
 0x5b0   : > { %2361 = vst.msk [vmem:[%s3993_s24 + $0x10] sm:$0xff] %vm4127_vm8, %v2353_v50  ;;  %v2210_v60 = vadd.f32 %v2209_v8, %v2132_v32 }
 0x5b2   : > { %v2334_v23 = vadd.f32 %v2318_v38, %v2210_v60 }
 0x5b4   : > { %v2346_v40 = vadd.f32 %v3984_v28, %v2334_v23  ;;  %v2212_v55 = vpop.f32.mrf.mxu2 }
 0x5b6   : > { %v2354_v44 = vadd.f32 %v2346_v40, %v651_v43 }
 0x5b7   : > { %v2135_v46 = vpop.f32.mrf.mxu3  ;;  %v2321_v24 = vpop.f32.mrf.mxu1 }
 0x5b8   : > { %2362 = vst.msk [vmem:[%s3993_s24 + $0x18] sm:$0xff] %vm4129_vm9, %v2354_v44  ;;  %v2213_v9 = vadd.f32 %v2212_v55, %v2135_v46 }
 0x5ba   : > { %v2335_v19 = vadd.f32 %v2321_v24, %v2213_v9 }
 0x5bc   : > { %v2347_v16 = vadd.f32 %v3984_v28, %v2335_v19  ;;  %v2214_v3 = vpop.f32.mrf.mxu2 }
 0x5be   : > { %v2355_v62 = vadd.f32 %v2347_v16, %v654_v34 }
 0x5bf   : > { %v2137_v29 = vpop.f32.mrf.mxu3  ;;  %v2323_v5 = vpop.f32.mrf.mxu1 }
 0x5c0   : > { %2363 = vst.msk [vmem:[%s3993_s24 + $0x20] sm:$0xff] %vm4131_vm10, %v2355_v62  ;;  %v2215_v56 = vadd.f32 %v2214_v3, %v2137_v29 }
 0x5c2   : > { %v2336_v17 = vadd.f32 %v2323_v5, %v2215_v56 }
 0x5c4   : > { %v2348_v54 = vadd.f32 %v3984_v28, %v2336_v17  ;;  %v2217_v14 = vpop.f32.mrf.mxu2 }
 0x5c6   : > { %v2356_v25 = vadd.f32 %v2348_v54, %v656_v49 }
 0x5c7   : > { %v2140_v59 = vpop.f32.mrf.mxu3  ;;  %v2326_v6 = vpop.f32.mrf.mxu1 }
 0x5c8   : > { %2364 = vst.msk [vmem:[%s3993_s24 + $0x28] sm:$0xff] %vm4133_vm2, %v2356_v25  ;;  %v2218_v1 = vadd.f32 %v2217_v14, %v2140_v59 }
 0x5ca   : > { %v2337_v10 = vadd.f32 %v2326_v6, %v2218_v1 }
 0x5cc   : > { %v2349_v61 = vadd.f32 %v3984_v28, %v2337_v10  ;;  %v2219_v0 = vpop.f32.mrf.mxu2 }
 0x5ce   : > { %v2357_v33 = vadd.f32 %v2349_v61, %v659_v30 }
 0x5cf   : > { %v2142_v37 = vpop.f32.mrf.mxu3  ;;  %v2328_v58 = vpop.f32.mrf.mxu1 }
 0x5d0   : > { %2365 = vst.msk [vmem:[%s3993_s24 + $0x30] sm:$0xff] %vm4135_vm11, %v2357_v33  ;;  %v2220_v63 = vadd.f32 %v2219_v0, %v2142_v37 }
 0x5d2   : > { %v2338_v2 = vadd.f32 %v2328_v58, %v2220_v63 }
 0x5d4   : > { %v2350_v41 = vadd.f32 %v3984_v28, %v2338_v2 }
 0x5d6   : > { %v2358_v26 = vadd.f32 %v2350_v41, %v661_v18 }
 0x5d8   : > { %2366 = vst.msk [vmem:[%s3993_s24 + $0x38] sm:$0xff] %vm4137_vm12, %v2358_v26 }
 0x5d9 PF: > { %s25_s18 = sadd.s32 1, %s2875_s18  }
 0x5da   : > { %p22_p4 = scmp.ge.s32.totalorder %s25_s18, 4  }
 0x5dc   :  { %24 = sbr.rel (!%p22_p4) target bundleno = 1 (0x1), region = 120 }

</bundles_post_ra>
